<compile_context>
chip_gen: v7x
topology: tpu7x:2x2x1
jax: 0.10.0
libtpu: 0.0.40
codegen_flags: <defaults>
</compile_context>

<pallas_src>
import jax
import jax.numpy as jnp
from jax.experimental import pallas as pl
from jax.experimental.pallas import tpu as pltpu

BN_EPS = 1e-5
KERNEL = 4                 # ConvTranspose2d kernel size used throughout DCGAN
FUSED_CHUNK = 512          # in-kernel M chunk width (bounds vreg pressure)
MAX_FUSED_CHUNKS = 8       # fused single-pass path handles per-phase M <= 4096


def _vmem_capacity_bytes():
    """Physical per-TensorCore VMEM (64 MiB on v7x, 128 MiB on v5e/v6e)."""
    try:
        cap = getattr(pltpu.get_tpu_info(), "vmem_capacity_bytes", None)
        if cap:
            return int(cap)
    except Exception:
        pass
    return 64 << 20        # conservative (v7x-sized) fallback


# ~48 MiB on v7x, ~96 MiB on v5e/v6e.
VMEM_LIMIT = min(_vmem_capacity_bytes() * 3 // 4, 100 << 20)
TILE_BUDGET = (VMEM_LIMIT * 4) // 5


def _round_up(x, r):
    return ((x + r - 1) // r) * r


# ----------------------------- Pallas kernels ------------------------------

def _make_fused_bn_relu_kernel(nph, n_chunks, tc, inv_count):
    """Single-pass ConvT-matmul + BatchNorm(batch stats) + ReLU.

    All phase matmuls land in a VMEM f32 scratch (no HBM round trip of Y);
    the M axis is processed in <= FUSED_CHUNK chunks so the per-chunk
    (Cout, tc) f32 temporaries stay vreg/VMEM friendly.
    """
    def kernel(w_ref, p_ref, g_ref, b_ref, o_ref, y_scr):
        cout = w_ref.shape[1]
        s1 = jnp.zeros((cout, 1), jnp.float32)
        s2 = jnp.zeros((cout, 1), jnp.float32)
        for ph in range(nph):                       # static unroll (1 or 4)
            w_ph = w_ref[ph]
            for c in range(n_chunks):               # static unroll
                lo = c * tc
                y = jnp.dot(w_ph, p_ref[ph, :, lo:lo + tc],
                            preferred_element_type=jnp.float32)
                y_scr[ph, :, lo:lo + tc] = y
                s1 = s1 + jnp.sum(y, axis=1, keepdims=True)
                s2 = s2 + jnp.sum(y * y, axis=1, keepdims=True)
        mean = s1 * inv_count
        var = jnp.maximum(s2 * inv_count - mean * mean, 0.0)
        scale = g_ref[...] * jax.lax.rsqrt(var + BN_EPS)
        shift = b_ref[...] - mean * scale
        for ph in range(nph):
            for c in range(n_chunks):
                lo = c * tc
                yn = y_scr[ph, :, lo:lo + tc] * scale + shift
                o_ref[ph, :, lo:lo + tc] = jnp.maximum(yn, 0.0).astype(o_ref.dtype)
    return kernel


def _mm_stats_kernel(w_ref, p_ref, y_ref, stats_ref):
    # Two-pass BN, pass 1: matmul tile -> bf16 Y + per-tile partial moments
    # written with one lane-contiguous store.
    y = jnp.dot(w_ref[0], p_ref[0], preferred_element_type=jnp.float32)
    y_ref[0] = y.astype(y_ref.dtype)
    s1 = jnp.sum(y, axis=1, keepdims=True)
    s2 = jnp.sum(y * y, axis=1, keepdims=True)
    stats_ref[0] = jnp.concatenate([s1, s2], axis=1)


def _bn_relu_apply_kernel(y_ref, scale_ref, shift_ref, o_ref):
    # Two-pass BN, pass 2: y*scale + shift, ReLU (bf16 in / bf16 out).
    y = y_ref[0].astype(jnp.float32)
    o_ref[0] = jnp.maximum(y * scale_ref[...] + shift_ref[...], 0.0).astype(o_ref.dtype)


def _mm_tanh_kernel(w_ref, p_ref, o_ref):
    y = jnp.dot(w_ref[0], p_ref[0], preferred_element_type=jnp.float32)
    o_ref[0] = jnp.tanh(y).astype(o_ref.dtype)


# --------------------------- pallas_call wrappers ---------------------------

def _pick_tile_m(m, kdim, cout, budget=TILE_BUDGET):
    """Largest M tile (multiple of 128) whose double-buffered working set fits
    the generation-aware VMEM budget."""
    cap = min(_round_up(m, 128), 4096)
    best, t = 128, 128
    while t <= cap:
        need = (2 * kdim * t * 2          # double-buffered bf16 patch tile
                + 2 * cout * t * 2        # double-buffered bf16 Y / out tile
                + 2 * cout * kdim * 2     # resident weights
                + (1 << 20))              # stats / semaphores / internals
        if need <= budget:
            best = t
        t += 128
    return best


def _fused_footprint_bytes(nph, kdim, cout, m):
    patch = nph * kdim * m * 2
    wmat = nph * cout * kdim * 2
    outb = nph * cout * m * 2
    yscr = nph * cout * m * 4
    return 2 * (patch + wmat + outb) + yscr + (1 << 20)


def _pallas_fused_bn_relu(wms, pts, gamma, beta, count):
    nph, cout, kdim = wms.shape
    m = pts.shape[2]
    if m > FUSED_CHUNK:
        tc = FUSED_CHUNK
        mp = _round_up(m, tc)
        if mp != m:                       # zero columns do not change the moments
            pts = jnp.pad(pts, ((0, 0), (0, 0), (0, mp - m)))
    else:
        tc, mp = m, m
    n_chunks = mp // tc
    kernel = _make_fused_bn_relu_kernel(nph, n_chunks, tc, 1.0 / count)
    out = pl.pallas_call(
        kernel,
        out_shape=jax.ShapeDtypeStruct((nph, cout, mp), jnp.bfloat16),
        grid=(1,),
        in_specs=[
            pl.BlockSpec((nph, cout, kdim), lambda i: (0, 0, 0)),
            pl.BlockSpec((nph, kdim, mp), lambda i: (0, 0, 0)),
            pl.BlockSpec((cout, 1), lambda i: (0, 0)),
            pl.BlockSpec((cout, 1), lambda i: (0, 0)),
        ],
        out_specs=pl.BlockSpec((nph, cout, mp), lambda i: (0, 0, 0)),
        scratch_shapes=[pltpu.VMEM((nph, cout, mp), jnp.float32)],
        compiler_params=pltpu.CompilerParams(
            dimension_semantics=("arbitrary",),
            vmem_limit_bytes=VMEM_LIMIT),
    )(wms, pts, gamma.reshape(-1, 1), beta.reshape(-1, 1))
    return out[:, :, :m]


def _pallas_bn_relu_two_pass(wms, pts, gamma, beta, count):
    nph, cout, kdim = wms.shape
    m = pts.shape[2]
    tm = _pick_tile_m(m, kdim, cout)
    mp = _round_up(m, tm)
    if mp != m:
        pts = jnp.pad(pts, ((0, 0), (0, 0), (0, mp - m)))
    nt = mp // tm

    y, stats = pl.pallas_call(
        _mm_stats_kernel,
        out_shape=(jax.ShapeDtypeStruct((nph, cout, mp), jnp.bfloat16),
                   jax.ShapeDtypeStruct((nph * nt, cout, 2), jnp.float32)),
        grid=(nph, nt),
        in_specs=[
            pl.BlockSpec((1, cout, kdim), lambda p, t: (p, 0, 0)),
            pl.BlockSpec((1, kdim, tm), lambda p, t: (p, 0, t)),
        ],
        out_specs=(pl.BlockSpec((1, cout, tm), lambda p, t: (p, 0, t)),
                   pl.BlockSpec((1, cout, 2), lambda p, t: (p * nt + t, 0, 0))),
        compiler_params=pltpu.CompilerParams(
            dimension_semantics=("parallel", "parallel"),
            vmem_limit_bytes=VMEM_LIMIT),
    )(wms, pts)

    s = jnp.sum(stats, axis=0)                        # (Cout, 2), full N*Ho*Wo extent
    mean = s[:, 0] / count
    var = jnp.maximum(s[:, 1] / count - mean * mean, 0.0)
    scale = gamma * jax.lax.rsqrt(var + BN_EPS)
    shift = beta - mean * scale

    out = pl.pallas_call(
        _bn_relu_apply_kernel,
        out_shape=jax.ShapeDtypeStruct((nph, cout, mp), jnp.bfloat16),
        grid=(nph, nt),
        in_specs=[
            pl.BlockSpec((1, cout, tm), lambda p, t: (p, 0, t)),
            pl.BlockSpec((cout, 1), lambda p, t: (0, 0)),
            pl.BlockSpec((cout, 1), lambda p, t: (0, 0)),
        ],
        out_specs=pl.BlockSpec((1, cout, tm), lambda p, t: (p, 0, t)),
        compiler_params=pltpu.CompilerParams(
            dimension_semantics=("parallel", "parallel"),
            vmem_limit_bytes=VMEM_LIMIT),
    )(y, scale.reshape(-1, 1), shift.reshape(-1, 1))
    return out[:, :, :m]


def _pallas_mm_tanh(wms, pts):
    nph, cout, kdim = wms.shape
    m = pts.shape[2]
    tm = _pick_tile_m(m, kdim, cout)
    mp = _round_up(m, tm)
    if mp != m:
        pts = jnp.pad(pts, ((0, 0), (0, 0), (0, mp - m)))
    nt = mp // tm
    out = pl.pallas_call(
        _mm_tanh_kernel,
        out_shape=jax.ShapeDtypeStruct((nph, cout, mp), jnp.float32),
        grid=(nph, nt),
        in_specs=[
            pl.BlockSpec((1, cout, kdim), lambda p, t: (p, 0, 0)),
            pl.BlockSpec((1, kdim, tm), lambda p, t: (p, 0, t)),
        ],
        out_specs=pl.BlockSpec((1, cout, tm), lambda p, t: (p, 0, t)),
        compiler_params=pltpu.CompilerParams(
            dimension_semantics=("parallel", "parallel"),
            vmem_limit_bytes=VMEM_LIMIT),
    )(wms, pts)
    return out[:, :, :m]


# --------------------- XLA glue: patches / weights / interleave -------------

def _patches_s1(x, padding):
    """stride-1 ConvTranspose == conv(pad = K-1-padding, flipped kernel).
    x: (Cin, N, H, W) -> P^T (1, Cin*K*K, N*Ho*Wo)."""
    c, n, h, w = x.shape
    pad = KERNEL - 1 - padding
    xp = jnp.pad(x, ((0, 0), (0, 0), (pad, pad), (pad, pad)))
    ho, wo = h + 2 * pad - KERNEL + 1, w + 2 * pad - KERNEL + 1
    views = [xp[:, :, kh:kh + ho, kw:kw + wo]
             for kh in range(KERNEL) for kw in range(KERNEL)]
    pt = jnp.stack(views, axis=1).reshape(c * KERNEL * KERNEL, n * ho * wo)
    return pt[None], (n, ho, wo)


def _weights_s1(w_t):
    """(Cin, Cout, 4, 4) ConvTranspose weight -> (1, Cout, Cin*16), flipped."""
    cin, cout = w_t.shape[0], w_t.shape[1]
    w_flip = w_t[:, :, ::-1, ::-1]
    return w_flip.transpose(1, 0, 2, 3).reshape(cout, cin * KERNEL * KERNEL)[None]


def _patches_s2(x):
    """stride-2 / pad-1 ConvTranspose, sub-pixel decomposition.
    x: (Cin, N, H, W) -> P^T (4, Cin*4, N*H*W); phase p = 2*py + px is the
    dense 2x2 conv producing out[..., 2j+py, 2i+px]."""
    c, n, h, w = x.shape
    xp = jnp.pad(x, ((0, 0), (0, 0), (1, 1), (1, 1)))
    phases = []
    for py in (0, 1):
        for px in (0, 1):
            views = [xp[:, :, py + dh:py + dh + h, px + dw:px + dw + w]
                     for dh in (0, 1) for dw in (0, 1)]
            phases.append(jnp.stack(views, axis=1).reshape(c * 4, n * h * w))
    return jnp.stack(phases, axis=0), (n, h, w)


def _weights_s2(w_t):
    """(Cin, Cout, 4, 4) ConvTranspose weight -> (4, Cout, Cin*4) phase
    sub-kernels, tap order (ci, dh, dw) matching _patches_s2."""
    cin, cout = w_t.shape[0], w_t.shape[1]
    mats = []
    for py in (0, 1):
        khs = [3, 1] if py == 0 else [2, 0]
        for px in (0, 1):
            kws = [3, 1] if px == 0 else [2, 0]
            sub = w_t[:, :, khs, :][:, :, :, kws]          # (Cin, Cout, 2, 2)
            mats.append(sub.transpose(1, 0, 2, 3).reshape(cout, cin * 4))
    return jnp.stack(mats, axis=0)


def _interleave_s2(yp, cout, n, h, w):
    """(4, Cout, N*H*W) phase outputs -> (Cout, N, 2H, 2W)."""
    y = yp.reshape(2, 2, cout, n, h, w)
    y = y.transpose(2, 3, 4, 0, 5, 1)                      # (Cout, N, H, py, W, px)
    return y.reshape(cout, n, 2 * h, 2 * w)


# ------------------------------- layer glue ---------------------------------

def _convT_bn_relu(h, w_t, gamma, beta, stride, padding):
    """h: channel-major (Cin, N, H, W) bf16 -> (Cout, N, Ho, Wo) bf16."""
    cout = w_t.shape[1]
    if stride == 1:
        pts, (n, ho, wo) = _patches_s1(h, padding)
        wms = _weights_s1(w_t)
    else:
        pts, (n, hi, wi) = _patches_s2(h)
        wms = _weights_s2(w_t)
        ho, wo = 2 * hi, 2 * wi
    pts = pts.astype(jnp.bfloat16)
    wms = wms.astype(jnp.bfloat16)
    nph, kdim, m = pts.shape
    count = nph * m                                   # true N*Ho*Wo (pads excluded)
    gamma = gamma.astype(jnp.float32)
    beta = beta.astype(jnp.float32)
    if (m <= FUSED_CHUNK * MAX_FUSED_CHUNKS and
            _fused_footprint_bytes(nph, kdim, cout, m) <= VMEM_LIMIT):
        out = _pallas_fused_bn_relu(wms, pts, gamma, beta, count)
    else:
        out = _pallas_bn_relu_two_pass(wms, pts, gamma, beta, count)
    if stride == 1:
        return out[0].reshape(cout, n, ho, wo)
    return _interleave_s2(out, cout, n, ho // 2, wo // 2)


def _convT_tanh(h, w_t):
    """Final DCGAN layer: ConvTranspose(4, stride 2, pad 1) + Tanh, no BN."""
    cout = w_t.shape[1]
    pts, (n, hi, wi) = _patches_s2(h)
    wms = _weights_s2(w_t)
    out = _pallas_mm_tanh(wms.astype(jnp.bfloat16), pts.astype(jnp.bfloat16))
    return _interleave_s2(out, cout, n, hi, wi)          # (Cout, N, 2H, 2W) f32


def generator_forward(x, params):
    """x: NCHW (N, latent, 1, 1) f32 -> NCHW (N, num_channels, 64*, 64*) f32."""
    h = x.astype(jnp.bfloat16).transpose(1, 0, 2, 3)      # channel-major (C, N, 1, 1)
    # hidden_0: ConvT(latent, 8d, 4, 1, 0) + BN + ReLU
    h = _convT_bn_relu(h, params["w0"], params["g0"], params["b0"], 1, 0)
    # hidden_1..3: ConvT(c_in, c_out, 4, 2, 1) + BN + ReLU
    h = _convT_bn_relu(h, params["w1"], params["g1"], params["b1"], 2, 1)
    h = _convT_bn_relu(h, params["w2"], params["g2"], params["b2"], 2, 1)
    h = _convT_bn_relu(h, params["w3"], params["g3"], params["b3"], 2, 1)
    # out: ConvT(depth, num_channels, 4, 2, 1) + Tanh
    y = _convT_tanh(h, params["w4"])                      # (C, N, H, W) f32
    return y.transpose(1, 0, 2, 3).astype(jnp.float32)    # back to NCHW


def init_params(key, depth=8, latent_size=16, num_channels=3):
    keys = jax.random.split(key, 16)
    d8, d4, d2, d1 = depth * 8, depth * 4, depth * 2, depth

    def w(k, cin, cout):
        return (0.05 * jax.random.normal(k, (cin, cout, KERNEL, KERNEL))).astype(jnp.float32)

    params = {
        "w0": w(keys[0], latent_size, d8),
        "w1": w(keys[1], d8, d4),
        "w2": w(keys[2], d4, d2),
        "w3": w(keys[3], d2, d1),
        "w4": w(keys[4], d1, num_channels),
    }
    for i, c in enumerate([d8, d4, d2, d1]):
        params[f"g{i}"] = (1.0 + 0.1 * jax.random.normal(keys[5 + i], (c,))).astype(jnp.float32)
        params[f"b{i}"] = (0.1 * jax.random.normal(keys[9 + i], (c,))).astype(jnp.float32)
    return params


if __name__ == "__main__":
    depth, latent_size, num_channels, batch = 8, 16, 3, 2
    key = jax.random.PRNGKey(0)
    k_param, k_x = jax.random.split(key)
    params = init_params(k_param, depth=depth, latent_size=latent_size,
                         num_channels=num_channels)
    # DCGAN latent input: (N, latent_size, 1, 1), NCHW
    x = jax.random.normal(k_x, (batch, latent_size, 1, 1), dtype=jnp.float32)

    fwd = jax.jit(generator_forward)
    out = jax.block_until_ready(fwd(x, params))

    expected = (batch, num_channels, 64, 64)
    assert out.shape == expected, (out.shape, expected)
    assert out.dtype == jnp.float32
    assert bool(jnp.all(jnp.isfinite(out)))
    assert bool(jnp.all(jnp.abs(out) <= 1.0 + 1e-6))  # tanh output range
    print("KERNEL_OK")
</pallas_src>

<mosaic_0001>
module attributes {stable_mosaic.version = 11 : i64} {
  func.func @kernel(%arg0: i32, %arg1: memref<1x64x256xbf16, #tpu.memory_space<vmem>>, %arg2: memref<1x256x32xbf16, #tpu.memory_space<vmem>>, %arg3: memref<64x1xf32, #tpu.memory_space<vmem>>, %arg4: memref<64x1xf32, #tpu.memory_space<vmem>>, %arg5: memref<1x64x32xbf16, #tpu.memory_space<vmem>>, %arg6: memref<1x64x32xf32, #tpu.memory_space<vmem>>) attributes {dimension_semantics = [#tpu.dimension_semantics<arbitrary>], iteration_bounds = array<i64: 1>, scalar_prefetch = 0 : i64, scratch_operands = 1 : i64, tpu.core_type = #tpu.core_type<tc>, window_params = [{pipeline_mode = #tpu.pipeline_mode<synchronous>, transform_indices = @transform_0, window_bounds = array<i64: 1, 64, 256>}, {pipeline_mode = #tpu.pipeline_mode<synchronous>, transform_indices = @transform_1, window_bounds = array<i64: 1, 256, 32>}, {pipeline_mode = #tpu.pipeline_mode<synchronous>, transform_indices = @transform_2, window_bounds = array<i64: 64, 1>}, {pipeline_mode = #tpu.pipeline_mode<synchronous>, transform_indices = @transform_3, window_bounds = array<i64: 64, 1>}, {pipeline_mode = #tpu.pipeline_mode<synchronous>, transform_indices = @transform_4, window_bounds = array<i64: 1, 64, 32>}]} {
    %cst = arith.constant 0.000000e+00 : f32
    %0 = vector.broadcast %cst : f32 to vector<64x1xf32>
    %cst_0 = arith.constant 0.000000e+00 : f32
    %1 = vector.broadcast %cst_0 : f32 to vector<64x1xf32>
    %c0 = arith.constant 0 : index
    %c0_1 = arith.constant 0 : index
    %c0_2 = arith.constant 0 : index
    %2 = vector.load %arg1[%c0, %c0_1, %c0_2] : memref<1x64x256xbf16, #tpu.memory_space<vmem>>, vector<1x64x256xbf16>
    %3 = vector.shape_cast %2 : vector<1x64x256xbf16> to vector<64x256xbf16>
    %c0_3 = arith.constant 0 : index
    %c0_4 = arith.constant 0 : index
    %c0_5 = arith.constant 0 : index
    %4 = vector.load %arg2[%c0_3, %c0_4, %c0_5] : memref<1x256x32xbf16, #tpu.memory_space<vmem>>, vector<1x256x32xbf16>
    %5 = vector.shape_cast %4 : vector<1x256x32xbf16> to vector<256x32xbf16>
    %cst_6 = arith.constant dense<0.000000e+00> : vector<64x32xf32>
    %6 = tpu.matmul %3, %5, %cst_6 {dimension_numbers = #tpu.dot_dimension_numbers<[1], [0], [0], [1], [0, 0, 1, 1], [], []>} : vector<64x256xbf16>, vector<256x32xbf16>, vector<64x32xf32> -> vector<64x32xf32>
    %c0_7 = arith.constant 0 : index
    %c0_8 = arith.constant 0 : index
    %c0_9 = arith.constant 0 : index
    %7 = vector.load %arg6[%c0_7, %c0_8, %c0_9] : memref<1x64x32xf32, #tpu.memory_space<vmem>>, vector<1x64x32xf32>
    %8 = vector.shape_cast %7 : vector<1x64x32xf32> to vector<64x32xf32>
    %9 = vector.shape_cast %6 : vector<64x32xf32> to vector<1x64x32xf32>
    tpu.vector_store %arg6[%c0_7, %c0_8, %c0_9], %9 {strides = array<i32>} : memref<1x64x32xf32, #tpu.memory_space<vmem>>, vector<1x64x32xf32>,
    %cst_10 = arith.constant dense<0.000000e+00> : vector<64xf32>
    %10 = vector.multi_reduction <add>, %6, %cst_10 [1] : vector<64x32xf32> to vector<64xf32>
    %11 = vector.shape_cast %10 : vector<64xf32> to vector<64x1xf32>
    %12 = arith.addf %0, %11 : vector<64x1xf32>
    %13 = arith.mulf %6, %6 : vector<64x32xf32>
    %cst_11 = arith.constant dense<0.000000e+00> : vector<64xf32>
    %14 = vector.multi_reduction <add>, %13, %cst_11 [1] : vector<64x32xf32> to vector<64xf32>
    %15 = vector.shape_cast %14 : vector<64xf32> to vector<64x1xf32>
    %16 = arith.addf %1, %15 : vector<64x1xf32>
    %cst_12 = arith.constant 3.125000e-02 : f32
    %17 = vector.broadcast %cst_12 : f32 to vector<64x1xf32>
    %18 = arith.mulf %12, %17 : vector<64x1xf32>
    %cst_13 = arith.constant 3.125000e-02 : f32
    %19 = vector.broadcast %cst_13 : f32 to vector<64x1xf32>
    %20 = arith.mulf %16, %19 : vector<64x1xf32>
    %21 = arith.mulf %18, %18 : vector<64x1xf32>
    %22 = arith.subf %20, %21 : vector<64x1xf32>
    %cst_14 = arith.constant 0.000000e+00 : f32
    %23 = vector.broadcast %cst_14 : f32 to vector<64x1xf32>
    %24 = arith.maximumf %22, %23 : vector<64x1xf32>
    %c0_15 = arith.constant 0 : index
    %c0_16 = arith.constant 0 : index
    %25 = vector.load %arg3[%c0_15, %c0_16] : memref<64x1xf32, #tpu.memory_space<vmem>>, vector<64x1xf32>
    %cst_17 = arith.constant 9.99999974E-6 : f32
    %26 = vector.broadcast %cst_17 : f32 to vector<64x1xf32>
    %27 = arith.addf %24, %26 : vector<64x1xf32>
    %28 = math.rsqrt %27 : vector<64x1xf32>
    %29 = arith.mulf %25, %28 : vector<64x1xf32>
    %c0_18 = arith.constant 0 : index
    %c0_19 = arith.constant 0 : index
    %30 = vector.load %arg4[%c0_18, %c0_19] : memref<64x1xf32, #tpu.memory_space<vmem>>, vector<64x1xf32>
    %31 = arith.mulf %18, %29 : vector<64x1xf32>
    %32 = arith.subf %30, %31 : vector<64x1xf32>
    %c0_20 = arith.constant 0 : index
    %c0_21 = arith.constant 0 : index
    %c0_22 = arith.constant 0 : index
    %33 = vector.load %arg6[%c0_20, %c0_21, %c0_22] : memref<1x64x32xf32, #tpu.memory_space<vmem>>, vector<1x64x32xf32>
    %34 = vector.shape_cast %33 : vector<1x64x32xf32> to vector<64x32xf32>
    %35 = vector.broadcast %29 : vector<64x1xf32> to vector<64x32xf32>
    %36 = arith.mulf %34, %35 : vector<64x32xf32>
    %37 = vector.broadcast %32 : vector<64x1xf32> to vector<64x32xf32>
    %38 = arith.addf %36, %37 : vector<64x32xf32>
    %cst_23 = arith.constant 0.000000e+00 : f32
    %39 = vector.broadcast %cst_23 : f32 to vector<64x32xf32>
    %40 = arith.maximumf %38, %39 : vector<64x32xf32>
    %41 = arith.truncf %40 : vector<64x32xf32> to vector<64x32xbf16>
    %c0_24 = arith.constant 0 : index
    %c0_25 = arith.constant 0 : index
    %c0_26 = arith.constant 0 : index
    %42 = vector.load %arg5[%c0_24, %c0_25, %c0_26] : memref<1x64x32xbf16, #tpu.memory_space<vmem>>, vector<1x64x32xbf16>
    %43 = vector.shape_cast %42 : vector<1x64x32xbf16> to vector<64x32xbf16>
    %44 = vector.shape_cast %41 : vector<64x32xbf16> to vector<1x64x32xbf16>
    tpu.vector_store %arg5[%c0_24, %c0_25, %c0_26], %44 {strides = array<i32>} : memref<1x64x32xbf16, #tpu.memory_space<vmem>>, vector<1x64x32xbf16>,
    return
  }
  func.func @transform_0(%arg0: i32) -> (i32, i32, i32) {
    %c0_i32 = arith.constant 0 : i32
    %c0_i32_0 = arith.constant 0 : i32
    %c0_i32_1 = arith.constant 0 : i32
    %c0_i32_2 = arith.constant 0 : i32
    return %c0_i32, %c0_i32_0, %c0_i32_1 : i32, i32, i32
  }
  func.func @transform_1(%arg0: i32) -> (i32, i32, i32) {
    %c0_i32 = arith.constant 0 : i32
    %c0_i32_0 = arith.constant 0 : i32
    %c0_i32_1 = arith.constant 0 : i32
    %c0_i32_2 = arith.constant 0 : i32
    return %c0_i32, %c0_i32_0, %c0_i32_1 : i32, i32, i32
  }
  func.func @transform_2(%arg0: i32) -> (i32, i32) {
    %c0_i32 = arith.constant 0 : i32
    %c0_i32_0 = arith.constant 0 : i32
    %c0_i32_1 = arith.constant 0 : i32
    return %c0_i32, %c0_i32_0 : i32, i32
  }
  func.func @transform_3(%arg0: i32) -> (i32, i32) {
    %c0_i32 = arith.constant 0 : i32
    %c0_i32_0 = arith.constant 0 : i32
    %c0_i32_1 = arith.constant 0 : i32
    return %c0_i32, %c0_i32_0 : i32, i32
  }
  func.func @transform_4(%arg0: i32) -> (i32, i32, i32) {
    %c0_i32 = arith.constant 0 : i32
    %c0_i32_0 = arith.constant 0 : i32
    %c0_i32_1 = arith.constant 0 : i32
    %c0_i32_2 = arith.constant 0 : i32
    return %c0_i32, %c0_i32_0, %c0_i32_1 : i32, i32, i32
  }
}

module attributes {stable_mosaic.version = 11 : i64} {
  func.func @kernel(%arg0: i32, %arg1: memref<4x32x256xbf16, #tpu.memory_space<vmem>>, %arg2: memref<4x256x32xbf16, #tpu.memory_space<vmem>>, %arg3: memref<32x1xf32, #tpu.memory_space<vmem>>, %arg4: memref<32x1xf32, #tpu.memory_space<vmem>>, %arg5: memref<4x32x32xbf16, #tpu.memory_space<vmem>>, %arg6: memref<4x32x32xf32, #tpu.memory_space<vmem>>) attributes {dimension_semantics = [#tpu.dimension_semantics<arbitrary>], iteration_bounds = array<i64: 1>, scalar_prefetch = 0 : i64, scratch_operands = 1 : i64, tpu.core_type = #tpu.core_type<tc>, window_params = [{pipeline_mode = #tpu.pipeline_mode<synchronous>, transform_indices = @transform_0, window_bounds = array<i64: 4, 32, 256>}, {pipeline_mode = #tpu.pipeline_mode<synchronous>, transform_indices = @transform_1, window_bounds = array<i64: 4, 256, 32>}, {pipeline_mode = #tpu.pipeline_mode<synchronous>, transform_indices = @transform_2, window_bounds = array<i64: 32, 1>}, {pipeline_mode = #tpu.pipeline_mode<synchronous>, transform_indices = @transform_3, window_bounds = array<i64: 32, 1>}, {pipeline_mode = #tpu.pipeline_mode<synchronous>, transform_indices = @transform_4, window_bounds = array<i64: 4, 32, 32>}]} {
    %cst = arith.constant 0.000000e+00 : f32
    %0 = vector.broadcast %cst : f32 to vector<32x1xf32>
    %cst_0 = arith.constant 0.000000e+00 : f32
    %1 = vector.broadcast %cst_0 : f32 to vector<32x1xf32>
    %c0 = arith.constant 0 : index
    %c0_1 = arith.constant 0 : index
    %c0_2 = arith.constant 0 : index
    %2 = vector.load %arg1[%c0, %c0_1, %c0_2] : memref<4x32x256xbf16, #tpu.memory_space<vmem>>, vector<1x32x256xbf16>
    %3 = vector.shape_cast %2 : vector<1x32x256xbf16> to vector<32x256xbf16>
    %c0_3 = arith.constant 0 : index
    %c0_4 = arith.constant 0 : index
    %c0_5 = arith.constant 0 : index
    %4 = vector.load %arg2[%c0_3, %c0_4, %c0_5] : memref<4x256x32xbf16, #tpu.memory_space<vmem>>, vector<1x256x32xbf16>
    %5 = vector.shape_cast %4 : vector<1x256x32xbf16> to vector<256x32xbf16>
    %cst_6 = arith.constant dense<0.000000e+00> : vector<32x32xf32>
    %6 = tpu.matmul %3, %5, %cst_6 {dimension_numbers = #tpu.dot_dimension_numbers<[1], [0], [0], [1], [0, 0, 1, 1], [], []>} : vector<32x256xbf16>, vector<256x32xbf16>, vector<32x32xf32> -> vector<32x32xf32>
    %c0_7 = arith.constant 0 : index
    %c0_8 = arith.constant 0 : index
    %c0_9 = arith.constant 0 : index
    %7 = vector.load %arg6[%c0_7, %c0_8, %c0_9] : memref<4x32x32xf32, #tpu.memory_space<vmem>>, vector<1x32x32xf32>
    %8 = vector.shape_cast %7 : vector<1x32x32xf32> to vector<32x32xf32>
    %9 = vector.shape_cast %6 : vector<32x32xf32> to vector<1x32x32xf32>
    tpu.vector_store %arg6[%c0_7, %c0_8, %c0_9], %9 {strides = array<i32>} : memref<4x32x32xf32, #tpu.memory_space<vmem>>, vector<1x32x32xf32>,
    %cst_10 = arith.constant dense<0.000000e+00> : vector<32xf32>
    %10 = vector.multi_reduction <add>, %6, %cst_10 [1] : vector<32x32xf32> to vector<32xf32>
    %11 = vector.shape_cast %10 : vector<32xf32> to vector<32x1xf32>
    %12 = arith.addf %0, %11 : vector<32x1xf32>
    %13 = arith.mulf %6, %6 : vector<32x32xf32>
    %cst_11 = arith.constant dense<0.000000e+00> : vector<32xf32>
    %14 = vector.multi_reduction <add>, %13, %cst_11 [1] : vector<32x32xf32> to vector<32xf32>
    %15 = vector.shape_cast %14 : vector<32xf32> to vector<32x1xf32>
    %16 = arith.addf %1, %15 : vector<32x1xf32>
    %c1 = arith.constant 1 : index
    %c0_12 = arith.constant 0 : index
    %c0_13 = arith.constant 0 : index
    %17 = vector.load %arg1[%c1, %c0_12, %c0_13] : memref<4x32x256xbf16, #tpu.memory_space<vmem>>, vector<1x32x256xbf16>
    %18 = vector.shape_cast %17 : vector<1x32x256xbf16> to vector<32x256xbf16>
    %c1_14 = arith.constant 1 : index
    %c0_15 = arith.constant 0 : index
    %c0_16 = arith.constant 0 : index
    %19 = vector.load %arg2[%c1_14, %c0_15, %c0_16] : memref<4x256x32xbf16, #tpu.memory_space<vmem>>, vector<1x256x32xbf16>
    %20 = vector.shape_cast %19 : vector<1x256x32xbf16> to vector<256x32xbf16>
    %cst_17 = arith.constant dense<0.000000e+00> : vector<32x32xf32>
    %21 = tpu.matmul %18, %20, %cst_17 {dimension_numbers = #tpu.dot_dimension_numbers<[1], [0], [0], [1], [0, 0, 1, 1], [], []>} : vector<32x256xbf16>, vector<256x32xbf16>, vector<32x32xf32> -> vector<32x32xf32>
    %c1_18 = arith.constant 1 : index
    %c0_19 = arith.constant 0 : index
    %c0_20 = arith.constant 0 : index
    %22 = vector.load %arg6[%c1_18, %c0_19, %c0_20] : memref<4x32x32xf32, #tpu.memory_space<vmem>>, vector<1x32x32xf32>
    %23 = vector.shape_cast %22 : vector<1x32x32xf32> to vector<32x32xf32>
    %24 = vector.shape_cast %21 : vector<32x32xf32> to vector<1x32x32xf32>
    tpu.vector_store %arg6[%c1_18, %c0_19, %c0_20], %24 {strides = array<i32>} : memref<4x32x32xf32, #tpu.memory_space<vmem>>, vector<1x32x32xf32>,
    %cst_21 = arith.constant dense<0.000000e+00> : vector<32xf32>
    %25 = vector.multi_reduction <add>, %21, %cst_21 [1] : vector<32x32xf32> to vector<32xf32>
    %26 = vector.shape_cast %25 : vector<32xf32> to vector<32x1xf32>
    %27 = arith.addf %12, %26 : vector<32x1xf32>
    %28 = arith.mulf %21, %21 : vector<32x32xf32>
    %cst_22 = arith.constant dense<0.000000e+00> : vector<32xf32>
    %29 = vector.multi_reduction <add>, %28, %cst_22 [1] : vector<32x32xf32> to vector<32xf32>
    %30 = vector.shape_cast %29 : vector<32xf32> to vector<32x1xf32>
    %31 = arith.addf %16, %30 : vector<32x1xf32>
    %c2 = arith.constant 2 : index
    %c0_23 = arith.constant 0 : index
    %c0_24 = arith.constant 0 : index
    %32 = vector.load %arg1[%c2, %c0_23, %c0_24] : memref<4x32x256xbf16, #tpu.memory_space<vmem>>, vector<1x32x256xbf16>
    %33 = vector.shape_cast %32 : vector<1x32x256xbf16> to vector<32x256xbf16>
    %c2_25 = arith.constant 2 : index
    %c0_26 = arith.constant 0 : index
    %c0_27 = arith.constant 0 : index
    %34 = vector.load %arg2[%c2_25, %c0_26, %c0_27] : memref<4x256x32xbf16, #tpu.memory_space<vmem>>, vector<1x256x32xbf16>
    %35 = vector.shape_cast %34 : vector<1x256x32xbf16> to vector<256x32xbf16>
    %cst_28 = arith.constant dense<0.000000e+00> : vector<32x32xf32>
    %36 = tpu.matmul %33, %35, %cst_28 {dimension_numbers = #tpu.dot_dimension_numbers<[1], [0], [0], [1], [0, 0, 1, 1], [], []>} : vector<32x256xbf16>, vector<256x32xbf16>, vector<32x32xf32> -> vector<32x32xf32>
    %c2_29 = arith.constant 2 : index
    %c0_30 = arith.constant 0 : index
    %c0_31 = arith.constant 0 : index
    %37 = vector.load %arg6[%c2_29, %c0_30, %c0_31] : memref<4x32x32xf32, #tpu.memory_space<vmem>>, vector<1x32x32xf32>
    %38 = vector.shape_cast %37 : vector<1x32x32xf32> to vector<32x32xf32>
    %39 = vector.shape_cast %36 : vector<32x32xf32> to vector<1x32x32xf32>
    tpu.vector_store %arg6[%c2_29, %c0_30, %c0_31], %39 {strides = array<i32>} : memref<4x32x32xf32, #tpu.memory_space<vmem>>, vector<1x32x32xf32>,
    %cst_32 = arith.constant dense<0.000000e+00> : vector<32xf32>
    %40 = vector.multi_reduction <add>, %36, %cst_32 [1] : vector<32x32xf32> to vector<32xf32>
    %41 = vector.shape_cast %40 : vector<32xf32> to vector<32x1xf32>
    %42 = arith.addf %27, %41 : vector<32x1xf32>
    %43 = arith.mulf %36, %36 : vector<32x32xf32>
    %cst_33 = arith.constant dense<0.000000e+00> : vector<32xf32>
    %44 = vector.multi_reduction <add>, %43, %cst_33 [1] : vector<32x32xf32> to vector<32xf32>
    %45 = vector.shape_cast %44 : vector<32xf32> to vector<32x1xf32>
    %46 = arith.addf %31, %45 : vector<32x1xf32>
    %c3 = arith.constant 3 : index
    %c0_34 = arith.constant 0 : index
    %c0_35 = arith.constant 0 : index
    %47 = vector.load %arg1[%c3, %c0_34, %c0_35] : memref<4x32x256xbf16, #tpu.memory_space<vmem>>, vector<1x32x256xbf16>
    %48 = vector.shape_cast %47 : vector<1x32x256xbf16> to vector<32x256xbf16>
    %c3_36 = arith.constant 3 : index
    %c0_37 = arith.constant 0 : index
    %c0_38 = arith.constant 0 : index
    %49 = vector.load %arg2[%c3_36, %c0_37, %c0_38] : memref<4x256x32xbf16, #tpu.memory_space<vmem>>, vector<1x256x32xbf16>
    %50 = vector.shape_cast %49 : vector<1x256x32xbf16> to vector<256x32xbf16>
    %cst_39 = arith.constant dense<0.000000e+00> : vector<32x32xf32>
    %51 = tpu.matmul %48, %50, %cst_39 {dimension_numbers = #tpu.dot_dimension_numbers<[1], [0], [0], [1], [0, 0, 1, 1], [], []>} : vector<32x256xbf16>, vector<256x32xbf16>, vector<32x32xf32> -> vector<32x32xf32>
    %c3_40 = arith.constant 3 : index
    %c0_41 = arith.constant 0 : index
    %c0_42 = arith.constant 0 : index
    %52 = vector.load %arg6[%c3_40, %c0_41, %c0_42] : memref<4x32x32xf32, #tpu.memory_space<vmem>>, vector<1x32x32xf32>
    %53 = vector.shape_cast %52 : vector<1x32x32xf32> to vector<32x32xf32>
    %54 = vector.shape_cast %51 : vector<32x32xf32> to vector<1x32x32xf32>
    tpu.vector_store %arg6[%c3_40, %c0_41, %c0_42], %54 {strides = array<i32>} : memref<4x32x32xf32, #tpu.memory_space<vmem>>, vector<1x32x32xf32>,
    %cst_43 = arith.constant dense<0.000000e+00> : vector<32xf32>
    %55 = vector.multi_reduction <add>, %51, %cst_43 [1] : vector<32x32xf32> to vector<32xf32>
    %56 = vector.shape_cast %55 : vector<32xf32> to vector<32x1xf32>
    %57 = arith.addf %42, %56 : vector<32x1xf32>
    %58 = arith.mulf %51, %51 : vector<32x32xf32>
    %cst_44 = arith.constant dense<0.000000e+00> : vector<32xf32>
    %59 = vector.multi_reduction <add>, %58, %cst_44 [1] : vector<32x32xf32> to vector<32xf32>
    %60 = vector.shape_cast %59 : vector<32xf32> to vector<32x1xf32>
    %61 = arith.addf %46, %60 : vector<32x1xf32>
    %cst_45 = arith.constant 7.812500e-03 : f32
    %62 = vector.broadcast %cst_45 : f32 to vector<32x1xf32>
    %63 = arith.mulf %57, %62 : vector<32x1xf32>
    %cst_46 = arith.constant 7.812500e-03 : f32
    %64 = vector.broadcast %cst_46 : f32 to vector<32x1xf32>
    %65 = arith.mulf %61, %64 : vector<32x1xf32>
    %66 = arith.mulf %63, %63 : vector<32x1xf32>
    %67 = arith.subf %65, %66 : vector<32x1xf32>
    %cst_47 = arith.constant 0.000000e+00 : f32
    %68 = vector.broadcast %cst_47 : f32 to vector<32x1xf32>
    %69 = arith.maximumf %67, %68 : vector<32x1xf32>
    %c0_48 = arith.constant 0 : index
    %c0_49 = arith.constant 0 : index
    %70 = vector.load %arg3[%c0_48, %c0_49] : memref<32x1xf32, #tpu.memory_space<vmem>>, vector<32x1xf32>
    %cst_50 = arith.constant 9.99999974E-6 : f32
    %71 = vector.broadcast %cst_50 : f32 to vector<32x1xf32>
    %72 = arith.addf %69, %71 : vector<32x1xf32>
    %73 = math.rsqrt %72 : vector<32x1xf32>
    %74 = arith.mulf %70, %73 : vector<32x1xf32>
    %c0_51 = arith.constant 0 : index
    %c0_52 = arith.constant 0 : index
    %75 = vector.load %arg4[%c0_51, %c0_52] : memref<32x1xf32, #tpu.memory_space<vmem>>, vector<32x1xf32>
    %76 = arith.mulf %63, %74 : vector<32x1xf32>
    %77 = arith.subf %75, %76 : vector<32x1xf32>
    %c0_53 = arith.constant 0 : index
    %c0_54 = arith.constant 0 : index
    %c0_55 = arith.constant 0 : index
    %78 = vector.load %arg6[%c0_53, %c0_54, %c0_55] : memref<4x32x32xf32, #tpu.memory_space<vmem>>, vector<1x32x32xf32>
    %79 = vector.shape_cast %78 : vector<1x32x32xf32> to vector<32x32xf32>
    %80 = vector.broadcast %74 : vector<32x1xf32> to vector<32x32xf32>
    %81 = arith.mulf %79, %80 : vector<32x32xf32>
    %82 = vector.broadcast %77 : vector<32x1xf32> to vector<32x32xf32>
    %83 = arith.addf %81, %82 : vector<32x32xf32>
    %cst_56 = arith.constant 0.000000e+00 : f32
    %84 = vector.broadcast %cst_56 : f32 to vector<32x32xf32>
    %85 = arith.maximumf %83, %84 : vector<32x32xf32>
    %86 = arith.truncf %85 : vector<32x32xf32> to vector<32x32xbf16>
    %c0_57 = arith.constant 0 : index
    %c0_58 = arith.constant 0 : index
    %c0_59 = arith.constant 0 : index
    %87 = vector.load %arg5[%c0_57, %c0_58, %c0_59] : memref<4x32x32xbf16, #tpu.memory_space<vmem>>, vector<1x32x32xbf16>
    %88 = vector.shape_cast %87 : vector<1x32x32xbf16> to vector<32x32xbf16>
    %89 = vector.shape_cast %86 : vector<32x32xbf16> to vector<1x32x32xbf16>
    tpu.vector_store %arg5[%c0_57, %c0_58, %c0_59], %89 {strides = array<i32>} : memref<4x32x32xbf16, #tpu.memory_space<vmem>>, vector<1x32x32xbf16>,
    %c1_60 = arith.constant 1 : index
    %c0_61 = arith.constant 0 : index
    %c0_62 = arith.constant 0 : index
    %90 = vector.load %arg6[%c1_60, %c0_61, %c0_62] : memref<4x32x32xf32, #tpu.memory_space<vmem>>, vector<1x32x32xf32>
    %91 = vector.shape_cast %90 : vector<1x32x32xf32> to vector<32x32xf32>
    %92 = vector.broadcast %74 : vector<32x1xf32> to vector<32x32xf32>
    %93 = arith.mulf %91, %92 : vector<32x32xf32>
    %94 = vector.broadcast %77 : vector<32x1xf32> to vector<32x32xf32>
    %95 = arith.addf %93, %94 : vector<32x32xf32>
    %cst_63 = arith.constant 0.000000e+00 : f32
    %96 = vector.broadcast %cst_63 : f32 to vector<32x32xf32>
    %97 = arith.maximumf %95, %96 : vector<32x32xf32>
    %98 = arith.truncf %97 : vector<32x32xf32> to vector<32x32xbf16>
    %c1_64 = arith.constant 1 : index
    %c0_65 = arith.constant 0 : index
    %c0_66 = arith.constant 0 : index
    %99 = vector.load %arg5[%c1_64, %c0_65, %c0_66] : memref<4x32x32xbf16, #tpu.memory_space<vmem>>, vector<1x32x32xbf16>
    %100 = vector.shape_cast %99 : vector<1x32x32xbf16> to vector<32x32xbf16>
    %101 = vector.shape_cast %98 : vector<32x32xbf16> to vector<1x32x32xbf16>
    tpu.vector_store %arg5[%c1_64, %c0_65, %c0_66], %101 {strides = array<i32>} : memref<4x32x32xbf16, #tpu.memory_space<vmem>>, vector<1x32x32xbf16>,
    %c2_67 = arith.constant 2 : index
    %c0_68 = arith.constant 0 : index
    %c0_69 = arith.constant 0 : index
    %102 = vector.load %arg6[%c2_67, %c0_68, %c0_69] : memref<4x32x32xf32, #tpu.memory_space<vmem>>, vector<1x32x32xf32>
    %103 = vector.shape_cast %102 : vector<1x32x32xf32> to vector<32x32xf32>
    %104 = vector.broadcast %74 : vector<32x1xf32> to vector<32x32xf32>
    %105 = arith.mulf %103, %104 : vector<32x32xf32>
    %106 = vector.broadcast %77 : vector<32x1xf32> to vector<32x32xf32>
    %107 = arith.addf %105, %106 : vector<32x32xf32>
    %cst_70 = arith.constant 0.000000e+00 : f32
    %108 = vector.broadcast %cst_70 : f32 to vector<32x32xf32>
    %109 = arith.maximumf %107, %108 : vector<32x32xf32>
    %110 = arith.truncf %109 : vector<32x32xf32> to vector<32x32xbf16>
    %c2_71 = arith.constant 2 : index
    %c0_72 = arith.constant 0 : index
    %c0_73 = arith.constant 0 : index
    %111 = vector.load %arg5[%c2_71, %c0_72, %c0_73] : memref<4x32x32xbf16, #tpu.memory_space<vmem>>, vector<1x32x32xbf16>
    %112 = vector.shape_cast %111 : vector<1x32x32xbf16> to vector<32x32xbf16>
    %113 = vector.shape_cast %110 : vector<32x32xbf16> to vector<1x32x32xbf16>
    tpu.vector_store %arg5[%c2_71, %c0_72, %c0_73], %113 {strides = array<i32>} : memref<4x32x32xbf16, #tpu.memory_space<vmem>>, vector<1x32x32xbf16>,
    %c3_74 = arith.constant 3 : index
    %c0_75 = arith.constant 0 : index
    %c0_76 = arith.constant 0 : index
    %114 = vector.load %arg6[%c3_74, %c0_75, %c0_76] : memref<4x32x32xf32, #tpu.memory_space<vmem>>, vector<1x32x32xf32>
    %115 = vector.shape_cast %114 : vector<1x32x32xf32> to vector<32x32xf32>
    %116 = vector.broadcast %74 : vector<32x1xf32> to vector<32x32xf32>
    %117 = arith.mulf %115, %116 : vector<32x32xf32>
    %118 = vector.broadcast %77 : vector<32x1xf32> to vector<32x32xf32>
    %119 = arith.addf %117, %118 : vector<32x32xf32>
    %cst_77 = arith.constant 0.000000e+00 : f32
    %120 = vector.broadcast %cst_77 : f32 to vector<32x32xf32>
    %121 = arith.maximumf %119, %120 : vector<32x32xf32>
    %122 = arith.truncf %121 : vector<32x32xf32> to vector<32x32xbf16>
    %c3_78 = arith.constant 3 : index
    %c0_79 = arith.constant 0 : index
    %c0_80 = arith.constant 0 : index
    %123 = vector.load %arg5[%c3_78, %c0_79, %c0_80] : memref<4x32x32xbf16, #tpu.memory_space<vmem>>, vector<1x32x32xbf16>
    %124 = vector.shape_cast %123 : vector<1x32x32xbf16> to vector<32x32xbf16>
    %125 = vector.shape_cast %122 : vector<32x32xbf16> to vector<1x32x32xbf16>
    tpu.vector_store %arg5[%c3_78, %c0_79, %c0_80], %125 {strides = array<i32>} : memref<4x32x32xbf16, #tpu.memory_space<vmem>>, vector<1x32x32xbf16>,
    return
  }
  func.func @transform_0(%arg0: i32) -> (i32, i32, i32) {
    %c0_i32 = arith.constant 0 : i32
    %c0_i32_0 = arith.constant 0 : i32
    %c0_i32_1 = arith.constant 0 : i32
    %c0_i32_2 = arith.constant 0 : i32
    return %c0_i32, %c0_i32_0, %c0_i32_1 : i32, i32, i32
  }
  func.func @transform_1(%arg0: i32) -> (i32, i32, i32) {
    %c0_i32 = arith.constant 0 : i32
    %c0_i32_0 = arith.constant 0 : i32
    %c0_i32_1 = arith.constant 0 : i32
    %c0_i32_2 = arith.constant 0 : i32
    return %c0_i32, %c0_i32_0, %c0_i32_1 : i32, i32, i32
  }
  func.func @transform_2(%arg0: i32) -> (i32, i32) {
    %c0_i32 = arith.constant 0 : i32
    %c0_i32_0 = arith.constant 0 : i32
    %c0_i32_1 = arith.constant 0 : i32
    return %c0_i32, %c0_i32_0 : i32, i32
  }
  func.func @transform_3(%arg0: i32) -> (i32, i32) {
    %c0_i32 = arith.constant 0 : i32
    %c0_i32_0 = arith.constant 0 : i32
    %c0_i32_1 = arith.constant 0 : i32
    return %c0_i32, %c0_i32_0 : i32, i32
  }
  func.func @transform_4(%arg0: i32) -> (i32, i32, i32) {
    %c0_i32 = arith.constant 0 : i32
    %c0_i32_0 = arith.constant 0 : i32
    %c0_i32_1 = arith.constant 0 : i32
    %c0_i32_2 = arith.constant 0 : i32
    return %c0_i32, %c0_i32_0, %c0_i32_1 : i32, i32, i32
  }
}

module attributes {stable_mosaic.version = 11 : i64} {
  func.func @kernel(%arg0: i32, %arg1: memref<4x16x128xbf16, #tpu.memory_space<vmem>>, %arg2: memref<4x128x128xbf16, #tpu.memory_space<vmem>>, %arg3: memref<16x1xf32, #tpu.memory_space<vmem>>, %arg4: memref<16x1xf32, #tpu.memory_space<vmem>>, %arg5: memref<4x16x128xbf16, #tpu.memory_space<vmem>>, %arg6: memref<4x16x128xf32, #tpu.memory_space<vmem>>) attributes {dimension_semantics = [#tpu.dimension_semantics<arbitrary>], iteration_bounds = array<i64: 1>, scalar_prefetch = 0 : i64, scratch_operands = 1 : i64, tpu.core_type = #tpu.core_type<tc>, window_params = [{pipeline_mode = #tpu.pipeline_mode<synchronous>, transform_indices = @transform_0, window_bounds = array<i64: 4, 16, 128>}, {pipeline_mode = #tpu.pipeline_mode<synchronous>, transform_indices = @transform_1, window_bounds = array<i64: 4, 128, 128>}, {pipeline_mode = #tpu.pipeline_mode<synchronous>, transform_indices = @transform_2, window_bounds = array<i64: 16, 1>}, {pipeline_mode = #tpu.pipeline_mode<synchronous>, transform_indices = @transform_3, window_bounds = array<i64: 16, 1>}, {pipeline_mode = #tpu.pipeline_mode<synchronous>, transform_indices = @transform_4, window_bounds = array<i64: 4, 16, 128>}]} {
    %cst = arith.constant 0.000000e+00 : f32
    %0 = vector.broadcast %cst : f32 to vector<16x1xf32>
    %cst_0 = arith.constant 0.000000e+00 : f32
    %1 = vector.broadcast %cst_0 : f32 to vector<16x1xf32>
    %c0 = arith.constant 0 : index
    %c0_1 = arith.constant 0 : index
    %c0_2 = arith.constant 0 : index
    %2 = vector.load %arg1[%c0, %c0_1, %c0_2] : memref<4x16x128xbf16, #tpu.memory_space<vmem>>, vector<1x16x128xbf16>
    %3 = vector.shape_cast %2 : vector<1x16x128xbf16> to vector<16x128xbf16>
    %c0_3 = arith.constant 0 : index
    %c0_4 = arith.constant 0 : index
    %c0_5 = arith.constant 0 : index
    %4 = vector.load %arg2[%c0_3, %c0_4, %c0_5] : memref<4x128x128xbf16, #tpu.memory_space<vmem>>, vector<1x128x128xbf16>
    %5 = vector.shape_cast %4 : vector<1x128x128xbf16> to vector<128x128xbf16>
    %cst_6 = arith.constant dense<0.000000e+00> : vector<16x128xf32>
    %6 = tpu.matmul %3, %5, %cst_6 {dimension_numbers = #tpu.dot_dimension_numbers<[1], [0], [0], [1], [0, 0, 1, 1], [], []>} : vector<16x128xbf16>, vector<128x128xbf16>, vector<16x128xf32> -> vector<16x128xf32>
    %c0_7 = arith.constant 0 : index
    %c0_8 = arith.constant 0 : index
    %c0_9 = arith.constant 0 : index
    %7 = vector.load %arg6[%c0_7, %c0_8, %c0_9] : memref<4x16x128xf32, #tpu.memory_space<vmem>>, vector<1x16x128xf32>
    %8 = vector.shape_cast %7 : vector<1x16x128xf32> to vector<16x128xf32>
    %9 = vector.shape_cast %6 : vector<16x128xf32> to vector<1x16x128xf32>
    tpu.vector_store %arg6[%c0_7, %c0_8, %c0_9], %9 {strides = array<i32>} : memref<4x16x128xf32, #tpu.memory_space<vmem>>, vector<1x16x128xf32>,
    %cst_10 = arith.constant dense<0.000000e+00> : vector<16xf32>
    %10 = vector.multi_reduction <add>, %6, %cst_10 [1] : vector<16x128xf32> to vector<16xf32>
    %11 = vector.shape_cast %10 : vector<16xf32> to vector<16x1xf32>
    %12 = arith.addf %0, %11 : vector<16x1xf32>
    %13 = arith.mulf %6, %6 : vector<16x128xf32>
    %cst_11 = arith.constant dense<0.000000e+00> : vector<16xf32>
    %14 = vector.multi_reduction <add>, %13, %cst_11 [1] : vector<16x128xf32> to vector<16xf32>
    %15 = vector.shape_cast %14 : vector<16xf32> to vector<16x1xf32>
    %16 = arith.addf %1, %15 : vector<16x1xf32>
    %c1 = arith.constant 1 : index
    %c0_12 = arith.constant 0 : index
    %c0_13 = arith.constant 0 : index
    %17 = vector.load %arg1[%c1, %c0_12, %c0_13] : memref<4x16x128xbf16, #tpu.memory_space<vmem>>, vector<1x16x128xbf16>
    %18 = vector.shape_cast %17 : vector<1x16x128xbf16> to vector<16x128xbf16>
    %c1_14 = arith.constant 1 : index
    %c0_15 = arith.constant 0 : index
    %c0_16 = arith.constant 0 : index
    %19 = vector.load %arg2[%c1_14, %c0_15, %c0_16] : memref<4x128x128xbf16, #tpu.memory_space<vmem>>, vector<1x128x128xbf16>
    %20 = vector.shape_cast %19 : vector<1x128x128xbf16> to vector<128x128xbf16>
    %cst_17 = arith.constant dense<0.000000e+00> : vector<16x128xf32>
    %21 = tpu.matmul %18, %20, %cst_17 {dimension_numbers = #tpu.dot_dimension_numbers<[1], [0], [0], [1], [0, 0, 1, 1], [], []>} : vector<16x128xbf16>, vector<128x128xbf16>, vector<16x128xf32> -> vector<16x128xf32>
    %c1_18 = arith.constant 1 : index
    %c0_19 = arith.constant 0 : index
    %c0_20 = arith.constant 0 : index
    %22 = vector.load %arg6[%c1_18, %c0_19, %c0_20] : memref<4x16x128xf32, #tpu.memory_space<vmem>>, vector<1x16x128xf32>
    %23 = vector.shape_cast %22 : vector<1x16x128xf32> to vector<16x128xf32>
    %24 = vector.shape_cast %21 : vector<16x128xf32> to vector<1x16x128xf32>
    tpu.vector_store %arg6[%c1_18, %c0_19, %c0_20], %24 {strides = array<i32>} : memref<4x16x128xf32, #tpu.memory_space<vmem>>, vector<1x16x128xf32>,
    %cst_21 = arith.constant dense<0.000000e+00> : vector<16xf32>
    %25 = vector.multi_reduction <add>, %21, %cst_21 [1] : vector<16x128xf32> to vector<16xf32>
    %26 = vector.shape_cast %25 : vector<16xf32> to vector<16x1xf32>
    %27 = arith.addf %12, %26 : vector<16x1xf32>
    %28 = arith.mulf %21, %21 : vector<16x128xf32>
    %cst_22 = arith.constant dense<0.000000e+00> : vector<16xf32>
    %29 = vector.multi_reduction <add>, %28, %cst_22 [1] : vector<16x128xf32> to vector<16xf32>
    %30 = vector.shape_cast %29 : vector<16xf32> to vector<16x1xf32>
    %31 = arith.addf %16, %30 : vector<16x1xf32>
    %c2 = arith.constant 2 : index
    %c0_23 = arith.constant 0 : index
    %c0_24 = arith.constant 0 : index
    %32 = vector.load %arg1[%c2, %c0_23, %c0_24] : memref<4x16x128xbf16, #tpu.memory_space<vmem>>, vector<1x16x128xbf16>
    %33 = vector.shape_cast %32 : vector<1x16x128xbf16> to vector<16x128xbf16>
    %c2_25 = arith.constant 2 : index
    %c0_26 = arith.constant 0 : index
    %c0_27 = arith.constant 0 : index
    %34 = vector.load %arg2[%c2_25, %c0_26, %c0_27] : memref<4x128x128xbf16, #tpu.memory_space<vmem>>, vector<1x128x128xbf16>
    %35 = vector.shape_cast %34 : vector<1x128x128xbf16> to vector<128x128xbf16>
    %cst_28 = arith.constant dense<0.000000e+00> : vector<16x128xf32>
    %36 = tpu.matmul %33, %35, %cst_28 {dimension_numbers = #tpu.dot_dimension_numbers<[1], [0], [0], [1], [0, 0, 1, 1], [], []>} : vector<16x128xbf16>, vector<128x128xbf16>, vector<16x128xf32> -> vector<16x128xf32>
    %c2_29 = arith.constant 2 : index
    %c0_30 = arith.constant 0 : index
    %c0_31 = arith.constant 0 : index
    %37 = vector.load %arg6[%c2_29, %c0_30, %c0_31] : memref<4x16x128xf32, #tpu.memory_space<vmem>>, vector<1x16x128xf32>
    %38 = vector.shape_cast %37 : vector<1x16x128xf32> to vector<16x128xf32>
    %39 = vector.shape_cast %36 : vector<16x128xf32> to vector<1x16x128xf32>
    tpu.vector_store %arg6[%c2_29, %c0_30, %c0_31], %39 {strides = array<i32>} : memref<4x16x128xf32, #tpu.memory_space<vmem>>, vector<1x16x128xf32>,
    %cst_32 = arith.constant dense<0.000000e+00> : vector<16xf32>
    %40 = vector.multi_reduction <add>, %36, %cst_32 [1] : vector<16x128xf32> to vector<16xf32>
    %41 = vector.shape_cast %40 : vector<16xf32> to vector<16x1xf32>
    %42 = arith.addf %27, %41 : vector<16x1xf32>
    %43 = arith.mulf %36, %36 : vector<16x128xf32>
    %cst_33 = arith.constant dense<0.000000e+00> : vector<16xf32>
    %44 = vector.multi_reduction <add>, %43, %cst_33 [1] : vector<16x128xf32> to vector<16xf32>
    %45 = vector.shape_cast %44 : vector<16xf32> to vector<16x1xf32>
    %46 = arith.addf %31, %45 : vector<16x1xf32>
    %c3 = arith.constant 3 : index
    %c0_34 = arith.constant 0 : index
    %c0_35 = arith.constant 0 : index
    %47 = vector.load %arg1[%c3, %c0_34, %c0_35] : memref<4x16x128xbf16, #tpu.memory_space<vmem>>, vector<1x16x128xbf16>
    %48 = vector.shape_cast %47 : vector<1x16x128xbf16> to vector<16x128xbf16>
    %c3_36 = arith.constant 3 : index
    %c0_37 = arith.constant 0 : index
    %c0_38 = arith.constant 0 : index
    %49 = vector.load %arg2[%c3_36, %c0_37, %c0_38] : memref<4x128x128xbf16, #tpu.memory_space<vmem>>, vector<1x128x128xbf16>
    %50 = vector.shape_cast %49 : vector<1x128x128xbf16> to vector<128x128xbf16>
    %cst_39 = arith.constant dense<0.000000e+00> : vector<16x128xf32>
    %51 = tpu.matmul %48, %50, %cst_39 {dimension_numbers = #tpu.dot_dimension_numbers<[1], [0], [0], [1], [0, 0, 1, 1], [], []>} : vector<16x128xbf16>, vector<128x128xbf16>, vector<16x128xf32> -> vector<16x128xf32>
    %c3_40 = arith.constant 3 : index
    %c0_41 = arith.constant 0 : index
    %c0_42 = arith.constant 0 : index
    %52 = vector.load %arg6[%c3_40, %c0_41, %c0_42] : memref<4x16x128xf32, #tpu.memory_space<vmem>>, vector<1x16x128xf32>
    %53 = vector.shape_cast %52 : vector<1x16x128xf32> to vector<16x128xf32>
    %54 = vector.shape_cast %51 : vector<16x128xf32> to vector<1x16x128xf32>
    tpu.vector_store %arg6[%c3_40, %c0_41, %c0_42], %54 {strides = array<i32>} : memref<4x16x128xf32, #tpu.memory_space<vmem>>, vector<1x16x128xf32>,
    %cst_43 = arith.constant dense<0.000000e+00> : vector<16xf32>
    %55 = vector.multi_reduction <add>, %51, %cst_43 [1] : vector<16x128xf32> to vector<16xf32>
    %56 = vector.shape_cast %55 : vector<16xf32> to vector<16x1xf32>
    %57 = arith.addf %42, %56 : vector<16x1xf32>
    %58 = arith.mulf %51, %51 : vector<16x128xf32>
    %cst_44 = arith.constant dense<0.000000e+00> : vector<16xf32>
    %59 = vector.multi_reduction <add>, %58, %cst_44 [1] : vector<16x128xf32> to vector<16xf32>
    %60 = vector.shape_cast %59 : vector<16xf32> to vector<16x1xf32>
    %61 = arith.addf %46, %60 : vector<16x1xf32>
    %cst_45 = arith.constant 0.001953125 : f32
    %62 = vector.broadcast %cst_45 : f32 to vector<16x1xf32>
    %63 = arith.mulf %57, %62 : vector<16x1xf32>
    %cst_46 = arith.constant 0.001953125 : f32
    %64 = vector.broadcast %cst_46 : f32 to vector<16x1xf32>
    %65 = arith.mulf %61, %64 : vector<16x1xf32>
    %66 = arith.mulf %63, %63 : vector<16x1xf32>
    %67 = arith.subf %65, %66 : vector<16x1xf32>
    %cst_47 = arith.constant 0.000000e+00 : f32
    %68 = vector.broadcast %cst_47 : f32 to vector<16x1xf32>
    %69 = arith.maximumf %67, %68 : vector<16x1xf32>
    %c0_48 = arith.constant 0 : index
    %c0_49 = arith.constant 0 : index
    %70 = vector.load %arg3[%c0_48, %c0_49] : memref<16x1xf32, #tpu.memory_space<vmem>>, vector<16x1xf32>
    %cst_50 = arith.constant 9.99999974E-6 : f32
    %71 = vector.broadcast %cst_50 : f32 to vector<16x1xf32>
    %72 = arith.addf %69, %71 : vector<16x1xf32>
    %73 = math.rsqrt %72 : vector<16x1xf32>
    %74 = arith.mulf %70, %73 : vector<16x1xf32>
    %c0_51 = arith.constant 0 : index
    %c0_52 = arith.constant 0 : index
    %75 = vector.load %arg4[%c0_51, %c0_52] : memref<16x1xf32, #tpu.memory_space<vmem>>, vector<16x1xf32>
    %76 = arith.mulf %63, %74 : vector<16x1xf32>
    %77 = arith.subf %75, %76 : vector<16x1xf32>
    %c0_53 = arith.constant 0 : index
    %c0_54 = arith.constant 0 : index
    %c0_55 = arith.constant 0 : index
    %78 = vector.load %arg6[%c0_53, %c0_54, %c0_55] : memref<4x16x128xf32, #tpu.memory_space<vmem>>, vector<1x16x128xf32>
    %79 = vector.shape_cast %78 : vector<1x16x128xf32> to vector<16x128xf32>
    %80 = vector.broadcast %74 : vector<16x1xf32> to vector<16x128xf32>
    %81 = arith.mulf %79, %80 : vector<16x128xf32>
    %82 = vector.broadcast %77 : vector<16x1xf32> to vector<16x128xf32>
    %83 = arith.addf %81, %82 : vector<16x128xf32>
    %cst_56 = arith.constant 0.000000e+00 : f32
    %84 = vector.broadcast %cst_56 : f32 to vector<16x128xf32>
    %85 = arith.maximumf %83, %84 : vector<16x128xf32>
    %86 = arith.truncf %85 : vector<16x128xf32> to vector<16x128xbf16>
    %c0_57 = arith.constant 0 : index
    %c0_58 = arith.constant 0 : index
    %c0_59 = arith.constant 0 : index
    %87 = vector.load %arg5[%c0_57, %c0_58, %c0_59] : memref<4x16x128xbf16, #tpu.memory_space<vmem>>, vector<1x16x128xbf16>
    %88 = vector.shape_cast %87 : vector<1x16x128xbf16> to vector<16x128xbf16>
    %89 = vector.shape_cast %86 : vector<16x128xbf16> to vector<1x16x128xbf16>
    tpu.vector_store %arg5[%c0_57, %c0_58, %c0_59], %89 {strides = array<i32>} : memref<4x16x128xbf16, #tpu.memory_space<vmem>>, vector<1x16x128xbf16>,
    %c1_60 = arith.constant 1 : index
    %c0_61 = arith.constant 0 : index
    %c0_62 = arith.constant 0 : index
    %90 = vector.load %arg6[%c1_60, %c0_61, %c0_62] : memref<4x16x128xf32, #tpu.memory_space<vmem>>, vector<1x16x128xf32>
    %91 = vector.shape_cast %90 : vector<1x16x128xf32> to vector<16x128xf32>
    %92 = vector.broadcast %74 : vector<16x1xf32> to vector<16x128xf32>
    %93 = arith.mulf %91, %92 : vector<16x128xf32>
    %94 = vector.broadcast %77 : vector<16x1xf32> to vector<16x128xf32>
    %95 = arith.addf %93, %94 : vector<16x128xf32>
    %cst_63 = arith.constant 0.000000e+00 : f32
    %96 = vector.broadcast %cst_63 : f32 to vector<16x128xf32>
    %97 = arith.maximumf %95, %96 : vector<16x128xf32>
    %98 = arith.truncf %97 : vector<16x128xf32> to vector<16x128xbf16>
    %c1_64 = arith.constant 1 : index
    %c0_65 = arith.constant 0 : index
    %c0_66 = arith.constant 0 : index
    %99 = vector.load %arg5[%c1_64, %c0_65, %c0_66] : memref<4x16x128xbf16, #tpu.memory_space<vmem>>, vector<1x16x128xbf16>
    %100 = vector.shape_cast %99 : vector<1x16x128xbf16> to vector<16x128xbf16>
    %101 = vector.shape_cast %98 : vector<16x128xbf16> to vector<1x16x128xbf16>
    tpu.vector_store %arg5[%c1_64, %c0_65, %c0_66], %101 {strides = array<i32>} : memref<4x16x128xbf16, #tpu.memory_space<vmem>>, vector<1x16x128xbf16>,
    %c2_67 = arith.constant 2 : index
    %c0_68 = arith.constant 0 : index
    %c0_69 = arith.constant 0 : index
    %102 = vector.load %arg6[%c2_67, %c0_68, %c0_69] : memref<4x16x128xf32, #tpu.memory_space<vmem>>, vector<1x16x128xf32>
    %103 = vector.shape_cast %102 : vector<1x16x128xf32> to vector<16x128xf32>
    %104 = vector.broadcast %74 : vector<16x1xf32> to vector<16x128xf32>
    %105 = arith.mulf %103, %104 : vector<16x128xf32>
    %106 = vector.broadcast %77 : vector<16x1xf32> to vector<16x128xf32>
    %107 = arith.addf %105, %106 : vector<16x128xf32>
    %cst_70 = arith.constant 0.000000e+00 : f32
    %108 = vector.broadcast %cst_70 : f32 to vector<16x128xf32>
    %109 = arith.maximumf %107, %108 : vector<16x128xf32>
    %110 = arith.truncf %109 : vector<16x128xf32> to vector<16x128xbf16>
    %c2_71 = arith.constant 2 : index
    %c0_72 = arith.constant 0 : index
    %c0_73 = arith.constant 0 : index
    %111 = vector.load %arg5[%c2_71, %c0_72, %c0_73] : memref<4x16x128xbf16, #tpu.memory_space<vmem>>, vector<1x16x128xbf16>
    %112 = vector.shape_cast %111 : vector<1x16x128xbf16> to vector<16x128xbf16>
    %113 = vector.shape_cast %110 : vector<16x128xbf16> to vector<1x16x128xbf16>
    tpu.vector_store %arg5[%c2_71, %c0_72, %c0_73], %113 {strides = array<i32>} : memref<4x16x128xbf16, #tpu.memory_space<vmem>>, vector<1x16x128xbf16>,
    %c3_74 = arith.constant 3 : index
    %c0_75 = arith.constant 0 : index
    %c0_76 = arith.constant 0 : index
    %114 = vector.load %arg6[%c3_74, %c0_75, %c0_76] : memref<4x16x128xf32, #tpu.memory_space<vmem>>, vector<1x16x128xf32>
    %115 = vector.shape_cast %114 : vector<1x16x128xf32> to vector<16x128xf32>
    %116 = vector.broadcast %74 : vector<16x1xf32> to vector<16x128xf32>
    %117 = arith.mulf %115, %116 : vector<16x128xf32>
    %118 = vector.broadcast %77 : vector<16x1xf32> to vector<16x128xf32>
    %119 = arith.addf %117, %118 : vector<16x128xf32>
    %cst_77 = arith.constant 0.000000e+00 : f32
    %120 = vector.broadcast %cst_77 : f32 to vector<16x128xf32>
    %121 = arith.maximumf %119, %120 : vector<16x128xf32>
    %122 = arith.truncf %121 : vector<16x128xf32> to vector<16x128xbf16>
    %c3_78 = arith.constant 3 : index
    %c0_79 = arith.constant 0 : index
    %c0_80 = arith.constant 0 : index
    %123 = vector.load %arg5[%c3_78, %c0_79, %c0_80] : memref<4x16x128xbf16, #tpu.memory_space<vmem>>, vector<1x16x128xbf16>
    %124 = vector.shape_cast %123 : vector<1x16x128xbf16> to vector<16x128xbf16>
    %125 = vector.shape_cast %122 : vector<16x128xbf16> to vector<1x16x128xbf16>
    tpu.vector_store %arg5[%c3_78, %c0_79, %c0_80], %125 {strides = array<i32>} : memref<4x16x128xbf16, #tpu.memory_space<vmem>>, vector<1x16x128xbf16>,
    return
  }
  func.func @transform_0(%arg0: i32) -> (i32, i32, i32) {
    %c0_i32 = arith.constant 0 : i32
    %c0_i32_0 = arith.constant 0 : i32
    %c0_i32_1 = arith.constant 0 : i32
    %c0_i32_2 = arith.constant 0 : i32
    return %c0_i32, %c0_i32_0, %c0_i32_1 : i32, i32, i32
  }
  func.func @transform_1(%arg0: i32) -> (i32, i32, i32) {
    %c0_i32 = arith.constant 0 : i32
    %c0_i32_0 = arith.constant 0 : i32
    %c0_i32_1 = arith.constant 0 : i32
    %c0_i32_2 = arith.constant 0 : i32
    return %c0_i32, %c0_i32_0, %c0_i32_1 : i32, i32, i32
  }
  func.func @transform_2(%arg0: i32) -> (i32, i32) {
    %c0_i32 = arith.constant 0 : i32
    %c0_i32_0 = arith.constant 0 : i32
    %c0_i32_1 = arith.constant 0 : i32
    return %c0_i32, %c0_i32_0 : i32, i32
  }
  func.func @transform_3(%arg0: i32) -> (i32, i32) {
    %c0_i32 = arith.constant 0 : i32
    %c0_i32_0 = arith.constant 0 : i32
    %c0_i32_1 = arith.constant 0 : i32
    return %c0_i32, %c0_i32_0 : i32, i32
  }
  func.func @transform_4(%arg0: i32) -> (i32, i32, i32) {
    %c0_i32 = arith.constant 0 : i32
    %c0_i32_0 = arith.constant 0 : i32
    %c0_i32_1 = arith.constant 0 : i32
    %c0_i32_2 = arith.constant 0 : i32
    return %c0_i32, %c0_i32_0, %c0_i32_1 : i32, i32, i32
  }
}

module attributes {stable_mosaic.version = 11 : i64} {
  func.func @kernel(%arg0: i32, %arg1: memref<4x8x64xbf16, #tpu.memory_space<vmem>>, %arg2: memref<4x64x512xbf16, #tpu.memory_space<vmem>>, %arg3: memref<8x1xf32, #tpu.memory_space<vmem>>, %arg4: memref<8x1xf32, #tpu.memory_space<vmem>>, %arg5: memref<4x8x512xbf16, #tpu.memory_space<vmem>>, %arg6: memref<4x8x512xf32, #tpu.memory_space<vmem>>) attributes {dimension_semantics = [#tpu.dimension_semantics<arbitrary>], iteration_bounds = array<i64: 1>, scalar_prefetch = 0 : i64, scratch_operands = 1 : i64, tpu.core_type = #tpu.core_type<tc>, window_params = [{pipeline_mode = #tpu.pipeline_mode<synchronous>, transform_indices = @transform_0, window_bounds = array<i64: 4, 8, 64>}, {pipeline_mode = #tpu.pipeline_mode<synchronous>, transform_indices = @transform_1, window_bounds = array<i64: 4, 64, 512>}, {pipeline_mode = #tpu.pipeline_mode<synchronous>, transform_indices = @transform_2, window_bounds = array<i64: 8, 1>}, {pipeline_mode = #tpu.pipeline_mode<synchronous>, transform_indices = @transform_3, window_bounds = array<i64: 8, 1>}, {pipeline_mode = #tpu.pipeline_mode<synchronous>, transform_indices = @transform_4, window_bounds = array<i64: 4, 8, 512>}]} {
    %cst = arith.constant 0.000000e+00 : f32
    %0 = vector.broadcast %cst : f32 to vector<8x1xf32>
    %cst_0 = arith.constant 0.000000e+00 : f32
    %1 = vector.broadcast %cst_0 : f32 to vector<8x1xf32>
    %c0 = arith.constant 0 : index
    %c0_1 = arith.constant 0 : index
    %c0_2 = arith.constant 0 : index
    %2 = vector.load %arg1[%c0, %c0_1, %c0_2] : memref<4x8x64xbf16, #tpu.memory_space<vmem>>, vector<1x8x64xbf16>
    %3 = vector.shape_cast %2 : vector<1x8x64xbf16> to vector<8x64xbf16>
    %c0_3 = arith.constant 0 : index
    %c0_4 = arith.constant 0 : index
    %c0_5 = arith.constant 0 : index
    %4 = vector.load %arg2[%c0_3, %c0_4, %c0_5] : memref<4x64x512xbf16, #tpu.memory_space<vmem>>, vector<1x64x512xbf16>
    %5 = vector.shape_cast %4 : vector<1x64x512xbf16> to vector<64x512xbf16>
    %cst_6 = arith.constant dense<0.000000e+00> : vector<8x512xf32>
    %6 = tpu.matmul %3, %5, %cst_6 {dimension_numbers = #tpu.dot_dimension_numbers<[1], [0], [0], [1], [0, 0, 1, 1], [], []>} : vector<8x64xbf16>, vector<64x512xbf16>, vector<8x512xf32> -> vector<8x512xf32>
    %c0_7 = arith.constant 0 : index
    %c0_8 = arith.constant 0 : index
    %c0_9 = arith.constant 0 : index
    %7 = vector.load %arg6[%c0_7, %c0_8, %c0_9] : memref<4x8x512xf32, #tpu.memory_space<vmem>>, vector<1x8x512xf32>
    %8 = vector.shape_cast %7 : vector<1x8x512xf32> to vector<8x512xf32>
    %9 = vector.shape_cast %6 : vector<8x512xf32> to vector<1x8x512xf32>
    tpu.vector_store %arg6[%c0_7, %c0_8, %c0_9], %9 {strides = array<i32>} : memref<4x8x512xf32, #tpu.memory_space<vmem>>, vector<1x8x512xf32>,
    %cst_10 = arith.constant dense<0.000000e+00> : vector<8xf32>
    %10 = vector.multi_reduction <add>, %6, %cst_10 [1] : vector<8x512xf32> to vector<8xf32>
    %11 = vector.shape_cast %10 : vector<8xf32> to vector<8x1xf32>
    %12 = arith.addf %0, %11 : vector<8x1xf32>
    %13 = arith.mulf %6, %6 : vector<8x512xf32>
    %cst_11 = arith.constant dense<0.000000e+00> : vector<8xf32>
    %14 = vector.multi_reduction <add>, %13, %cst_11 [1] : vector<8x512xf32> to vector<8xf32>
    %15 = vector.shape_cast %14 : vector<8xf32> to vector<8x1xf32>
    %16 = arith.addf %1, %15 : vector<8x1xf32>
    %c1 = arith.constant 1 : index
    %c0_12 = arith.constant 0 : index
    %c0_13 = arith.constant 0 : index
    %17 = vector.load %arg1[%c1, %c0_12, %c0_13] : memref<4x8x64xbf16, #tpu.memory_space<vmem>>, vector<1x8x64xbf16>
    %18 = vector.shape_cast %17 : vector<1x8x64xbf16> to vector<8x64xbf16>
    %c1_14 = arith.constant 1 : index
    %c0_15 = arith.constant 0 : index
    %c0_16 = arith.constant 0 : index
    %19 = vector.load %arg2[%c1_14, %c0_15, %c0_16] : memref<4x64x512xbf16, #tpu.memory_space<vmem>>, vector<1x64x512xbf16>
    %20 = vector.shape_cast %19 : vector<1x64x512xbf16> to vector<64x512xbf16>
    %cst_17 = arith.constant dense<0.000000e+00> : vector<8x512xf32>
    %21 = tpu.matmul %18, %20, %cst_17 {dimension_numbers = #tpu.dot_dimension_numbers<[1], [0], [0], [1], [0, 0, 1, 1], [], []>} : vector<8x64xbf16>, vector<64x512xbf16>, vector<8x512xf32> -> vector<8x512xf32>
    %c1_18 = arith.constant 1 : index
    %c0_19 = arith.constant 0 : index
    %c0_20 = arith.constant 0 : index
    %22 = vector.load %arg6[%c1_18, %c0_19, %c0_20] : memref<4x8x512xf32, #tpu.memory_space<vmem>>, vector<1x8x512xf32>
    %23 = vector.shape_cast %22 : vector<1x8x512xf32> to vector<8x512xf32>
    %24 = vector.shape_cast %21 : vector<8x512xf32> to vector<1x8x512xf32>
    tpu.vector_store %arg6[%c1_18, %c0_19, %c0_20], %24 {strides = array<i32>} : memref<4x8x512xf32, #tpu.memory_space<vmem>>, vector<1x8x512xf32>,
    %cst_21 = arith.constant dense<0.000000e+00> : vector<8xf32>
    %25 = vector.multi_reduction <add>, %21, %cst_21 [1] : vector<8x512xf32> to vector<8xf32>
    %26 = vector.shape_cast %25 : vector<8xf32> to vector<8x1xf32>
    %27 = arith.addf %12, %26 : vector<8x1xf32>
    %28 = arith.mulf %21, %21 : vector<8x512xf32>
    %cst_22 = arith.constant dense<0.000000e+00> : vector<8xf32>
    %29 = vector.multi_reduction <add>, %28, %cst_22 [1] : vector<8x512xf32> to vector<8xf32>
    %30 = vector.shape_cast %29 : vector<8xf32> to vector<8x1xf32>
    %31 = arith.addf %16, %30 : vector<8x1xf32>
    %c2 = arith.constant 2 : index
    %c0_23 = arith.constant 0 : index
    %c0_24 = arith.constant 0 : index
    %32 = vector.load %arg1[%c2, %c0_23, %c0_24] : memref<4x8x64xbf16, #tpu.memory_space<vmem>>, vector<1x8x64xbf16>
    %33 = vector.shape_cast %32 : vector<1x8x64xbf16> to vector<8x64xbf16>
    %c2_25 = arith.constant 2 : index
    %c0_26 = arith.constant 0 : index
    %c0_27 = arith.constant 0 : index
    %34 = vector.load %arg2[%c2_25, %c0_26, %c0_27] : memref<4x64x512xbf16, #tpu.memory_space<vmem>>, vector<1x64x512xbf16>
    %35 = vector.shape_cast %34 : vector<1x64x512xbf16> to vector<64x512xbf16>
    %cst_28 = arith.constant dense<0.000000e+00> : vector<8x512xf32>
    %36 = tpu.matmul %33, %35, %cst_28 {dimension_numbers = #tpu.dot_dimension_numbers<[1], [0], [0], [1], [0, 0, 1, 1], [], []>} : vector<8x64xbf16>, vector<64x512xbf16>, vector<8x512xf32> -> vector<8x512xf32>
    %c2_29 = arith.constant 2 : index
    %c0_30 = arith.constant 0 : index
    %c0_31 = arith.constant 0 : index
    %37 = vector.load %arg6[%c2_29, %c0_30, %c0_31] : memref<4x8x512xf32, #tpu.memory_space<vmem>>, vector<1x8x512xf32>
    %38 = vector.shape_cast %37 : vector<1x8x512xf32> to vector<8x512xf32>
    %39 = vector.shape_cast %36 : vector<8x512xf32> to vector<1x8x512xf32>
    tpu.vector_store %arg6[%c2_29, %c0_30, %c0_31], %39 {strides = array<i32>} : memref<4x8x512xf32, #tpu.memory_space<vmem>>, vector<1x8x512xf32>,
    %cst_32 = arith.constant dense<0.000000e+00> : vector<8xf32>
    %40 = vector.multi_reduction <add>, %36, %cst_32 [1] : vector<8x512xf32> to vector<8xf32>
    %41 = vector.shape_cast %40 : vector<8xf32> to vector<8x1xf32>
    %42 = arith.addf %27, %41 : vector<8x1xf32>
    %43 = arith.mulf %36, %36 : vector<8x512xf32>
    %cst_33 = arith.constant dense<0.000000e+00> : vector<8xf32>
    %44 = vector.multi_reduction <add>, %43, %cst_33 [1] : vector<8x512xf32> to vector<8xf32>
    %45 = vector.shape_cast %44 : vector<8xf32> to vector<8x1xf32>
    %46 = arith.addf %31, %45 : vector<8x1xf32>
    %c3 = arith.constant 3 : index
    %c0_34 = arith.constant 0 : index
    %c0_35 = arith.constant 0 : index
    %47 = vector.load %arg1[%c3, %c0_34, %c0_35] : memref<4x8x64xbf16, #tpu.memory_space<vmem>>, vector<1x8x64xbf16>
    %48 = vector.shape_cast %47 : vector<1x8x64xbf16> to vector<8x64xbf16>
    %c3_36 = arith.constant 3 : index
    %c0_37 = arith.constant 0 : index
    %c0_38 = arith.constant 0 : index
    %49 = vector.load %arg2[%c3_36, %c0_37, %c0_38] : memref<4x64x512xbf16, #tpu.memory_space<vmem>>, vector<1x64x512xbf16>
    %50 = vector.shape_cast %49 : vector<1x64x512xbf16> to vector<64x512xbf16>
    %cst_39 = arith.constant dense<0.000000e+00> : vector<8x512xf32>
    %51 = tpu.matmul %48, %50, %cst_39 {dimension_numbers = #tpu.dot_dimension_numbers<[1], [0], [0], [1], [0, 0, 1, 1], [], []>} : vector<8x64xbf16>, vector<64x512xbf16>, vector<8x512xf32> -> vector<8x512xf32>
    %c3_40 = arith.constant 3 : index
    %c0_41 = arith.constant 0 : index
    %c0_42 = arith.constant 0 : index
    %52 = vector.load %arg6[%c3_40, %c0_41, %c0_42] : memref<4x8x512xf32, #tpu.memory_space<vmem>>, vector<1x8x512xf32>
    %53 = vector.shape_cast %52 : vector<1x8x512xf32> to vector<8x512xf32>
    %54 = vector.shape_cast %51 : vector<8x512xf32> to vector<1x8x512xf32>
    tpu.vector_store %arg6[%c3_40, %c0_41, %c0_42], %54 {strides = array<i32>} : memref<4x8x512xf32, #tpu.memory_space<vmem>>, vector<1x8x512xf32>,
    %cst_43 = arith.constant dense<0.000000e+00> : vector<8xf32>
    %55 = vector.multi_reduction <add>, %51, %cst_43 [1] : vector<8x512xf32> to vector<8xf32>
    %56 = vector.shape_cast %55 : vector<8xf32> to vector<8x1xf32>
    %57 = arith.addf %42, %56 : vector<8x1xf32>
    %58 = arith.mulf %51, %51 : vector<8x512xf32>
    %cst_44 = arith.constant dense<0.000000e+00> : vector<8xf32>
    %59 = vector.multi_reduction <add>, %58, %cst_44 [1] : vector<8x512xf32> to vector<8xf32>
    %60 = vector.shape_cast %59 : vector<8xf32> to vector<8x1xf32>
    %61 = arith.addf %46, %60 : vector<8x1xf32>
    %cst_45 = arith.constant 4.8828125E-4 : f32
    %62 = vector.broadcast %cst_45 : f32 to vector<8x1xf32>
    %63 = arith.mulf %57, %62 : vector<8x1xf32>
    %cst_46 = arith.constant 4.8828125E-4 : f32
    %64 = vector.broadcast %cst_46 : f32 to vector<8x1xf32>
    %65 = arith.mulf %61, %64 : vector<8x1xf32>
    %66 = arith.mulf %63, %63 : vector<8x1xf32>
    %67 = arith.subf %65, %66 : vector<8x1xf32>
    %cst_47 = arith.constant 0.000000e+00 : f32
    %68 = vector.broadcast %cst_47 : f32 to vector<8x1xf32>
    %69 = arith.maximumf %67, %68 : vector<8x1xf32>
    %c0_48 = arith.constant 0 : index
    %c0_49 = arith.constant 0 : index
    %70 = vector.load %arg3[%c0_48, %c0_49] : memref<8x1xf32, #tpu.memory_space<vmem>>, vector<8x1xf32>
    %cst_50 = arith.constant 9.99999974E-6 : f32
    %71 = vector.broadcast %cst_50 : f32 to vector<8x1xf32>
    %72 = arith.addf %69, %71 : vector<8x1xf32>
    %73 = math.rsqrt %72 : vector<8x1xf32>
    %74 = arith.mulf %70, %73 : vector<8x1xf32>
    %c0_51 = arith.constant 0 : index
    %c0_52 = arith.constant 0 : index
    %75 = vector.load %arg4[%c0_51, %c0_52] : memref<8x1xf32, #tpu.memory_space<vmem>>, vector<8x1xf32>
    %76 = arith.mulf %63, %74 : vector<8x1xf32>
    %77 = arith.subf %75, %76 : vector<8x1xf32>
    %c0_53 = arith.constant 0 : index
    %c0_54 = arith.constant 0 : index
    %c0_55 = arith.constant 0 : index
    %78 = vector.load %arg6[%c0_53, %c0_54, %c0_55] : memref<4x8x512xf32, #tpu.memory_space<vmem>>, vector<1x8x512xf32>
    %79 = vector.shape_cast %78 : vector<1x8x512xf32> to vector<8x512xf32>
    %80 = vector.broadcast %74 : vector<8x1xf32> to vector<8x512xf32>
    %81 = arith.mulf %79, %80 : vector<8x512xf32>
    %82 = vector.broadcast %77 : vector<8x1xf32> to vector<8x512xf32>
    %83 = arith.addf %81, %82 : vector<8x512xf32>
    %cst_56 = arith.constant 0.000000e+00 : f32
    %84 = vector.broadcast %cst_56 : f32 to vector<8x512xf32>
    %85 = arith.maximumf %83, %84 : vector<8x512xf32>
    %86 = arith.truncf %85 : vector<8x512xf32> to vector<8x512xbf16>
    %c0_57 = arith.constant 0 : index
    %c0_58 = arith.constant 0 : index
    %c0_59 = arith.constant 0 : index
    %87 = vector.load %arg5[%c0_57, %c0_58, %c0_59] : memref<4x8x512xbf16, #tpu.memory_space<vmem>>, vector<1x8x512xbf16>
    %88 = vector.shape_cast %87 : vector<1x8x512xbf16> to vector<8x512xbf16>
    %89 = vector.shape_cast %86 : vector<8x512xbf16> to vector<1x8x512xbf16>
    tpu.vector_store %arg5[%c0_57, %c0_58, %c0_59], %89 {strides = array<i32>} : memref<4x8x512xbf16, #tpu.memory_space<vmem>>, vector<1x8x512xbf16>,
    %c1_60 = arith.constant 1 : index
    %c0_61 = arith.constant 0 : index
    %c0_62 = arith.constant 0 : index
    %90 = vector.load %arg6[%c1_60, %c0_61, %c0_62] : memref<4x8x512xf32, #tpu.memory_space<vmem>>, vector<1x8x512xf32>
    %91 = vector.shape_cast %90 : vector<1x8x512xf32> to vector<8x512xf32>
    %92 = vector.broadcast %74 : vector<8x1xf32> to vector<8x512xf32>
    %93 = arith.mulf %91, %92 : vector<8x512xf32>
    %94 = vector.broadcast %77 : vector<8x1xf32> to vector<8x512xf32>
    %95 = arith.addf %93, %94 : vector<8x512xf32>
    %cst_63 = arith.constant 0.000000e+00 : f32
    %96 = vector.broadcast %cst_63 : f32 to vector<8x512xf32>
    %97 = arith.maximumf %95, %96 : vector<8x512xf32>
    %98 = arith.truncf %97 : vector<8x512xf32> to vector<8x512xbf16>
    %c1_64 = arith.constant 1 : index
    %c0_65 = arith.constant 0 : index
    %c0_66 = arith.constant 0 : index
    %99 = vector.load %arg5[%c1_64, %c0_65, %c0_66] : memref<4x8x512xbf16, #tpu.memory_space<vmem>>, vector<1x8x512xbf16>
    %100 = vector.shape_cast %99 : vector<1x8x512xbf16> to vector<8x512xbf16>
    %101 = vector.shape_cast %98 : vector<8x512xbf16> to vector<1x8x512xbf16>
    tpu.vector_store %arg5[%c1_64, %c0_65, %c0_66], %101 {strides = array<i32>} : memref<4x8x512xbf16, #tpu.memory_space<vmem>>, vector<1x8x512xbf16>,
    %c2_67 = arith.constant 2 : index
    %c0_68 = arith.constant 0 : index
    %c0_69 = arith.constant 0 : index
    %102 = vector.load %arg6[%c2_67, %c0_68, %c0_69] : memref<4x8x512xf32, #tpu.memory_space<vmem>>, vector<1x8x512xf32>
    %103 = vector.shape_cast %102 : vector<1x8x512xf32> to vector<8x512xf32>
    %104 = vector.broadcast %74 : vector<8x1xf32> to vector<8x512xf32>
    %105 = arith.mulf %103, %104 : vector<8x512xf32>
    %106 = vector.broadcast %77 : vector<8x1xf32> to vector<8x512xf32>
    %107 = arith.addf %105, %106 : vector<8x512xf32>
    %cst_70 = arith.constant 0.000000e+00 : f32
    %108 = vector.broadcast %cst_70 : f32 to vector<8x512xf32>
    %109 = arith.maximumf %107, %108 : vector<8x512xf32>
    %110 = arith.truncf %109 : vector<8x512xf32> to vector<8x512xbf16>
    %c2_71 = arith.constant 2 : index
    %c0_72 = arith.constant 0 : index
    %c0_73 = arith.constant 0 : index
    %111 = vector.load %arg5[%c2_71, %c0_72, %c0_73] : memref<4x8x512xbf16, #tpu.memory_space<vmem>>, vector<1x8x512xbf16>
    %112 = vector.shape_cast %111 : vector<1x8x512xbf16> to vector<8x512xbf16>
    %113 = vector.shape_cast %110 : vector<8x512xbf16> to vector<1x8x512xbf16>
    tpu.vector_store %arg5[%c2_71, %c0_72, %c0_73], %113 {strides = array<i32>} : memref<4x8x512xbf16, #tpu.memory_space<vmem>>, vector<1x8x512xbf16>,
    %c3_74 = arith.constant 3 : index
    %c0_75 = arith.constant 0 : index
    %c0_76 = arith.constant 0 : index
    %114 = vector.load %arg6[%c3_74, %c0_75, %c0_76] : memref<4x8x512xf32, #tpu.memory_space<vmem>>, vector<1x8x512xf32>
    %115 = vector.shape_cast %114 : vector<1x8x512xf32> to vector<8x512xf32>
    %116 = vector.broadcast %74 : vector<8x1xf32> to vector<8x512xf32>
    %117 = arith.mulf %115, %116 : vector<8x512xf32>
    %118 = vector.broadcast %77 : vector<8x1xf32> to vector<8x512xf32>
    %119 = arith.addf %117, %118 : vector<8x512xf32>
    %cst_77 = arith.constant 0.000000e+00 : f32
    %120 = vector.broadcast %cst_77 : f32 to vector<8x512xf32>
    %121 = arith.maximumf %119, %120 : vector<8x512xf32>
    %122 = arith.truncf %121 : vector<8x512xf32> to vector<8x512xbf16>
    %c3_78 = arith.constant 3 : index
    %c0_79 = arith.constant 0 : index
    %c0_80 = arith.constant 0 : index
    %123 = vector.load %arg5[%c3_78, %c0_79, %c0_80] : memref<4x8x512xbf16, #tpu.memory_space<vmem>>, vector<1x8x512xbf16>
    %124 = vector.shape_cast %123 : vector<1x8x512xbf16> to vector<8x512xbf16>
    %125 = vector.shape_cast %122 : vector<8x512xbf16> to vector<1x8x512xbf16>
    tpu.vector_store %arg5[%c3_78, %c0_79, %c0_80], %125 {strides = array<i32>} : memref<4x8x512xbf16, #tpu.memory_space<vmem>>, vector<1x8x512xbf16>,
    return
  }
  func.func @transform_0(%arg0: i32) -> (i32, i32, i32) {
    %c0_i32 = arith.constant 0 : i32
    %c0_i32_0 = arith.constant 0 : i32
    %c0_i32_1 = arith.constant 0 : i32
    %c0_i32_2 = arith.constant 0 : i32
    return %c0_i32, %c0_i32_0, %c0_i32_1 : i32, i32, i32
  }
  func.func @transform_1(%arg0: i32) -> (i32, i32, i32) {
    %c0_i32 = arith.constant 0 : i32
    %c0_i32_0 = arith.constant 0 : i32
    %c0_i32_1 = arith.constant 0 : i32
    %c0_i32_2 = arith.constant 0 : i32
    return %c0_i32, %c0_i32_0, %c0_i32_1 : i32, i32, i32
  }
  func.func @transform_2(%arg0: i32) -> (i32, i32) {
    %c0_i32 = arith.constant 0 : i32
    %c0_i32_0 = arith.constant 0 : i32
    %c0_i32_1 = arith.constant 0 : i32
    return %c0_i32, %c0_i32_0 : i32, i32
  }
  func.func @transform_3(%arg0: i32) -> (i32, i32) {
    %c0_i32 = arith.constant 0 : i32
    %c0_i32_0 = arith.constant 0 : i32
    %c0_i32_1 = arith.constant 0 : i32
    return %c0_i32, %c0_i32_0 : i32, i32
  }
  func.func @transform_4(%arg0: i32) -> (i32, i32, i32) {
    %c0_i32 = arith.constant 0 : i32
    %c0_i32_0 = arith.constant 0 : i32
    %c0_i32_1 = arith.constant 0 : i32
    %c0_i32_2 = arith.constant 0 : i32
    return %c0_i32, %c0_i32_0, %c0_i32_1 : i32, i32, i32
  }
}

module attributes {stable_mosaic.version = 11 : i64} {
  func.func @_mm_tanh_kernel(%arg0: i32, %arg1: i32, %arg2: memref<1x3x32xbf16, #tpu.memory_space<vmem>>, %arg3: memref<1x32x2048xbf16, #tpu.memory_space<vmem>>, %arg4: memref<1x3x2048xf32, #tpu.memory_space<vmem>>) attributes {dimension_semantics = [#tpu.dimension_semantics<parallel>, #tpu.dimension_semantics<parallel>], iteration_bounds = array<i64: 4, 1>, scalar_prefetch = 0 : i64, scratch_operands = 0 : i64, tpu.core_type = #tpu.core_type<tc>, window_params = [{transform_indices = @transform_0, window_bounds = array<i64: 1, 3, 32>}, {transform_indices = @transform_1, window_bounds = array<i64: 1, 32, 2048>}, {transform_indices = @transform_2, window_bounds = array<i64: 1, 3, 2048>}]} {
    %c0 = arith.constant 0 : index
    %c0_0 = arith.constant 0 : index
    %c0_1 = arith.constant 0 : index
    %0 = vector.load %arg2[%c0, %c0_0, %c0_1] : memref<1x3x32xbf16, #tpu.memory_space<vmem>>, vector<1x3x32xbf16>
    %1 = vector.shape_cast %0 : vector<1x3x32xbf16> to vector<3x32xbf16>
    %c0_2 = arith.constant 0 : index
    %c0_3 = arith.constant 0 : index
    %c0_4 = arith.constant 0 : index
    %2 = vector.load %arg3[%c0_2, %c0_3, %c0_4] : memref<1x32x2048xbf16, #tpu.memory_space<vmem>>, vector<1x32x2048xbf16>
    %3 = vector.shape_cast %2 : vector<1x32x2048xbf16> to vector<32x2048xbf16>
    %cst = arith.constant dense<0.000000e+00> : vector<3x2048xf32>
    %4 = tpu.matmul %1, %3, %cst {dimension_numbers = #tpu.dot_dimension_numbers<[1], [0], [0], [1], [0, 0, 1, 1], [], []>} : vector<3x32xbf16>, vector<32x2048xbf16>, vector<3x2048xf32> -> vector<3x2048xf32>
    %5 = math.tanh %4 : vector<3x2048xf32>
    %c0_5 = arith.constant 0 : index
    %c0_6 = arith.constant 0 : index
    %c0_7 = arith.constant 0 : index
    %6 = vector.load %arg4[%c0_5, %c0_6, %c0_7] : memref<1x3x2048xf32, #tpu.memory_space<vmem>>, vector<1x3x2048xf32>
    %7 = vector.shape_cast %6 : vector<1x3x2048xf32> to vector<3x2048xf32>
    %8 = vector.shape_cast %5 : vector<3x2048xf32> to vector<1x3x2048xf32>
    tpu.vector_store %arg4[%c0_5, %c0_6, %c0_7], %8 {strides = array<i32>} : memref<1x3x2048xf32, #tpu.memory_space<vmem>>, vector<1x3x2048xf32>,
    return
  }
  func.func @transform_0(%arg0: i32, %arg1: i32) -> (i32, i32, i32) {
    %c0_i32 = arith.constant 0 : i32
    %c0_i32_0 = arith.constant 0 : i32
    %c0_i32_1 = arith.constant 0 : i32
    return %arg0, %c0_i32, %c0_i32_0 : i32, i32, i32
  }
  func.func @transform_1(%arg0: i32, %arg1: i32) -> (i32, i32, i32) {
    %c0_i32 = arith.constant 0 : i32
    %c0_i32_0 = arith.constant 0 : i32
    return %arg0, %c0_i32, %arg1 : i32, i32, i32
  }
  func.func @transform_2(%arg0: i32, %arg1: i32) -> (i32, i32, i32) {
    %c0_i32 = arith.constant 0 : i32
    %c0_i32_0 = arith.constant 0 : i32
    return %arg0, %c0_i32, %arg1 : i32, i32, i32
  }
}

</mosaic_0001>

<bundles_post_ra>
// kernel: generator_forward.5
= control target key start
LH: loop header
LB: loop body
LE: loop exit
PB: predicated region body
PF: predicated region fallthrough
CT: control target
= control target key end

     0   :  { %vm259_vm0 = vcmask 261120   ;;  %vm580_vm1 = vcmask 257024   ;;  %s973_s1 = inlined_call_operand.vmem [shape: bf16[1,256,32], index: 1, kind: input, shape index: {}]   ;;  %s974_s0 = inlined_call_operand.vmem [shape: bf16[1,64,256], index: 0, kind: input, shape index: {}]   ;;  %s975_s2 = inlined_call_operand.vmem [shape: f32[64,1], index: 2, kind: input, shape index: {}]   ;;  %s976_s3 = inlined_call_operand.vmem [shape: f32[64,1], index: 3, kind: input, shape index: {}]   ;;  %s977_s4 = inlined_call_operand.vmem [shape: bf16[1,64,32], index: 4, kind: output, shape index: {}]  }
   0x1   :  { %v692_v0 = vld [vmem:[%s973_s1 + $0x40] sm:$0xff]   ;;  %v694_v2 = vld [vmem:[%s973_s1 + $0x48] sm:$0xff]   ;;  %v696_v4 = vld [vmem:[%s973_s1 + $0x50] sm:$0xff]  }
   0x2   :  { %v693_v1 = vld [vmem:[%s973_s1] sm:$0xff]   ;;  %633 = vmatprep.subr.bf16.mxu0 %v692_v0  ;;  %673 = vmatprep.subr.bf16.mxu1 %v692_v0  ;;  %v695_v3 = vld [vmem:[%s973_s1 + $0x8] sm:$0xff]   ;;  %v697_v5 = vld [vmem:[%s973_s1 + $0x10] sm:$0xff]  }
   0x3   :  { %634 = vmatpush3.bf16.msra.mxu0 %v693_v1  ;;  %681 = vmatpush3.bf16.msra.mxu1 %v693_v1  ;;  %v698_v6 = vld [vmem:[%s973_s1 + $0x58] sm:$0xff]   ;;  %v700_v8 = vld [vmem:[%s973_s1 + $0x60] sm:$0xff]   ;;  %v702_v10 = vld [vmem:[%s973_s1 + $0x68] sm:$0xff]  }
   0x4   :  { %635 = vmatprep.subr.bf16.mxu0 %v694_v2  ;;  %674 = vmatprep.subr.bf16.mxu1 %v694_v2  ;;  %v699_v7 = vld [vmem:[%s973_s1 + $0x18] sm:$0xff]   ;;  %v701_v9 = vld [vmem:[%s973_s1 + $0x20] sm:$0xff]   ;;  %v703_v13 = vld [vmem:[%s973_s1 + $0x28] sm:$0xff]  }
   0x5   :  { %v710_v11 = vld [vmem:[%s974_s0 + $0x4] ss:$8 sps:$4 sm:$0xff]   ;;  %v704_v14 = vld [vmem:[%s973_s1 + $0x70] sm:$0xff]   ;;  %v706_v16 = vld [vmem:[%s973_s1 + $0x78] sm:$0xff]  }
   0x6   :  { %v713_v12 = vld [vmem:[%s974_s0 + $0x24] ss:$8 sps:$4 sm:$0xff]   ;;  %226 = vmatprep.mubr.bf16.mxu0 %v710_v11  ;;  %v705_v15 = vld [vmem:[%s973_s1 + $0x30] sm:$0xff]   ;;  %v707_v17 = vld [vmem:[%s973_s1 + $0x38] sm:$0xff]  }
   0x7   :  { %636 = vmatpush3.bf16.msra.mxu0 %v695_v3  ;;  %682 = vmatpush3.bf16.msra.mxu1 %v695_v3  ;;  %v708_v18 = vld [vmem:[%s974_s0] ss:$8 sps:$4 sm:$0xff]   ;;  %v714_v20 = vld [vmem:[%s974_s0 + $0x14] ss:$8 sps:$4 sm:$0xff]   ;;  %v716_v22 = vld [vmem:[%s974_s0 + $0x10] ss:$8 sps:$4 sm:$0xff]  }
   0x8   :  { %637 = vmatprep.subr.bf16.mxu0 %v696_v4  ;;  %675 = vmatprep.subr.bf16.mxu1 %v696_v4  ;;  %v711_v19 = vld [vmem:[%s974_s0 + $0x20] ss:$8 sps:$4 sm:$0xff]   ;;  %v717_v21 = vld [vmem:[%s974_s0 + $0x34] ss:$8 sps:$4 sm:$0xff]   ;;  %v719_v23 = vld [vmem:[%s974_s0 + $0x30] ss:$8 sps:$4 sm:$0xff]  }
   0x9   :  { %242 = vmatprep.mubr.bf16.mxu1 %v713_v12 }
   0xb   :  { %638 = vmatpush3.bf16.msra.mxu0 %v697_v5  ;;  %683 = vmatpush3.bf16.msra.mxu1 %v697_v5 }
   0xc   :  { %639 = vmatprep.subr.bf16.mxu0 %v698_v6  ;;  %676 = vmatprep.subr.bf16.mxu1 %v698_v6 }
   0xf   :  { %640 = vmatpush3.bf16.msra.mxu0 %v699_v7  ;;  %684 = vmatpush3.bf16.msra.mxu1 %v699_v7 }
  0x10   :  { %641 = vmatprep.subr.bf16.mxu0 %v700_v8  ;;  %677 = vmatprep.subr.bf16.mxu1 %v700_v8  ;;  %v736_v8 = vmov 0  }
  0x11   :  { %690 = vset.pattern.permute.xlu0 %v736_v8  ;;  %691 = vset.pattern.permute.xlu1 %v736_v8 }
  0x13   :  { %642 = vmatpush3.bf16.msra.mxu0 %v701_v9  ;;  %685 = vmatpush3.bf16.msra.mxu1 %v701_v9 }
  0x14   :  { %643 = vmatprep.subr.bf16.mxu0 %v702_v10  ;;  %678 = vmatprep.subr.bf16.mxu1 %v702_v10 }
  0x17   :  { %644 = vmatpush3.bf16.msra.mxu0 %v703_v13  ;;  %686 = vmatpush3.bf16.msra.mxu1 %v703_v13 }
  0x18   :  { %645 = vmatprep.subr.bf16.mxu0 %v704_v14  ;;  %679 = vmatprep.subr.bf16.mxu1 %v704_v14 }
  0x1b   :  { %646 = vmatpush3.bf16.msra.mxu0 %v705_v15  ;;  %687 = vmatpush3.bf16.msra.mxu1 %v705_v15 }
  0x1c   :  { %647 = vmatprep.subr.bf16.mxu0 %v706_v16  ;;  %680 = vmatprep.subr.bf16.mxu1 %v706_v16 }
  0x1f   :  { %648 = vmatpush3.bf16.msra.mxu0 %v707_v17  ;;  %688 = vmatpush3.bf16.msra.mxu1 %v707_v17 }
  0x22   :  { %227 = vmatmul.mubr.bf16.vlgmr.msra.gmra.mrb[0].mxu0 %v708_v18  ;;  %243 = vmatmul.mubr.bf16.vlgmr.msra.gmra.mrb[0].mxu1 %v711_v19 }
  0x23   :  { %234 = vmatprep.mubr.bf16.mxu0 %v714_v20  ;;  %250 = vmatprep.mubr.bf16.mxu1 %v717_v21 }
  0x2a   :  { %235 = vmatmul.mubr.bf16.gmra.mrb[4].mxu0 %v716_v22  ;;  %251 = vmatmul.mubr.bf16.gmra.mrb[4].mxu1 %v719_v23 }
  0xf5   :  { %v649_v24 = vpop.f32.mrb[0].mxu0  ;;  %v661_v25 = vpop.f32.mrb[0].mxu1 }
  0xf6   :  { %v650_v26 = vpop.f32.mrb[1].mxu0  ;;  %v662_v27 = vpop.f32.mrb[1].mxu1 }
  0xf7   :  { %v651_v28 = vadd.f32 %v650_v26, %v649_v24  ;;  %v663_v29 = vadd.f32 %v662_v27, %v661_v25  ;;  %v652_v30 = vpop.f32.mrb[2].mxu0  ;;  %v664_v31 = vpop.f32.mrb[2].mxu1 }
  0xf8   :  { %v653_v32 = vpop.f32.mrb[3].mxu0  ;;  %v665_v33 = vpop.f32.mrb[3].mxu1 }
  0xf9   :  { %260 = vst.msk [vmem:[#allocation2] sm:$0xff] %vm259_vm0, %v651_v28  ;;  %264 = vst.msk [vmem:[#allocation2 + $0x20] sm:$0xff] %vm259_vm0, %v663_v29  ;;  %v654_v34 = vadd.f32 %v653_v32, %v652_v30  ;;  %v666_v35 = vadd.f32 %v665_v33, %v664_v31  ;;  %v268_v36 = vsel %vm259_vm0, %v651_v28, 0.0  ;;  %v280_v38 = vsel %vm259_vm0, %v663_v29, 0.0 }
  0xfa   :  { %269 = vadd.xlane.f32.xlu0 %v268_v36  ;;  %v300_v53 = vmul.f32 %v651_v28, %v651_v28  ;;  %v304_v59 = vmul.f32 %v663_v29, %v663_v29 }
  0xfb   :  { %261 = vst.msk [vmem:[#allocation2 + $0x8] sm:$0xff] %vm259_vm0, %v654_v34  ;;  %265 = vst.msk [vmem:[#allocation2 + $0x28] sm:$0xff] %vm259_vm0, %v666_v35  ;;  %v283_v37 = vsel %vm259_vm0, %v666_v35, 0.0  ;;  %v301_v39 = vmul.f32 %v654_v34, %v654_v34  ;;  %v305_v46 = vmul.f32 %v666_v35, %v666_v35  ;;  %v271_v52 = vsel %vm259_vm0, %v654_v34, 0.0 }
  0xfc   :  { %284 = vadd.xlane.f32.xlu1 %v283_v37  ;;  %v308_v57 = vsel %vm259_vm0, %v300_v53, 0.0  ;;  %v320_v60 = vsel %vm259_vm0, %v304_v59, 0.0 }
  0xfd   :  { %v655_v40 = vpop.f32.mrb[4].mxu0  ;;  %v667_v41 = vpop.f32.mrb[4].mxu1  ;;  %v311_v44 = vsel %vm259_vm0, %v301_v39, 0.0  ;;  %v323_v56 = vsel %vm259_vm0, %v305_v46, 0.0 }
  0xfe   :  { %281 = vadd.xlane.f32.xlu0 %v280_v38  ;;  %v656_v42 = vpop.f32.mrb[5].mxu0  ;;  %v668_v43 = vpop.f32.mrb[5].mxu1 }
  0xff   :  { %v657_v45 = vadd.f32 %v656_v42, %v655_v40  ;;  %v658_v47 = vpop.f32.mrb[6].mxu0  ;;  %v669_v48 = vadd.f32 %v668_v43, %v667_v41  ;;  %v670_v49 = vpop.f32.mrb[6].mxu1 }
 0x100   :  { %312 = vadd.xlane.f32.xlu1 %v311_v44  ;;  %v659_v50 = vpop.f32.mrb[7].mxu0  ;;  %v671_v51 = vpop.f32.mrb[7].mxu1 }
 0x101   :  { %262 = vst.msk [vmem:[#allocation2 + $0x10] sm:$0xff] %vm259_vm0, %v657_v45  ;;  %v660_v54 = vadd.f32 %v659_v50, %v658_v47  ;;  %266 = vst.msk [vmem:[#allocation2 + $0x30] sm:$0xff] %vm259_vm0, %v669_v48  ;;  %v672_v55 = vadd.f32 %v671_v51, %v670_v49  ;;  %v274_v58 = vsel %vm259_vm0, %v657_v45, 0.0  ;;  %v286_v62 = vsel %vm259_vm0, %v669_v48, 0.0  ;;  %v381_v51 = vld [vmem:[%s975_s2 + $0x8] sm:$0xff] }
 0x102   :  { %272 = vadd.xlane.f32.xlu0 %v271_v52  ;;  %v302_v63 = vmul.f32 %v657_v45, %v657_v45  ;;  %v306_v3 = vmul.f32 %v669_v48, %v669_v48 }
 0x103   :  { %263 = vst.msk [vmem:[#allocation2 + $0x18] sm:$0xff] %vm259_vm0, %v660_v54  ;;  %267 = vst.msk [vmem:[#allocation2 + $0x38] sm:$0xff] %vm259_vm0, %v672_v55  ;;  %v277_v61 = vsel %vm259_vm0, %v660_v54, 0.0  ;;  %v289_v0 = vsel %vm259_vm0, %v672_v55, 0.0  ;;  %v303_v1 = vmul.f32 %v660_v54, %v660_v54  ;;  %v307_v5 = vmul.f32 %v672_v55, %v672_v55 }
 0x104   :  { %324 = vadd.xlane.f32.xlu1 %v323_v56  ;;  %v314_v2 = vsel %vm259_vm0, %v302_v63, 0.0  ;;  %v326_v6 = vsel %vm259_vm0, %v306_v3, 0.0 }
 0x105   :  { %v317_v4 = vsel %vm259_vm0, %v303_v1, 0.0  ;;  %v329_v7 = vsel %vm259_vm0, %v307_v5, 0.0 }
 0x106   :  { %309 = vadd.xlane.f32.xlu0 %v308_v57 }
 0x108   :  { %275 = vadd.xlane.f32.xlu1 %v274_v58 }
 0x10a   :  { %321 = vadd.xlane.f32.xlu0 %v320_v60  ;;  %v380_v60 = vld [vmem:[%s975_s2] sm:$0xff] }
 0x10c   :  { %278 = vadd.xlane.f32.xlu1 %v277_v61  ;;  %v385_v61 = vld [vmem:[%s975_s2 + $0x28] sm:$0xff] }
 0x10e   :  { %287 = vadd.xlane.f32.xlu0 %v286_v62 }
 0x110   :  { %290 = vadd.xlane.f32.xlu1 %v289_v0 }
 0x112   :  { %315 = vadd.xlane.f32.xlu0 %v314_v2 }
 0x114   :  { %318 = vadd.xlane.f32.xlu1 %v317_v4 }
 0x116   :  { %327 = vadd.xlane.f32.xlu0 %v326_v6 }
 0x118   :  { %330 = vadd.xlane.f32.xlu1 %v329_v7 }
 0x187   :  { %v270_v9 = vpop.xlane.xlu0 %269 }
 0x188   :  { %v860_v15 = vmul.f32 0.03125, %v270_v9 }
 0x189   :  { %v285_v10 = vpop.xlane.xlu1 %284 }
 0x18a   :  { %v858_v13 = vmul.f32 0.03125, %v285_v10  ;;  %v356_v23 = vmul.f32 %v860_v15, %v860_v15 }
 0x18b   :  { %v282_v11 = vpop.xlane.xlu0 %281 }
 0x18c   :  { %v361_v18 = vmul.f32 %v858_v13, %v858_v13  ;;  %v866_v27 = vmul.f32 0.03125, %v282_v11 }
 0x18d   :  { %v313_v12 = vpop.xlane.xlu1 %312 }
 0x18e   :  { %v349_v19 = vmul.f32 0.03125, %v313_v12  ;;  %v360_v36 = vmul.f32 %v866_v27, %v866_v27  ;;  %v413_v12 = vld [vmem:[%s976_s3 + $0x8] sm:$0xff] }
 0x18f   :  { %v273_v14 = vpop.xlane.xlu0 %272 }
 0x190   :  { %v341_v16 = vmul.f32 0.03125, %v273_v14  ;;  %v384_v14 = vld [vmem:[%s975_s2 + $0x20] sm:$0xff] }
 0x191   :  { %v325_v17 = vpop.xlane.xlu1 %324 }
 0x192   :  { %v357_v20 = vmul.f32 %v341_v16, %v341_v16  ;;  %v353_v21 = vmul.f32 0.03125, %v325_v17 }
 0x193   :  { %v310_v22 = vpop.xlane.xlu0 %309 }
 0x194   :  { %v365_v24 = vsub.f32 %v349_v19, %v357_v20  ;;  %v369_v25 = vsub.f32 %v353_v21, %v361_v18  ;;  %v348_v26 = vmul.f32 0.03125, %v310_v22 }
 0x195   :  { %v276_v28 = vpop.xlane.xlu1 %275 }
 0x196   :  { %v373_v29 = vmax.f32 %v365_v24, 0.0  ;;  %v377_v30 = vmax.f32 %v369_v25, 0.0  ;;  %v364_v31 = vsub.f32 %v348_v26, %v356_v23  ;;  %v872_v45 = vmul.f32 0.03125, %v276_v28  ;;  %v417_v24 = vld [vmem:[%s976_s3 + $0x28] sm:$0xff] }
 0x197   :  { %v322_v32 = vpop.xlane.xlu0 %321 }
 0x198   :  { %v389_v33 = vadd.f32 1e-05, %v373_v29  ;;  %v393_v34 = vadd.f32 1e-05, %v377_v30  ;;  %v372_v35 = vmax.f32 %v364_v31, 0.0  ;;  %v352_v37 = vmul.f32 0.03125, %v322_v32 }
 0x199   :  { %v279_v38 = vpop.xlane.xlu1 %278  ;;  %v358_v52 = vmul.f32 %v872_v45, %v872_v45  ;;  %v383_v29 = vld [vmem:[%s975_s2 + $0x18] sm:$0xff]  ;;  %v412_v32 = vld [vmem:[%s976_s3] sm:$0xff] }
 0x19a   :  { %720 = vrsqrt.f32 %v389_v33  ;;  %v388_v39 = vadd.f32 1e-05, %v372_v35  ;;  %v368_v40 = vsub.f32 %v352_v37, %v360_v36  ;;  %v870_v42 = vmul.f32 0.03125, %v279_v38  ;;  %v387_v35 = vld [vmem:[%s975_s2 + $0x38] sm:$0xff] }
 0x19b   :  { %722 = vrsqrt.f32 %v393_v34  ;;  %v288_v41 = vpop.xlane.xlu0 %287  ;;  %v415_v34 = vld [vmem:[%s976_s3 + $0x18] sm:$0xff] }
 0x19c   :  { %724 = vrsqrt.f32 %v388_v39  ;;  %v376_v43 = vmax.f32 %v368_v40, 0.0  ;;  %v359_v48 = vmul.f32 %v870_v42, %v870_v42  ;;  %v883_v53 = vmul.f32 0.03125, %v288_v41  ;;  %v416_v40 = vld [vmem:[%s976_s3 + $0x20] sm:$0xff] }
 0x19d   :  { %v291_v44 = vpop.xlane.xlu1 %290 }
 0x19e   :  { %v392_v46 = vadd.f32 1e-05, %v376_v43  ;;  %v876_v49 = vmul.f32 0.03125, %v291_v44  ;;  %v362_v2 = vmul.f32 %v883_v53, %v883_v53  ;;  %v419_v43 = vld [vmem:[%s976_s3 + $0x38] sm:$0xff] }
 0x19f   :  { %v316_v47 = vpop.xlane.xlu0 %315 }
 0x1a0   :  { %726 = vrsqrt.f32 %v392_v46  ;;  %v350_v54 = vmul.f32 0.03125, %v316_v47  ;;  %v363_v57 = vmul.f32 %v876_v49, %v876_v49 }
 0x1a1   :  { %v319_v50 = vpop.xlane.xlu1 %318 }
 0x1a2   :  { %v351_v55 = vmul.f32 0.03125, %v319_v50  ;;  %v366_v3 = vsub.f32 %v350_v54, %v358_v52  ;;  %v414_v54 = vld [vmem:[%s976_s3 + $0x10] sm:$0xff] }
 0x1a3   :  { %v328_v59 = vpop.xlane.xlu0 %327 }
 0x1a4   :  { %v721_v56 = vpop.eup %720  ;;  %v367_v58 = vsub.f32 %v351_v55, %v359_v48  ;;  %v354_v7 = vmul.f32 0.03125, %v328_v59  ;;  %v374_v19 = vmax.f32 %v366_v3, 0.0 }
 0x1a5   :  { %v723_v62 = vpop.eup %722  ;;  %v405_v63 = vmul.f32 %v721_v56, %v381_v51  ;;  %v331_v0 = vpop.xlane.xlu1 %330  ;;  %v386_v51 = vld [vmem:[%s975_s2 + $0x30] sm:$0xff] }
 0x1a6   :  { %v725_v1 = vpop.eup %724  ;;  %v375_v4 = vmax.f32 %v367_v58, 0.0  ;;  %v355_v5 = vmul.f32 0.03125, %v331_v0  ;;  %v409_v9 = vmul.f32 %v723_v62, %v385_v61  ;;  %v370_v20 = vsub.f32 %v354_v7, %v362_v2  ;;  %v437_v62 = vld [vmem:[#allocation2 + $0x8] sm:$0xff] }
 0x1a7   :  { %v421_v6 = vmul.f32 %v405_v63, %v341_v16  ;;  %v404_v8 = vmul.f32 %v725_v1, %v380_v60  ;;  %v390_v25 = vadd.f32 1e-05, %v374_v19  ;;  %v441_v1 = vld [vmem:[#allocation2 + $0x28] sm:$0xff] }
 0x1a8   :  { %v391_v10 = vadd.f32 1e-05, %v375_v4  ;;  %v371_v11 = vsub.f32 %v355_v5, %v363_v57  ;;  %v425_v21 = vmul.f32 %v409_v9, %v858_v13  ;;  %v378_v26 = vmax.f32 %v370_v20, 0.0  ;;  %v418_v57 = vld [vmem:[%s976_s3 + $0x30] sm:$0xff]  ;;  %v436_v5 = vld [vmem:[#allocation2] sm:$0xff] }
 0x1a9   :  { %446 = vperm.xlu0 %690, %v404_v8   ;;  %v429_v16 = vsub.f32 %v413_v12, %v421_v6  ;;  %v420_v31 = vmul.f32 %v404_v8, %v860_v15  ;;  %v440_v12 = vld [vmem:[#allocation2 + $0x20] sm:$0xff] }
 0x1aa   :  { %728 = vrsqrt.f32 %v391_v10  ;;  %v379_v17 = vmax.f32 %v371_v11, 0.0  ;;  %v727_v18 = vpop.eup %726  ;;  %v433_v28 = vsub.f32 %v417_v24, %v425_v21  ;;  %v394_v13 = vadd.f32 1e-05, %v378_v26  ;;  %v439_v26 = vld [vmem:[#allocation2 + $0x18] sm:$0xff] }
 0x1ab   :  { %v408_v23 = vmul.f32 %v727_v18, %v384_v14  ;;  %v428_v38 = vsub.f32 %v412_v32, %v420_v31 }
 0x1ac   :  { %v395_v22 = vadd.f32 1e-05, %v379_v17 }
 0x1ad   :  { %499 = vperm.xlu0 %690, %v429_v16   ;;  %466 = vperm.xlu1 %691, %v408_v23   ;;  %v424_v15 = vmul.f32 %v408_v23, %v866_v27  ;;  %v382_v27 = vld [vmem:[%s975_s2 + $0x10] sm:$0xff] }
 0x1ae   :  { %730 = vrsqrt.f32 %v395_v22 }
 0x1af   :  { %732 = vrsqrt.f32 %v390_v25  ;;  %v432_v46 = vsub.f32 %v416_v40, %v424_v15 }
 0x1b0   :  { %734 = vrsqrt.f32 %v394_v13 }
 0x1b1   :  { %519 = vperm.xlu0 %690, %v433_v28   ;;  %451 = vperm.xlu1 %691, %v405_v63  }
 0x1b4   :  { %v729_v30 = vpop.eup %728 }
 0x1b5   :  { %v407_v33 = vmul.f32 %v729_v30, %v383_v29  ;;  %471 = vperm.xlu1 %691, %v409_v9   ;;  %v443_v30 = vld [vmem:[#allocation2 + $0x38] sm:$0xff] }
 0x1b7   :  { %v423_v36 = vmul.f32 %v407_v33, %v870_v42 }
 0x1b8   :  { %v731_v37 = vpop.eup %730 }
 0x1b9   :  { %v431_v39 = vsub.f32 %v415_v34, %v423_v36  ;;  %v411_v41 = vmul.f32 %v731_v37, %v387_v35  ;;  %494 = vperm.xlu1 %691, %v428_v38   ;;  %v733_v42 = vpop.eup %732  ;;  %v438_v35 = vld [vmem:[#allocation2 + $0x10] sm:$0xff] }
 0x1ba   :  { %v406_v48 = vmul.f32 %v733_v42, %v382_v27  ;;  %v735_v50 = vpop.eup %734 }
 0x1bb   :  { %509 = vperm.xlu0 %690, %v431_v39   ;;  %v427_v44 = vmul.f32 %v411_v41, %v876_v49  ;;  %v410_v52 = vmul.f32 %v735_v50, %v386_v51 }
 0x1bc   :  { %v422_v49 = vmul.f32 %v406_v48, %v872_v45 }
 0x1bd   :  { %v435_v47 = vsub.f32 %v419_v43, %v427_v44  ;;  %514 = vperm.xlu1 %691, %v432_v46   ;;  %v426_v56 = vmul.f32 %v410_v52, %v883_v53 }
 0x1be   :  { %v430_v55 = vsub.f32 %v414_v54, %v422_v49 }
 0x1bf   :  { %529 = vperm.xlu0 %690, %v435_v47   ;;  %v434_v58 = vsub.f32 %v418_v57, %v426_v56 }
 0x1c1   :  { %456 = vperm.xlu1 %691, %v406_v48  }
 0x1c5   :  { %476 = vperm.xlu1 %691, %v410_v52  }
 0x1c9   :  { %461 = vperm.xlu1 %691, %v407_v33  }
 0x1cd   :  { %481 = vperm.xlu1 %691, %v411_v41   ;;  %v442_v41 = vld [vmem:[#allocation2 + $0x30] sm:$0xff] }
 0x1d1   :  { %504 = vperm.xlu1 %691, %v430_v55  }
 0x1d5   :  { %524 = vperm.xlu1 %691, %v434_v58  }
 0x228   :  { %v447_v59 = vpop.permute.xlu0 %446 }
 0x229   :  { %v484_v6 = vmul.f32 %v447_v59, %v436_v5 }
 0x22c   :  { %v467_v60 = vpop.permute.xlu1 %466  ;;  %v500_v61 = vpop.permute.xlu0 %499 }
 0x22d   :  { %v488_v14 = vmul.f32 %v467_v60, %v440_v12 }
 0x230   :  { %v452_v45 = vpop.permute.xlu1 %451  ;;  %v520_v53 = vpop.permute.xlu0 %519 }
 0x231   :  { %v485_v63 = vmul.f32 %v452_v45, %v437_v62 }
 0x233   :  { %v533_v0 = vadd.f32 %v500_v61, %v485_v63 }
 0x234   :  { %v472_v2 = vpop.permute.xlu1 %471 }
 0x235   :  { %v541_v3 = vmax.f32 %v533_v0, 0.0  ;;  %v489_v4 = vmul.f32 %v472_v2, %v441_v1 }
 0x237   :  { %v626_v7 = vpack.c.bf16 %v541_v3, %v541_v3  ;;  %v537_v8 = vadd.f32 %v520_v53, %v489_v4 }
 0x238   :  { %v495_v9 = vpop.permute.xlu1 %494 }
 0x239   :  { %582 = vst.msk [vmem:[%s977_s4 + $0x4] sm:$0xf] %vm580_vm1, %v626_v7  ;;  %v545_v10 = vmax.f32 %v537_v8, 0.0  ;;  %v532_v11 = vadd.f32 %v495_v9, %v484_v6 }
 0x23a   :  { %v510_v25 = vpop.permute.xlu0 %509 }
 0x23b   :  { %v630_v17 = vpack.c.bf16 %v545_v10, %v545_v10  ;;  %v540_v18 = vmax.f32 %v532_v11, 0.0 }
 0x23c   :  { %v515_v19 = vpop.permute.xlu1 %514 }
 0x23d   :  { %586 = vst.msk [vmem:[%s977_s4 + $0x14] sm:$0xf] %vm580_vm1, %v630_v17  ;;  %v625_v20 = vpack.c.bf16 %v540_v18, %v540_v18  ;;  %v536_v16 = vadd.f32 %v515_v19, %v488_v14 }
 0x23e   :  { %v530_v34 = vpop.permute.xlu0 %529 }
 0x23f   :  { %581 = vst.msk [vmem:[%s977_s4] sm:$0xf] %vm580_vm1, %v625_v20  ;;  %v544_v21 = vmax.f32 %v536_v16, 0.0 }
 0x240   :  { %v457_v22 = vpop.permute.xlu1 %456 }
 0x241   :  { %v629_v23 = vpack.c.bf16 %v544_v21, %v544_v21  ;;  %v486_v36 = vmul.f32 %v457_v22, %v438_v35 }
 0x243   :  { %585 = vst.msk [vmem:[%s977_s4 + $0x10] sm:$0xf] %vm580_vm1, %v629_v23 }
 0x244   :  { %v477_v24 = vpop.permute.xlu1 %476 }
 0x245   :  { %v490_v43 = vmul.f32 %v477_v24, %v442_v41 }
 0x248   :  { %v462_v28 = vpop.permute.xlu1 %461 }
 0x249   :  { %v487_v29 = vmul.f32 %v462_v28, %v439_v26 }
 0x24b   :  { %v535_v13 = vadd.f32 %v510_v25, %v487_v29 }
 0x24c   :  { %v482_v31 = vpop.permute.xlu1 %481 }
 0x24d   :  { %v543_v32 = vmax.f32 %v535_v13, 0.0  ;;  %v491_v33 = vmul.f32 %v482_v31, %v443_v30 }
 0x24f   :  { %v628_v37 = vpack.c.bf16 %v543_v32, %v543_v32  ;;  %v539_v38 = vadd.f32 %v530_v34, %v491_v33 }
 0x250   :  { %v505_v15 = vpop.permute.xlu1 %504 }
 0x251   :  { %584 = vst.msk [vmem:[%s977_s4 + $0xc] sm:$0xf] %vm580_vm1, %v628_v37  ;;  %v547_v39 = vmax.f32 %v539_v38, 0.0  ;;  %v534_v40 = vadd.f32 %v505_v15, %v486_v36 }
 0x253   :  { %v632_v44 = vpack.c.bf16 %v547_v39, %v547_v39  ;;  %v542_v46 = vmax.f32 %v534_v40, 0.0 }
 0x254   :  { %v525_v42 = vpop.permute.xlu1 %524 }
 0x255   :  { %588 = vst.msk [vmem:[%s977_s4 + $0x1c] sm:$0xf] %vm580_vm1, %v632_v44  ;;  %v627_v47 = vpack.c.bf16 %v542_v46, %v542_v46  ;;  %v538_v27 = vadd.f32 %v525_v42, %v490_v43 }
 0x257   :  { %583 = vst.msk [vmem:[%s977_s4 + $0x8] sm:$0xf] %vm580_vm1, %v627_v47  ;;  %v546_v48 = vmax.f32 %v538_v27, 0.0 }
 0x259   :  { %v631_v50 = vpack.c.bf16 %v546_v48, %v546_v48 }
 0x25b   :  { %587 = vst.msk [vmem:[%s977_s4 + $0x18] sm:$0xf] %vm580_vm1, %v631_v50 }

// kernel: generator_forward.6
= control target key start
LH: loop header
LB: loop body
LE: loop exit
PB: predicated region body
PF: predicated region fallthrough
CT: control target
= control target key end

     0   :  { %vm219_vm0 = vcmask 261120   ;;  %vm1112_vm1 = vcmask 257024   ;;  %s2082_s1 = inlined_call_operand.vmem [shape: bf16[4,256,32], index: 1, kind: input, shape index: {}]   ;;  %s2083_s0 = inlined_call_operand.vmem [shape: bf16[4,32,256], index: 0, kind: input, shape index: {}]   ;;  %s2084_s2 = inlined_call_operand.vmem [shape: f32[32,1], index: 2, kind: input, shape index: {}]   ;;  %s2085_s3 = inlined_call_operand.vmem [shape: f32[32,1], index: 3, kind: input, shape index: {}]   ;;  %s2086_s4 = inlined_call_operand.vmem [shape: bf16[4,32,32], index: 4, kind: output, shape index: {}]  }
   0x1   :  { %v1579_v0 = vld [vmem:[%s2082_s1 + $0x40] sm:$0xff]   ;;  %v1583_v4 = vld [vmem:[%s2082_s1 + $0x48] sm:$0xff]   ;;  %v1587_v8 = vld [vmem:[%s2082_s1 + $0x50] sm:$0xff]  }
   0x2   :  { %v1580_v1 = vld [vmem:[%s2082_s1 + $0xc0] sm:$0xff]   ;;  %1464 = vmatprep.subr.bf16.mxu0 %v1579_v0  ;;  %v1584_v5 = vld [vmem:[%s2082_s1 + $0xc8] sm:$0xff]   ;;  %v1588_v9 = vld [vmem:[%s2082_s1 + $0xd0] sm:$0xff]  }
   0x3   :  { %v1581_v2 = vld [vmem:[%s2082_s1] sm:$0xff]   ;;  %1492 = vmatprep.subr.bf16.mxu1 %v1580_v1  ;;  %v1585_v6 = vld [vmem:[%s2082_s1 + $0x8] sm:$0xff]   ;;  %v1589_v10 = vld [vmem:[%s2082_s1 + $0x10] sm:$0xff]  }
   0x4   :  { %v1582_v3 = vld [vmem:[%s2082_s1 + $0x80] sm:$0xff]   ;;  %1465 = vmatpush3.bf16.msra.mxu0 %v1581_v2  ;;  %v1586_v7 = vld [vmem:[%s2082_s1 + $0x88] sm:$0xff]   ;;  %v1590_v11 = vld [vmem:[%s2082_s1 + $0x90] sm:$0xff]  }
   0x5   :  { %1493 = vmatpush3.bf16.msra.mxu1 %v1582_v3  ;;  %1466 = vmatprep.subr.bf16.mxu0 %v1583_v4  ;;  %v1591_v12 = vld [vmem:[%s2082_s1 + $0x58] sm:$0xff]   ;;  %v1595_v16 = vld [vmem:[%s2082_s1 + $0x60] sm:$0xff]   ;;  %v1599_v20 = vld [vmem:[%s2082_s1 + $0x68] sm:$0xff]  }
   0x6   :  { %1494 = vmatprep.subr.bf16.mxu1 %v1584_v5  ;;  %v1592_v13 = vld [vmem:[%s2082_s1 + $0xd8] sm:$0xff]   ;;  %v1596_v17 = vld [vmem:[%s2082_s1 + $0xe0] sm:$0xff]   ;;  %v1600_v21 = vld [vmem:[%s2082_s1 + $0xe8] sm:$0xff]  }
   0x7   :  { %v1593_v14 = vld [vmem:[%s2082_s1 + $0x18] sm:$0xff]   ;;  %v1597_v18 = vld [vmem:[%s2082_s1 + $0x20] sm:$0xff]   ;;  %v1601_v22 = vld [vmem:[%s2082_s1 + $0x28] sm:$0xff]  }
   0x8   :  { %1467 = vmatpush3.bf16.msra.mxu0 %v1585_v6  ;;  %v1594_v15 = vld [vmem:[%s2082_s1 + $0x98] sm:$0xff]   ;;  %v1598_v19 = vld [vmem:[%s2082_s1 + $0xa0] sm:$0xff]   ;;  %v1602_v23 = vld [vmem:[%s2082_s1 + $0xa8] sm:$0xff]  }
   0x9   :  { %1495 = vmatpush3.bf16.msra.mxu1 %v1586_v7  ;;  %1468 = vmatprep.subr.bf16.mxu0 %v1587_v8  ;;  %v1603_v24 = vld [vmem:[%s2082_s1 + $0x70] sm:$0xff]   ;;  %v1607_v28 = vld [vmem:[%s2082_s1 + $0x78] sm:$0xff]   ;;  %v1611_v32 = vld [vmem:[%s2083_s0] ss:$8 sps:$4 sm:$0xff]  }
   0xa   :  { %1496 = vmatprep.subr.bf16.mxu1 %v1588_v9  ;;  %v1604_v25 = vld [vmem:[%s2082_s1 + $0xf0] sm:$0xff]   ;;  %v1608_v29 = vld [vmem:[%s2082_s1 + $0xf8] sm:$0xff]   ;;  %v1613_v33 = vld [vmem:[%s2083_s0 + $0x4] ss:$8 sps:$4 sm:$0xff]  }
   0xb   :  { %v1605_v26 = vld [vmem:[%s2082_s1 + $0x30] sm:$0xff]   ;;  %v1609_v30 = vld [vmem:[%s2082_s1 + $0x38] sm:$0xff]   ;;  %v1614_v34 = vld [vmem:[%s2083_s0 + $0x20] ss:$8 sps:$4 sm:$0xff]   ;;  %202 = vmatprep.mubr.bf16.mxu0 %v1613_v33 }
   0xc   :  { %1469 = vmatpush3.bf16.msra.mxu0 %v1589_v10  ;;  %v1606_v27 = vld [vmem:[%s2082_s1 + $0xb0] sm:$0xff]   ;;  %v1610_v31 = vld [vmem:[%s2082_s1 + $0xb8] sm:$0xff]   ;;  %v1616_v35 = vld [vmem:[%s2083_s0 + $0x24] ss:$8 sps:$4 sm:$0xff]  }
   0xd   :  { %1497 = vmatpush3.bf16.msra.mxu1 %v1590_v11  ;;  %1470 = vmatprep.subr.bf16.mxu0 %v1591_v12  ;;  %v1617_v36 = vld [vmem:[%s2082_s1 + $0x140] sm:$0xff]   ;;  %v1621_v40 = vld [vmem:[%s2082_s1 + $0x148] sm:$0xff]   ;;  %v1625_v44 = vld [vmem:[%s2082_s1 + $0x150] sm:$0xff]  }
   0xe   :  { %1498 = vmatprep.subr.bf16.mxu1 %v1592_v13  ;;  %446 = vmatprep.mubr.bf16.mxu1 %v1616_v35  ;;  %v1618_v37 = vld [vmem:[%s2082_s1 + $0x100] sm:$0xff]   ;;  %v1622_v41 = vld [vmem:[%s2082_s1 + $0x108] sm:$0xff]   ;;  %v1626_v45 = vld [vmem:[%s2082_s1 + $0x110] sm:$0xff]  }
   0xf   :  { %v1619_v38 = vld [vmem:[%s2082_s1 + $0x1c0] sm:$0xff]   ;;  %v1623_v42 = vld [vmem:[%s2082_s1 + $0x1c8] sm:$0xff]   ;;  %v1627_v46 = vld [vmem:[%s2082_s1 + $0x1d0] sm:$0xff]  }
  0x10   :  { %1471 = vmatpush3.bf16.msra.mxu0 %v1593_v14  ;;  %v1620_v39 = vld [vmem:[%s2082_s1 + $0x180] sm:$0xff]   ;;  %v1624_v43 = vld [vmem:[%s2082_s1 + $0x188] sm:$0xff]   ;;  %v1628_v47 = vld [vmem:[%s2082_s1 + $0x190] sm:$0xff]  }
  0x11   :  { %1499 = vmatpush3.bf16.msra.mxu1 %v1594_v15  ;;  %1472 = vmatprep.subr.bf16.mxu0 %v1595_v16  ;;  %v1629_v48 = vld [vmem:[%s2083_s0 + $0x14] ss:$8 sps:$4 sm:$0xff]   ;;  %v1632_v50 = vld [vmem:[%s2083_s0 + $0x10] ss:$8 sps:$4 sm:$0xff]   ;;  %v1638_v55 = vld [vmem:[%s2082_s1 + $0x160] sm:$0xff]  }
  0x12   :  { %1500 = vmatprep.subr.bf16.mxu1 %v1596_v17  ;;  %v1631_v49 = vld [vmem:[%s2082_s1 + $0x158] sm:$0xff]   ;;  %v1640_v57 = vld [vmem:[%s2082_s1 + $0x120] sm:$0xff]   ;;  %v1643_v60 = vld [vmem:[%s2082_s1 + $0x168] sm:$0xff]  }
  0x13   :  { %v1633_v51 = vld [vmem:[%s2082_s1 + $0x118] sm:$0xff]   ;;  %v1641_v58 = vld [vmem:[%s2082_s1 + $0x1e0] sm:$0xff]   ;;  %v1644_v61 = vld [vmem:[%s2082_s1 + $0x128] sm:$0xff]  }
  0x14   :  { %1473 = vmatpush3.bf16.msra.mxu0 %v1597_v18  ;;  %v1634_v52 = vld [vmem:[%s2082_s1 + $0x1d8] sm:$0xff]   ;;  %v1642_v59 = vld [vmem:[%s2082_s1 + $0x1a0] sm:$0xff]   ;;  %v1645_v62 = vld [vmem:[%s2082_s1 + $0x1e8] sm:$0xff]  }
  0x15   :  { %1501 = vmatpush3.bf16.msra.mxu1 %v1598_v19  ;;  %1474 = vmatprep.subr.bf16.mxu0 %v1599_v20  ;;  %v1635_v53 = vld [vmem:[%s2082_s1 + $0x198] sm:$0xff]   ;;  %v1646_v63 = vld [vmem:[%s2082_s1 + $0x1a8] sm:$0xff]   ;;  %v1647_v0 = vld [vmem:[%s2082_s1 + $0x170] sm:$0xff]  }
  0x16   :  { %1502 = vmatprep.subr.bf16.mxu1 %v1600_v21  ;;  %v1636_v54 = vld [vmem:[%s2083_s0 + $0x34] ss:$8 sps:$4 sm:$0xff]   ;;  %v1639_v56 = vld [vmem:[%s2083_s0 + $0x30] ss:$8 sps:$4 sm:$0xff]   ;;  %v1655_v8 = vld [vmem:[%s2083_s0 + $0x40] ss:$8 sps:$4 sm:$0xff]  }
  0x17   :  { %v1648_v1 = vld [vmem:[%s2082_s1 + $0x130] sm:$0xff]   ;;  %v1651_v4 = vld [vmem:[%s2082_s1 + $0x178] sm:$0xff]   ;;  %v1657_v9 = vld [vmem:[%s2083_s0 + $0x44] ss:$8 sps:$4 sm:$0xff]  }
  0x18   :  { %1475 = vmatpush3.bf16.msra.mxu0 %v1601_v22  ;;  %v1649_v2 = vld [vmem:[%s2082_s1 + $0x1f0] sm:$0xff]   ;;  %v1652_v5 = vld [vmem:[%s2082_s1 + $0x138] sm:$0xff]   ;;  %v1658_v10 = vld [vmem:[%s2083_s0 + $0x60] ss:$8 sps:$4 sm:$0xff]  }
  0x19   :  { %1503 = vmatpush3.bf16.msra.mxu1 %v1602_v23  ;;  %1476 = vmatprep.subr.bf16.mxu0 %v1603_v24  ;;  %v1650_v3 = vld [vmem:[%s2082_s1 + $0x1b0] sm:$0xff]   ;;  %v1653_v6 = vld [vmem:[%s2082_s1 + $0x1f8] sm:$0xff]   ;;  %v1660_v11 = vld [vmem:[%s2083_s0 + $0x64] ss:$8 sps:$4 sm:$0xff]  }
  0x1a   :  { %1504 = vmatprep.subr.bf16.mxu1 %v1604_v25  ;;  %v1654_v7 = vld [vmem:[%s2082_s1 + $0x1b8] sm:$0xff]  }
  0x1b   :  { %v1661_v12 = vld [vmem:[%s2083_s0 + $0x54] ss:$8 sps:$4 sm:$0xff]   ;;  %v1663_v14 = vld [vmem:[%s2083_s0 + $0x50] ss:$8 sps:$4 sm:$0xff]  }
  0x1c   :  { %1477 = vmatpush3.bf16.msra.mxu0 %v1605_v26  ;;  %v1664_v13 = vld [vmem:[%s2083_s0 + $0x74] ss:$8 sps:$4 sm:$0xff]   ;;  %v1666_v15 = vld [vmem:[%s2083_s0 + $0x70] ss:$8 sps:$4 sm:$0xff]  }
  0x1d   :  { %1505 = vmatpush3.bf16.msra.mxu1 %v1606_v27  ;;  %1478 = vmatprep.subr.bf16.mxu0 %v1607_v28 }
  0x1e   :  { %1506 = vmatprep.subr.bf16.mxu1 %v1608_v29 }
  0x20   :  { %1479 = vmatpush3.bf16.msra.mxu0 %v1609_v30 }
  0x21   :  { %1507 = vmatpush3.bf16.msra.mxu1 %v1610_v31  ;;  %1520 = vmatprep.subr.bf16.mxu0 %v1617_v36 }
  0x22   :  { %1548 = vmatprep.subr.bf16.mxu1 %v1619_v38 }
  0x23   :  { %203 = vmatmul.mubr.bf16.vlgmr.msra.gmra.mrb[0].mxu0 %v1611_v32 }
  0x24   :  { %447 = vmatmul.mubr.bf16.vlgmr.msra.gmra.mrb[0].mxu1 %v1614_v34  ;;  %1521 = vmatpush3.bf16.msra.mxu0 %v1618_v37 }
  0x25   :  { %1549 = vmatpush3.bf16.msra.mxu1 %v1620_v39  ;;  %1522 = vmatprep.subr.bf16.mxu0 %v1621_v40 }
  0x26   :  { %1550 = vmatprep.subr.bf16.mxu1 %v1623_v42  ;;  %210 = vmatprep.mubr.bf16.mxu0 %v1629_v48 }
  0x27   :  { %454 = vmatprep.mubr.bf16.mxu1 %v1636_v54 }
  0x28   :  { %1523 = vmatpush3.bf16.msra.mxu0 %v1622_v41 }
  0x29   :  { %1551 = vmatpush3.bf16.msra.mxu1 %v1624_v43  ;;  %1524 = vmatprep.subr.bf16.mxu0 %v1625_v44 }
  0x2a   :  { %1552 = vmatprep.subr.bf16.mxu1 %v1627_v46 }
  0x2b   :  { %211 = vmatmul.mubr.bf16.gmra.mrb[4].mxu0 %v1632_v50 }
  0x2c   :  { %1525 = vmatpush3.bf16.msra.mxu0 %v1626_v45  ;;  %455 = vmatmul.mubr.bf16.gmra.mrb[4].mxu1 %v1639_v56 }
  0x2d   :  { %1553 = vmatpush3.bf16.msra.mxu1 %v1628_v47  ;;  %1526 = vmatprep.subr.bf16.mxu0 %v1631_v49 }
  0x2e   :  { %1554 = vmatprep.subr.bf16.mxu1 %v1634_v52  ;;  %690 = vmatprep.mubr.bf16.mxu0 %v1657_v9 }
  0x2f   :  { %934 = vmatprep.mubr.bf16.mxu1 %v1660_v11 }
  0x30   :  { %1527 = vmatpush3.bf16.msra.mxu0 %v1633_v51 }
  0x31   :  { %1555 = vmatpush3.bf16.msra.mxu1 %v1635_v53  ;;  %1528 = vmatprep.subr.bf16.mxu0 %v1638_v55 }
  0x32   :  { %1556 = vmatprep.subr.bf16.mxu1 %v1641_v58 }
  0x34   :  { %1529 = vmatpush3.bf16.msra.mxu0 %v1640_v57 }
  0x35   :  { %1557 = vmatpush3.bf16.msra.mxu1 %v1642_v59  ;;  %1530 = vmatprep.subr.bf16.mxu0 %v1643_v60 }
  0x36   :  { %1558 = vmatprep.subr.bf16.mxu1 %v1645_v62 }
  0x38   :  { %1531 = vmatpush3.bf16.msra.mxu0 %v1644_v61 }
  0x39   :  { %1559 = vmatpush3.bf16.msra.mxu1 %v1646_v63  ;;  %1532 = vmatprep.subr.bf16.mxu0 %v1647_v0 }
  0x3a   :  { %1560 = vmatprep.subr.bf16.mxu1 %v1649_v2 }
  0x3c   :  { %1533 = vmatpush3.bf16.msra.mxu0 %v1648_v1 }
  0x3d   :  { %1561 = vmatpush3.bf16.msra.mxu1 %v1650_v3  ;;  %1534 = vmatprep.subr.bf16.mxu0 %v1651_v4 }
  0x3e   :  { %1562 = vmatprep.subr.bf16.mxu1 %v1653_v6 }
  0x40   :  { %1535 = vmatpush3.bf16.msra.mxu0 %v1652_v5 }
  0x41   :  { %1563 = vmatpush3.bf16.msra.mxu1 %v1654_v7 }
  0x43   :  { %691 = vmatmul.mubr.bf16.vlgmr.msra.gmra.mrb[8].mxu0 %v1655_v8 }
  0x44   :  { %935 = vmatmul.mubr.bf16.vlgmr.msra.gmra.mrb[8].mxu1 %v1658_v10  ;;  %698 = vmatprep.mubr.bf16.mxu0 %v1661_v12 }
  0x45   :  { %942 = vmatprep.mubr.bf16.mxu1 %v1664_v13 }
  0x4b   :  { %699 = vmatmul.mubr.bf16.gmra.mrb[12].mxu0 %v1663_v14 }
  0x4c   :  { %943 = vmatmul.mubr.bf16.gmra.mrb[12].mxu1 %v1666_v15 }
  0xf6   :  { %v1480_v16 = vpop.f32.mrb[0].mxu0 }
  0xf7   :  { %v1508_v17 = vpop.f32.mrb[0].mxu1  ;;  %v1481_v18 = vpop.f32.mrb[1].mxu0 }
  0xf8   :  { %v1482_v19 = vadd.f32 %v1481_v18, %v1480_v16  ;;  %v1509_v20 = vpop.f32.mrb[1].mxu1  ;;  %v1483_v21 = vpop.f32.mrb[2].mxu0 }
  0xf9   :  { %v1510_v22 = vadd.f32 %v1509_v20, %v1508_v17  ;;  %v1511_v23 = vpop.f32.mrb[2].mxu1  ;;  %v1484_v24 = vpop.f32.mrb[3].mxu0 }
  0xfa   :  { %220 = vst.msk [vmem:[#allocation2] sm:$0xff] %vm219_vm0, %v1482_v19  ;;  %v1485_v25 = vadd.f32 %v1484_v24, %v1483_v21  ;;  %v1512_v26 = vpop.f32.mrb[3].mxu1  ;;  %v224_v27 = vsel %vm219_vm0, %v1482_v19, 0.0  ;;  %v240_v35 = vmul.f32 %v1482_v19, %v1482_v19 }
  0xfb   :  { %464 = vst.msk [vmem:[#allocation2 + $0x20] sm:$0xff] %vm219_vm0, %v1510_v22  ;;  %v1513_v28 = vadd.f32 %v1512_v26, %v1511_v23  ;;  %225 = vadd.xlane.f32.xlu0 %v224_v27  ;;  %v468_v31 = vsel %vm219_vm0, %v1510_v22, 0.0  ;;  %v484_v42 = vmul.f32 %v1510_v22, %v1510_v22 }
  0xfc   :  { %221 = vst.msk [vmem:[#allocation2 + $0x8] sm:$0xff] %vm219_vm0, %v1485_v25  ;;  %v241_v30 = vmul.f32 %v1485_v25, %v1485_v25  ;;  %v227_v34 = vsel %vm219_vm0, %v1485_v25, 0.0  ;;  %v244_v41 = vsel %vm219_vm0, %v240_v35, 0.0 }
  0xfd   :  { %465 = vst.msk [vmem:[#allocation2 + $0x28] sm:$0xff] %vm219_vm0, %v1513_v28  ;;  %v471_v29 = vsel %vm219_vm0, %v1513_v28, 0.0  ;;  %v485_v33 = vmul.f32 %v1513_v28, %v1513_v28  ;;  %v488_v47 = vsel %vm219_vm0, %v484_v42, 0.0 }
  0xfe   :  { %472 = vadd.xlane.f32.xlu1 %v471_v29  ;;  %v247_v32 = vsel %vm219_vm0, %v241_v30, 0.0  ;;  %v1486_v36 = vpop.f32.mrb[4].mxu0 }
  0xff   :  { %469 = vadd.xlane.f32.xlu0 %v468_v31  ;;  %v1487_v37 = vpop.f32.mrb[5].mxu0  ;;  %v491_v38 = vsel %vm219_vm0, %v485_v33, 0.0  ;;  %v1514_v46 = vpop.f32.mrb[4].mxu1 }
 0x100   :  { %v1488_v39 = vadd.f32 %v1487_v37, %v1486_v36  ;;  %v1489_v40 = vpop.f32.mrb[6].mxu0  ;;  %v1515_v48 = vpop.f32.mrb[5].mxu1 }
 0x101   :  { %v1490_v43 = vpop.f32.mrb[7].mxu0  ;;  %v1516_v49 = vadd.f32 %v1515_v48, %v1514_v46  ;;  %v1517_v50 = vpop.f32.mrb[6].mxu1  ;;  %v1675_v48 = vmov 0  }
 0x102   :  { %248 = vadd.xlane.f32.xlu1 %v247_v32  ;;  %222 = vst.msk [vmem:[#allocation2 + $0x10] sm:$0xff] %vm219_vm0, %v1488_v39  ;;  %v1491_v44 = vadd.f32 %v1490_v43, %v1489_v40  ;;  %v230_v45 = vsel %vm219_vm0, %v1488_v39, 0.0  ;;  %v1518_v51 = vpop.f32.mrb[7].mxu1  ;;  %v242_v55 = vmul.f32 %v1488_v39, %v1488_v39  ;;  %1577 = vset.pattern.permute.xlu0 %v1675_v48 }
 0x103   :  { %228 = vadd.xlane.f32.xlu0 %v227_v34  ;;  %466 = vst.msk [vmem:[#allocation2 + $0x30] sm:$0xff] %vm219_vm0, %v1516_v49  ;;  %v1519_v53 = vadd.f32 %v1518_v51, %v1517_v50  ;;  %v474_v54 = vsel %vm219_vm0, %v1516_v49, 0.0  ;;  %v486_v59 = vmul.f32 %v1516_v49, %v1516_v49  ;;  %1578 = vset.pattern.permute.xlu1 %v1675_v48 }
 0x104   :  { %223 = vst.msk [vmem:[#allocation2 + $0x18] sm:$0xff] %vm219_vm0, %v1491_v44  ;;  %v233_v52 = vsel %vm219_vm0, %v1491_v44, 0.0  ;;  %v243_v57 = vmul.f32 %v1491_v44, %v1491_v44  ;;  %v250_v58 = vsel %vm219_vm0, %v242_v55, 0.0 }
 0x105   :  { %467 = vst.msk [vmem:[#allocation2 + $0x38] sm:$0xff] %vm219_vm0, %v1519_v53  ;;  %v477_v56 = vsel %vm219_vm0, %v1519_v53, 0.0  ;;  %v487_v61 = vmul.f32 %v1519_v53, %v1519_v53  ;;  %v494_v62 = vsel %vm219_vm0, %v486_v59, 0.0 }
 0x106   :  { %492 = vadd.xlane.f32.xlu1 %v491_v38  ;;  %v253_v60 = vsel %vm219_vm0, %v243_v57, 0.0 }
 0x107   :  { %245 = vadd.xlane.f32.xlu0 %v244_v41  ;;  %v497_v63 = vsel %vm219_vm0, %v487_v61, 0.0 }
 0x10a   :  { %231 = vadd.xlane.f32.xlu1 %v230_v45 }
 0x10b   :  { %489 = vadd.xlane.f32.xlu0 %v488_v47 }
 0x10e   :  { %234 = vadd.xlane.f32.xlu1 %v233_v52 }
 0x10f   :  { %475 = vadd.xlane.f32.xlu0 %v474_v54 }
 0x112   :  { %478 = vadd.xlane.f32.xlu1 %v477_v56 }
 0x113   :  { %251 = vadd.xlane.f32.xlu0 %v250_v58 }
 0x116   :  { %254 = vadd.xlane.f32.xlu1 %v253_v60  ;;  %v1536_v0 = vpop.f32.mrb[8].mxu0 }
 0x117   :  { %495 = vadd.xlane.f32.xlu0 %v494_v62  ;;  %v1537_v1 = vpop.f32.mrb[9].mxu0  ;;  %v1564_v2 = vpop.f32.mrb[8].mxu1 }
 0x118   :  { %v1538_v3 = vadd.f32 %v1537_v1, %v1536_v0  ;;  %v1539_v4 = vpop.f32.mrb[10].mxu0  ;;  %v1565_v5 = vpop.f32.mrb[9].mxu1 }
 0x119   :  { %v1566_v6 = vadd.f32 %v1565_v5, %v1564_v2  ;;  %v1540_v7 = vpop.f32.mrb[11].mxu0  ;;  %v1567_v8 = vpop.f32.mrb[10].mxu1 }
 0x11a   :  { %498 = vadd.xlane.f32.xlu1 %v497_v63  ;;  %708 = vst.msk [vmem:[#allocation2 + $0x40] sm:$0xff] %vm219_vm0, %v1538_v3  ;;  %v1541_v9 = vadd.f32 %v1540_v7, %v1539_v4  ;;  %v1568_v10 = vpop.f32.mrb[11].mxu1  ;;  %v712_v11 = vsel %vm219_vm0, %v1538_v3, 0.0  ;;  %v728_v16 = vmul.f32 %v1538_v3, %v1538_v3 }
 0x11b   :  { %952 = vst.msk [vmem:[#allocation2 + $0x60] sm:$0xff] %vm219_vm0, %v1566_v6  ;;  %v1569_v12 = vadd.f32 %v1568_v10, %v1567_v8  ;;  %713 = vadd.xlane.f32.xlu0 %v712_v11  ;;  %v956_v14 = vsel %vm219_vm0, %v1566_v6, 0.0  ;;  %v972_v29 = vmul.f32 %v1566_v6, %v1566_v6 }
 0x11c   :  { %709 = vst.msk [vmem:[#allocation2 + $0x48] sm:$0xff] %vm219_vm0, %v1541_v9  ;;  %v715_v13 = vsel %vm219_vm0, %v1541_v9, 0.0  ;;  %v729_v22 = vmul.f32 %v1541_v9, %v1541_v9  ;;  %v732_v27 = vsel %vm219_vm0, %v728_v16, 0.0 }
 0x11d   :  { %953 = vst.msk [vmem:[#allocation2 + $0x68] sm:$0xff] %vm219_vm0, %v1569_v12  ;;  %v959_v19 = vsel %vm219_vm0, %v1569_v12, 0.0  ;;  %v973_v34 = vmul.f32 %v1569_v12, %v1569_v12  ;;  %v976_v37 = vsel %vm219_vm0, %v972_v29, 0.0 }
 0x11e   :  { %716 = vadd.xlane.f32.xlu1 %v715_v13  ;;  %v1542_v15 = vpop.f32.mrb[12].mxu0  ;;  %v735_v33 = vsel %vm219_vm0, %v729_v22, 0.0 }
 0x11f   :  { %957 = vadd.xlane.f32.xlu0 %v956_v14  ;;  %v1543_v17 = vpop.f32.mrb[13].mxu0  ;;  %v1570_v18 = vpop.f32.mrb[12].mxu1  ;;  %v979_v39 = vsel %vm219_vm0, %v973_v34, 0.0 }
 0x120   :  { %v1544_v20 = vadd.f32 %v1543_v17, %v1542_v15  ;;  %v1545_v21 = vpop.f32.mrb[14].mxu0  ;;  %v1571_v23 = vpop.f32.mrb[13].mxu1 }
 0x121   :  { %v1546_v24 = vpop.f32.mrb[15].mxu0  ;;  %v1572_v25 = vadd.f32 %v1571_v23, %v1570_v18  ;;  %v1573_v26 = vpop.f32.mrb[14].mxu1 }
 0x122   :  { %960 = vadd.xlane.f32.xlu1 %v959_v19  ;;  %710 = vst.msk [vmem:[#allocation2 + $0x50] sm:$0xff] %vm219_vm0, %v1544_v20  ;;  %v1547_v28 = vadd.f32 %v1546_v24, %v1545_v21  ;;  %v1574_v30 = vpop.f32.mrb[15].mxu1  ;;  %v718_v40 = vsel %vm219_vm0, %v1544_v20, 0.0  ;;  %v730_v43 = vmul.f32 %v1544_v20, %v1544_v20 }
 0x123   :  { %733 = vadd.xlane.f32.xlu0 %v732_v27  ;;  %954 = vst.msk [vmem:[#allocation2 + $0x70] sm:$0xff] %vm219_vm0, %v1572_v25  ;;  %v1575_v31 = vadd.f32 %v1574_v30, %v1573_v26  ;;  %v974_v32 = vmul.f32 %v1572_v25, %v1572_v25  ;;  %v962_v42 = vsel %vm219_vm0, %v1572_v25, 0.0 }
 0x124   :  { %711 = vst.msk [vmem:[#allocation2 + $0x58] sm:$0xff] %vm219_vm0, %v1547_v28  ;;  %v721_v41 = vsel %vm219_vm0, %v1547_v28, 0.0  ;;  %v731_v45 = vmul.f32 %v1547_v28, %v1547_v28  ;;  %v738_v46 = vsel %vm219_vm0, %v730_v43, 0.0 }
 0x125   :  { %955 = vst.msk [vmem:[#allocation2 + $0x78] sm:$0xff] %vm219_vm0, %v1575_v31  ;;  %v982_v35 = vsel %vm219_vm0, %v974_v32, 0.0  ;;  %v975_v36 = vmul.f32 %v1575_v31, %v1575_v31  ;;  %v965_v44 = vsel %vm219_vm0, %v1575_v31, 0.0 }
 0x126   :  { %736 = vadd.xlane.f32.xlu1 %v735_v33  ;;  %v741_v47 = vsel %vm219_vm0, %v731_v45, 0.0 }
 0x127   :  { %977 = vadd.xlane.f32.xlu0 %v976_v37  ;;  %v985_v38 = vsel %vm219_vm0, %v975_v36, 0.0 }
 0x12a   :  { %980 = vadd.xlane.f32.xlu1 %v979_v39 }
 0x12b   :  { %719 = vadd.xlane.f32.xlu0 %v718_v40 }
 0x12e   :  { %722 = vadd.xlane.f32.xlu1 %v721_v41 }
 0x12f   :  { %963 = vadd.xlane.f32.xlu0 %v962_v42 }
 0x132   :  { %966 = vadd.xlane.f32.xlu1 %v965_v44 }
 0x133   :  { %739 = vadd.xlane.f32.xlu0 %v738_v46 }
 0x136   :  { %742 = vadd.xlane.f32.xlu1 %v741_v47 }
 0x137   :  { %983 = vadd.xlane.f32.xlu0 %v982_v35 }
 0x13a   :  { %986 = vadd.xlane.f32.xlu1 %v985_v38 }
 0x188   :  { %v226_v49 = vpop.xlane.xlu0 %225 }
 0x18b   :  { %v473_v50 = vpop.xlane.xlu1 %472 }
 0x18c   :  { %v470_v51 = vpop.xlane.xlu0 %469 }
 0x18d   :  { %v480_v3 = vadd.f32 %v470_v51, %v226_v49 }
 0x18f   :  { %v249_v52 = vpop.xlane.xlu1 %248 }
 0x190   :  { %v229_v53 = vpop.xlane.xlu0 %228 }
 0x191   :  { %v481_v5 = vadd.f32 %v473_v50, %v229_v53 }
 0x193   :  { %v493_v54 = vpop.xlane.xlu1 %492 }
 0x194   :  { %v246_v55 = vpop.xlane.xlu0 %245  ;;  %v501_v14 = vadd.f32 %v493_v54, %v249_v52 }
 0x197   :  { %v232_v56 = vpop.xlane.xlu1 %231 }
 0x198   :  { %v490_v57 = vpop.xlane.xlu0 %489 }
 0x199   :  { %v500_v11 = vadd.f32 %v490_v57, %v246_v55  ;;  %v1012_v57 = vld [vmem:[%s2084_s2] sm:$0xff] }
 0x19b   :  { %v235_v58 = vpop.xlane.xlu1 %234 }
 0x19c   :  { %v476_v59 = vpop.xlane.xlu0 %475 }
 0x19d   :  { %v482_v30 = vadd.f32 %v476_v59, %v232_v56 }
 0x19f   :  { %v479_v60 = vpop.xlane.xlu1 %478 }
 0x1a0   :  { %v252_v61 = vpop.xlane.xlu0 %251  ;;  %v483_v34 = vadd.f32 %v479_v60, %v235_v58 }
 0x1a3   :  { %v255_v62 = vpop.xlane.xlu1 %254 }
 0x1a4   :  { %v496_v63 = vpop.xlane.xlu0 %495 }
 0x1a5   :  { %v502_v43 = vadd.f32 %v496_v63, %v252_v61 }
 0x1a7   :  { %v499_v0 = vpop.xlane.xlu1 %498 }
 0x1a8   :  { %v714_v1 = vpop.xlane.xlu0 %713  ;;  %v503_v46 = vadd.f32 %v499_v0, %v255_v62  ;;  %v1013_v62 = vld [vmem:[%s2084_s2 + $0x8] sm:$0xff] }
 0x1a9   :  { %v724_v6 = vadd.f32 %v714_v1, %v480_v3 }
 0x1ab   :  { %v717_v2 = vpop.xlane.xlu1 %716 }
 0x1ac   :  { %v958_v4 = vpop.xlane.xlu0 %957  ;;  %v725_v8 = vadd.f32 %v717_v2, %v481_v5 }
 0x1ad   :  { %v968_v9 = vadd.f32 %v958_v4, %v724_v6 }
 0x1af   :  { %v961_v7 = vpop.xlane.xlu1 %960  ;;  %v992_v15 = vmul.f32 0.0078125, %v968_v9 }
 0x1b0   :  { %v734_v10 = vpop.xlane.xlu0 %733  ;;  %v969_v12 = vadd.f32 %v961_v7, %v725_v8  ;;  %v1028_v7 = vld [vmem:[%s2085_s3] sm:$0xff] }
 0x1b1   :  { %v744_v16 = vadd.f32 %v734_v10, %v500_v11  ;;  %v1000_v22 = vmul.f32 %v992_v15, %v992_v15  ;;  %v1029_v11 = vld [vmem:[%s2085_s3 + $0x8] sm:$0xff] }
 0x1b2   :  { %v1989_v18 = vmul.f32 0.0078125, %v969_v12 }
 0x1b3   :  { %v737_v13 = vpop.xlane.xlu1 %736 }
 0x1b4   :  { %v978_v17 = vpop.xlane.xlu0 %977  ;;  %v745_v19 = vadd.f32 %v737_v13, %v501_v14  ;;  %v1001_v26 = vmul.f32 %v1989_v18, %v1989_v18  ;;  %v1014_v13 = vld [vmem:[%s2084_s2 + $0x10] sm:$0xff] }
 0x1b5   :  { %v988_v20 = vadd.f32 %v978_v17, %v744_v16  ;;  %v1015_v17 = vld [vmem:[%s2084_s2 + $0x18] sm:$0xff] }
 0x1b7   :  { %v981_v21 = vpop.xlane.xlu1 %980  ;;  %v996_v23 = vmul.f32 0.0078125, %v988_v20  ;;  %v1030_v20 = vld [vmem:[%s2085_s3 + $0x10] sm:$0xff] }
 0x1b8   :  { %v989_v24 = vadd.f32 %v981_v21, %v745_v19  ;;  %v720_v25 = vpop.xlane.xlu0 %719 }
 0x1b9   :  { %v1004_v27 = vsub.f32 %v996_v23, %v1000_v22  ;;  %v726_v37 = vadd.f32 %v720_v25, %v482_v30  ;;  %v1031_v23 = vld [vmem:[%s2085_s3 + $0x18] sm:$0xff]  ;;  %v1191_v30 = vld [vmem:[#allocation2 + $0x60] sm:$0xff] }
 0x1ba   :  { %v997_v28 = vmul.f32 0.0078125, %v989_v24 }
 0x1bb   :  { %v723_v29 = vpop.xlane.xlu1 %722  ;;  %v1008_v31 = vmax.f32 %v1004_v27, 0.0  ;;  %v1040_v27 = vld [vmem:[#allocation2] sm:$0xff] }
 0x1bc   :  { %v1005_v32 = vsub.f32 %v997_v28, %v1001_v26  ;;  %v964_v33 = vpop.xlane.xlu0 %963  ;;  %v727_v40 = vadd.f32 %v723_v29, %v483_v34  ;;  %v1117_v28 = vld [vmem:[#allocation2 + $0x20] sm:$0xff] }
 0x1bd   :  { %v1016_v35 = vadd.f32 1e-05, %v1008_v31  ;;  %v970_v41 = vadd.f32 %v964_v33, %v726_v37  ;;  %v1154_v29 = vld [vmem:[#allocation2 + $0x40] sm:$0xff] }
 0x1be   :  { %v1009_v36 = vmax.f32 %v1005_v32, 0.0 }
 0x1bf   :  { %v967_v38 = vpop.xlane.xlu1 %966  ;;  %1667 = vrsqrt.f32 %v1016_v35  ;;  %v994_v47 = vmul.f32 0.0078125, %v970_v41  ;;  %v1118_v41 = vld [vmem:[#allocation2 + $0x28] sm:$0xff] }
 0x1c0   :  { %v1017_v39 = vadd.f32 1e-05, %v1009_v36  ;;  %v740_v42 = vpop.xlane.xlu0 %739  ;;  %v971_v44 = vadd.f32 %v967_v38, %v727_v40  ;;  %v1041_v40 = vld [vmem:[#allocation2 + $0x8] sm:$0xff] }
 0x1c1   :  { %v746_v48 = vadd.f32 %v740_v42, %v502_v43  ;;  %v1002_v54 = vmul.f32 %v994_v47, %v994_v47  ;;  %v1155_v42 = vld [vmem:[#allocation2 + $0x48] sm:$0xff] }
 0x1c2   :  { %1669 = vrsqrt.f32 %v1017_v39  ;;  %v995_v50 = vmul.f32 0.0078125, %v971_v44  ;;  %v1192_v43 = vld [vmem:[#allocation2 + $0x68] sm:$0xff] }
 0x1c3   :  { %v743_v45 = vpop.xlane.xlu1 %742 }
 0x1c4   :  { %v984_v49 = vpop.xlane.xlu0 %983  ;;  %v747_v51 = vadd.f32 %v743_v45, %v503_v46  ;;  %v1003_v59 = vmul.f32 %v995_v50, %v995_v50 }
 0x1c5   :  { %v990_v52 = vadd.f32 %v984_v49, %v746_v48 }
 0x1c7   :  { %v987_v53 = vpop.xlane.xlu1 %986  ;;  %v998_v55 = vmul.f32 0.0078125, %v990_v52 }
 0x1c8   :  { %v991_v56 = vadd.f32 %v987_v53, %v747_v51 }
 0x1c9   :  { %v1668_v58 = vpop.eup %1667  ;;  %v1006_v60 = vsub.f32 %v998_v55, %v1002_v54 }
 0x1ca   :  { %v999_v61 = vmul.f32 0.0078125, %v991_v56  ;;  %v1024_v63 = vmul.f32 %v1668_v58, %v1012_v57 }
 0x1cb   :  { %v1010_v1 = vmax.f32 %v1006_v60, 0.0 }
 0x1cc   :  { %v1670_v0 = vpop.eup %1669  ;;  %v1007_v2 = vsub.f32 %v999_v61, %v1003_v59  ;;  %1046 = vperm.xlu0 %1577, %v1024_v63   ;;  %v1032_v4 = vmul.f32 %v1024_v63, %v992_v15 }
 0x1cd   :  { %v1025_v3 = vmul.f32 %v1670_v0, %v1013_v62  ;;  %v1018_v5 = vadd.f32 1e-05, %v1010_v1 }
 0x1ce   :  { %v1011_v6 = vmax.f32 %v1007_v2, 0.0  ;;  %v1036_v9 = vsub.f32 %v1028_v7, %v1032_v4  ;;  %v1042_v7 = vld [vmem:[#allocation2 + $0x10] sm:$0xff] }
 0x1cf   :  { %1051 = vperm.xlu1 %1578, %v1025_v3   ;;  %1671 = vrsqrt.f32 %v1018_v5  ;;  %v1033_v10 = vmul.f32 %v1025_v3, %v1989_v18 }
 0x1d0   :  { %v1019_v8 = vadd.f32 1e-05, %v1011_v6 }
 0x1d1   :  { %v1037_v12 = vsub.f32 %v1029_v11, %v1033_v10  ;;  %v1193_v10 = vld [vmem:[#allocation2 + $0x70] sm:$0xff] }
 0x1d2   :  { %1673 = vrsqrt.f32 %v1019_v8  ;;  %v1119_v8 = vld [vmem:[#allocation2 + $0x30] sm:$0xff] }
 0x1d3   :  { %1070 = vperm.xlu1 %1578, %v1036_v9   ;;  %v1156_v9 = vld [vmem:[#allocation2 + $0x50] sm:$0xff] }
 0x1d7   :  { %1075 = vperm.xlu1 %1578, %v1037_v12  }
 0x1d9   :  { %v1672_v14 = vpop.eup %1671 }
 0x1da   :  { %v1026_v15 = vmul.f32 %v1672_v14, %v1014_v13 }
 0x1dc   :  { %v1674_v16 = vpop.eup %1673  ;;  %1056 = vperm.xlu1 %1578, %v1026_v15   ;;  %v1034_v19 = vmul.f32 %v1026_v15, %v994_v47 }
 0x1dd   :  { %v1027_v18 = vmul.f32 %v1674_v16, %v1015_v17 }
 0x1de   :  { %v1038_v21 = vsub.f32 %v1030_v20, %v1034_v19  ;;  %v1043_v20 = vld [vmem:[#allocation2 + $0x18] sm:$0xff] }
 0x1df   :  { %v1035_v22 = vmul.f32 %v1027_v18, %v995_v50 }
 0x1e0   :  { %1061 = vperm.xlu1 %1578, %v1027_v18  }
 0x1e1   :  { %v1039_v24 = vsub.f32 %v1031_v23, %v1035_v22 }
 0x1e4   :  { %1080 = vperm.xlu1 %1578, %v1038_v21   ;;  %v1120_v21 = vld [vmem:[#allocation2 + $0x38] sm:$0xff] }
 0x1e8   :  { %1085 = vperm.xlu1 %1578, %v1039_v24  }
 0x24b   :  { %v1047_v25 = vpop.permute.xlu0 %1046 }
 0x24c   :  { %v1064_v31 = vmul.f32 %v1047_v25, %v1040_v27  ;;  %v1121_v32 = vmul.f32 %v1117_v28, %v1047_v25  ;;  %v1158_v33 = vmul.f32 %v1154_v29, %v1047_v25  ;;  %v1195_v34 = vmul.f32 %v1191_v30, %v1047_v25  ;;  %v1194_v27 = vld [vmem:[#allocation2 + $0x78] sm:$0xff] }
 0x24e   :  { %v1052_v26 = vpop.permute.xlu1 %1051 }
 0x24f   :  { %v1065_v48 = vmul.f32 %v1052_v26, %v1041_v40  ;;  %v1122_v49 = vmul.f32 %v1118_v41, %v1052_v26  ;;  %v1159_v50 = vmul.f32 %v1155_v42, %v1052_v26  ;;  %v1196_v51 = vmul.f32 %v1192_v43, %v1052_v26  ;;  %v1157_v26 = vld [vmem:[#allocation2 + $0x58] sm:$0xff] }
 0x252   :  { %v1071_v35 = vpop.permute.xlu1 %1070 }
 0x253   :  { %v1088_v36 = vadd.f32 %v1071_v35, %v1064_v31  ;;  %v1125_v37 = vadd.f32 %v1121_v32, %v1071_v35  ;;  %v1162_v38 = vadd.f32 %v1158_v33, %v1071_v35  ;;  %v1199_v39 = vadd.f32 %v1195_v34, %v1071_v35 }
 0x255   :  { %v1092_v44 = vmax.f32 %v1088_v36, 0.0  ;;  %v1129_v45 = vmax.f32 %v1125_v37, 0.0  ;;  %v1166_v46 = vmax.f32 %v1162_v38, 0.0  ;;  %v1203_v47 = vmax.f32 %v1199_v39, 0.0 }
 0x256   :  { %v1076_v52 = vpop.permute.xlu1 %1075 }
 0x257   :  { %v1448_v53 = vpack.c.bf16 %v1092_v44, %v1092_v44  ;;  %v1452_v54 = vpack.c.bf16 %v1129_v45, %v1129_v45  ;;  %v1456_v55 = vpack.c.bf16 %v1166_v46, %v1166_v46  ;;  %v1460_v56 = vpack.c.bf16 %v1203_v47, %v1203_v47 }
 0x258   :  { %v1089_v57 = vadd.f32 %v1076_v52, %v1065_v48  ;;  %v1126_v58 = vadd.f32 %v1122_v49, %v1076_v52  ;;  %v1163_v59 = vadd.f32 %v1159_v50, %v1076_v52  ;;  %v1200_v60 = vadd.f32 %v1196_v51, %v1076_v52 }
 0x259   :  { %1113 = vst.msk [vmem:[%s2086_s4] sm:$0xf] %vm1112_vm1, %v1448_v53  ;;  %1428 = vst.msk [vmem:[%s2086_s4 + $0x10] sm:$0xf] %vm1112_vm1, %v1452_v54 }
 0x25a   :  { %1436 = vst.msk [vmem:[%s2086_s4 + $0x20] sm:$0xf] %vm1112_vm1, %v1456_v55  ;;  %1444 = vst.msk [vmem:[%s2086_s4 + $0x30] sm:$0xf] %vm1112_vm1, %v1460_v56  ;;  %v1093_v61 = vmax.f32 %v1089_v57, 0.0  ;;  %v1130_v62 = vmax.f32 %v1126_v58, 0.0 }
 0x25b   :  { %v1167_v63 = vmax.f32 %v1163_v59, 0.0  ;;  %v1204_v0 = vmax.f32 %v1200_v60, 0.0  ;;  %v1057_v5 = vpop.permute.xlu1 %1056 }
 0x25c   :  { %v1449_v1 = vpack.c.bf16 %v1093_v61, %v1093_v61  ;;  %v1453_v2 = vpack.c.bf16 %v1130_v62, %v1130_v62  ;;  %v1066_v11 = vmul.f32 %v1057_v5, %v1042_v7  ;;  %v1123_v12 = vmul.f32 %v1119_v8, %v1057_v5 }
 0x25d   :  { %v1457_v3 = vpack.c.bf16 %v1167_v63, %v1167_v63  ;;  %v1461_v4 = vpack.c.bf16 %v1204_v0, %v1204_v0  ;;  %v1160_v13 = vmul.f32 %v1156_v9, %v1057_v5  ;;  %v1197_v14 = vmul.f32 %v1193_v10, %v1057_v5 }
 0x25e   :  { %1114 = vst.msk [vmem:[%s2086_s4 + $0x4] sm:$0xf] %vm1112_vm1, %v1449_v1  ;;  %1429 = vst.msk [vmem:[%s2086_s4 + $0x14] sm:$0xf] %vm1112_vm1, %v1453_v2 }
 0x25f   :  { %1437 = vst.msk [vmem:[%s2086_s4 + $0x24] sm:$0xf] %vm1112_vm1, %v1457_v3  ;;  %1445 = vst.msk [vmem:[%s2086_s4 + $0x34] sm:$0xf] %vm1112_vm1, %v1461_v4  ;;  %v1062_v6 = vpop.permute.xlu1 %1061 }
 0x260   :  { %v1067_v28 = vmul.f32 %v1062_v6, %v1043_v20  ;;  %v1124_v29 = vmul.f32 %v1120_v21, %v1062_v6  ;;  %v1161_v30 = vmul.f32 %v1157_v26, %v1062_v6  ;;  %v1198_v31 = vmul.f32 %v1194_v27, %v1062_v6 }
 0x263   :  { %v1081_v15 = vpop.permute.xlu1 %1080 }
 0x264   :  { %v1090_v16 = vadd.f32 %v1081_v15, %v1066_v11  ;;  %v1127_v17 = vadd.f32 %v1123_v12, %v1081_v15  ;;  %v1164_v18 = vadd.f32 %v1160_v13, %v1081_v15  ;;  %v1201_v19 = vadd.f32 %v1197_v14, %v1081_v15 }
 0x266   :  { %v1094_v22 = vmax.f32 %v1090_v16, 0.0  ;;  %v1131_v23 = vmax.f32 %v1127_v17, 0.0  ;;  %v1168_v24 = vmax.f32 %v1164_v18, 0.0  ;;  %v1205_v25 = vmax.f32 %v1201_v19, 0.0 }
 0x267   :  { %v1086_v32 = vpop.permute.xlu1 %1085 }
 0x268   :  { %v1450_v33 = vpack.c.bf16 %v1094_v22, %v1094_v22  ;;  %v1454_v34 = vpack.c.bf16 %v1131_v23, %v1131_v23  ;;  %v1458_v35 = vpack.c.bf16 %v1168_v24, %v1168_v24  ;;  %v1462_v36 = vpack.c.bf16 %v1205_v25, %v1205_v25 }
 0x269   :  { %v1091_v37 = vadd.f32 %v1086_v32, %v1067_v28  ;;  %v1128_v38 = vadd.f32 %v1124_v29, %v1086_v32  ;;  %v1165_v39 = vadd.f32 %v1161_v30, %v1086_v32  ;;  %v1202_v40 = vadd.f32 %v1198_v31, %v1086_v32 }
 0x26a   :  { %1115 = vst.msk [vmem:[%s2086_s4 + $0x8] sm:$0xf] %vm1112_vm1, %v1450_v33  ;;  %1430 = vst.msk [vmem:[%s2086_s4 + $0x18] sm:$0xf] %vm1112_vm1, %v1454_v34 }
 0x26b   :  { %1438 = vst.msk [vmem:[%s2086_s4 + $0x28] sm:$0xf] %vm1112_vm1, %v1458_v35  ;;  %1446 = vst.msk [vmem:[%s2086_s4 + $0x38] sm:$0xf] %vm1112_vm1, %v1462_v36  ;;  %v1095_v41 = vmax.f32 %v1091_v37, 0.0  ;;  %v1132_v42 = vmax.f32 %v1128_v38, 0.0 }
 0x26c   :  { %v1169_v43 = vmax.f32 %v1165_v39, 0.0  ;;  %v1206_v44 = vmax.f32 %v1202_v40, 0.0 }
 0x26d   :  { %v1451_v45 = vpack.c.bf16 %v1095_v41, %v1095_v41  ;;  %v1455_v46 = vpack.c.bf16 %v1132_v42, %v1132_v42 }
 0x26e   :  { %v1459_v47 = vpack.c.bf16 %v1169_v43, %v1169_v43  ;;  %v1463_v48 = vpack.c.bf16 %v1206_v44, %v1206_v44 }
 0x26f   :  { %1116 = vst.msk [vmem:[%s2086_s4 + $0xc] sm:$0xf] %vm1112_vm1, %v1451_v45  ;;  %1431 = vst.msk [vmem:[%s2086_s4 + $0x1c] sm:$0xf] %vm1112_vm1, %v1455_v46 }
 0x270   :  { %1439 = vst.msk [vmem:[%s2086_s4 + $0x2c] sm:$0xf] %vm1112_vm1, %v1459_v47  ;;  %1447 = vst.msk [vmem:[%s2086_s4 + $0x3c] sm:$0xf] %vm1112_vm1, %v1463_v48 }

// kernel: generator_forward.7
= control target key start
LH: loop header
LB: loop body
LE: loop exit
PB: predicated region body
PF: predicated region fallthrough
CT: control target
= control target key end

     0   :  { %v962_v0 = vmov 0.0   ;;  %vm963_vm0 = vmmov 0   ;;  %v964_v61 = vmov 0   ;;  %s1210_s1 = inlined_call_operand.vmem [shape: bf16[4,128,128], index: 1, kind: input, shape index: {}]   ;;  %s1211_s0 = inlined_call_operand.vmem [shape: bf16[4,16,128], index: 0, kind: input, shape index: {}]   ;;  %s1212_s2 = inlined_call_operand.vmem [shape: f32[16,1], index: 2, kind: input, shape index: {}]   ;;  %s1213_s3 = inlined_call_operand.vmem [shape: f32[16,1], index: 3, kind: input, shape index: {}]   ;;  %s1214_s4 = inlined_call_operand.vmem [shape: bf16[4,16,128], index: 4, kind: output, shape index: {}]  }
   0x1   :  { %837 = vmatprep.subr.bf16.mxu0 %v962_v0  ;;  %857 = vmatprep.subr.bf16.mxu1 %v962_v0  ;;  %v922_v1 = vld [vmem:[%s1210_s1] sm:$0xff]   ;;  %v924_v3 = vld [vmem:[%s1210_s1 + $0x8] sm:$0xff]   ;;  %v926_v5 = vld [vmem:[%s1210_s1 + $0x10] sm:$0xff]  }
   0x2   :  { %v923_v2 = vld [vmem:[%s1210_s1 + $0x40] sm:$0xff]   ;;  %853 = vmatprep.mubr.msk.bf16.mxu0 %vm963_vm0, %v962_v0  ;;  %873 = vmatprep.mubr.msk.bf16.mxu1 %vm963_vm0, %v962_v0  ;;  %v925_v4 = vld [vmem:[%s1210_s1 + $0x48] sm:$0xff]   ;;  %v927_v6 = vld [vmem:[%s1210_s1 + $0x50] sm:$0xff]  }
   0x3   :  { %838 = vmatpush3.bf16.msra.mxu0 %v922_v1  ;;  %858 = vmatpush3.bf16.msra.mxu1 %v923_v2  ;;  %v928_v7 = vld [vmem:[%s1210_s1 + $0x18] sm:$0xff]   ;;  %v930_v9 = vld [vmem:[%s1210_s1 + $0x20] sm:$0xff]   ;;  %v932_v11 = vld [vmem:[%s1210_s1 + $0x28] sm:$0xff]  }
   0x4   :  { %839 = vmatprep.subr.bf16.mxu0 %v962_v0  ;;  %859 = vmatprep.subr.bf16.mxu1 %v962_v0  ;;  %v929_v8 = vld [vmem:[%s1210_s1 + $0x58] sm:$0xff]   ;;  %v931_v10 = vld [vmem:[%s1210_s1 + $0x60] sm:$0xff]   ;;  %v933_v12 = vld [vmem:[%s1210_s1 + $0x68] sm:$0xff]  }
   0x5   :  { %v934_v13 = vld [vmem:[%s1210_s1 + $0x30] sm:$0xff]   ;;  %v936_v15 = vld [vmem:[%s1210_s1 + $0x38] sm:$0xff]   ;;  %v938_v17 = vld [vmem:[%s1211_s0] sm:$0xff]   ;;  %920 = vset.pattern.permute.xlu0 %v964_v61  ;;  %921 = vset.pattern.permute.xlu1 %v964_v61 }
   0x6   :  { %v935_v14 = vld [vmem:[%s1210_s1 + $0x70] sm:$0xff]   ;;  %v937_v16 = vld [vmem:[%s1210_s1 + $0x78] sm:$0xff]   ;;  %v939_v18 = vld [vmem:[%s1211_s0 + $0x8] sm:$0xff]  }
   0x7   :  { %840 = vmatpush3.bf16.msra.mxu0 %v924_v3  ;;  %860 = vmatpush3.bf16.msra.mxu1 %v925_v4  ;;  %v940_v19 = vld [vmem:[%s1210_s1 + $0x80] sm:$0xff]   ;;  %v942_v21 = vld [vmem:[%s1210_s1 + $0x88] sm:$0xff]   ;;  %v944_v23 = vld [vmem:[%s1210_s1 + $0x90] sm:$0xff]  }
   0x8   :  { %841 = vmatprep.subr.bf16.mxu0 %v962_v0  ;;  %861 = vmatprep.subr.bf16.mxu1 %v962_v0  ;;  %v941_v20 = vld [vmem:[%s1210_s1 + $0xc0] sm:$0xff]   ;;  %v943_v22 = vld [vmem:[%s1210_s1 + $0xc8] sm:$0xff]   ;;  %v945_v24 = vld [vmem:[%s1210_s1 + $0xd0] sm:$0xff]  }
   0x9   :  { %v946_v25 = vld [vmem:[%s1210_s1 + $0x98] sm:$0xff]   ;;  %v948_v27 = vld [vmem:[%s1210_s1 + $0xa0] sm:$0xff]   ;;  %v950_v29 = vld [vmem:[%s1210_s1 + $0xa8] sm:$0xff]  }
   0xa   :  { %v947_v26 = vld [vmem:[%s1210_s1 + $0xd8] sm:$0xff]   ;;  %v949_v28 = vld [vmem:[%s1210_s1 + $0xe0] sm:$0xff]   ;;  %v951_v30 = vld [vmem:[%s1210_s1 + $0xe8] sm:$0xff]  }
   0xb   :  { %842 = vmatpush3.bf16.msra.mxu0 %v926_v5  ;;  %862 = vmatpush3.bf16.msra.mxu1 %v927_v6  ;;  %v952_v31 = vld [vmem:[%s1210_s1 + $0xb0] sm:$0xff]   ;;  %v954_v33 = vld [vmem:[%s1210_s1 + $0xb8] sm:$0xff]  }
   0xc   :  { %843 = vmatprep.subr.bf16.mxu0 %v962_v0  ;;  %863 = vmatprep.subr.bf16.mxu1 %v962_v0  ;;  %v953_v32 = vld [vmem:[%s1210_s1 + $0xf0] sm:$0xff]   ;;  %v955_v34 = vld [vmem:[%s1210_s1 + $0xf8] sm:$0xff]  }
   0xd   :  { %v956_v35 = vld [vmem:[%s1211_s0 + $0x10] sm:$0xff]   ;;  %v957_v36 = vld [vmem:[%s1211_s0 + $0x18] sm:$0xff]  }
   0xf   :  { %844 = vmatpush3.bf16.msra.mxu0 %v928_v7  ;;  %864 = vmatpush3.bf16.msra.mxu1 %v929_v8 }
  0x10   :  { %845 = vmatprep.subr.bf16.mxu0 %v962_v0  ;;  %865 = vmatprep.subr.bf16.mxu1 %v962_v0 }
  0x13   :  { %846 = vmatpush3.bf16.msra.mxu0 %v930_v9  ;;  %866 = vmatpush3.bf16.msra.mxu1 %v931_v10 }
  0x14   :  { %847 = vmatprep.subr.bf16.mxu0 %v962_v0  ;;  %867 = vmatprep.subr.bf16.mxu1 %v962_v0 }
  0x17   :  { %848 = vmatpush3.bf16.msra.mxu0 %v932_v11  ;;  %868 = vmatpush3.bf16.msra.mxu1 %v933_v12 }
  0x18   :  { %849 = vmatprep.subr.bf16.mxu0 %v962_v0  ;;  %869 = vmatprep.subr.bf16.mxu1 %v962_v0 }
  0x1b   :  { %850 = vmatpush3.bf16.msra.mxu0 %v934_v13  ;;  %870 = vmatpush3.bf16.msra.mxu1 %v935_v14 }
  0x1c   :  { %851 = vmatprep.subr.bf16.mxu0 %v962_v0  ;;  %871 = vmatprep.subr.bf16.mxu1 %v962_v0 }
  0x1f   :  { %852 = vmatpush3.bf16.msra.mxu0 %v936_v15  ;;  %872 = vmatpush3.bf16.msra.mxu1 %v937_v16 }
  0x20   :  { %877 = vmatprep.subr.bf16.mxu0 %v962_v0  ;;  %897 = vmatprep.subr.bf16.mxu1 %v962_v0 }
  0x22   :  { %854 = vmatmul.mubr.bf16.vlgmr.msra.gmra.mrb[0].mxu0 %v938_v17  ;;  %874 = vmatmul.mubr.bf16.vlgmr.msra.gmra.mrb[0].mxu1 %v939_v18 }
  0x23   :  { %878 = vmatpush3.bf16.msra.mxu0 %v940_v19  ;;  %898 = vmatpush3.bf16.msra.mxu1 %v941_v20 }
  0x24   :  { %879 = vmatprep.subr.bf16.mxu0 %v962_v0  ;;  %899 = vmatprep.subr.bf16.mxu1 %v962_v0 }
  0x25   :  { %893 = vmatprep.mubr.msk.bf16.mxu0 %vm963_vm0, %v962_v0  ;;  %913 = vmatprep.mubr.msk.bf16.mxu1 %vm963_vm0, %v962_v0 }
  0x27   :  { %880 = vmatpush3.bf16.msra.mxu0 %v942_v21  ;;  %900 = vmatpush3.bf16.msra.mxu1 %v943_v22 }
  0x28   :  { %881 = vmatprep.subr.bf16.mxu0 %v962_v0  ;;  %901 = vmatprep.subr.bf16.mxu1 %v962_v0 }
  0x2b   :  { %882 = vmatpush3.bf16.msra.mxu0 %v944_v23  ;;  %902 = vmatpush3.bf16.msra.mxu1 %v945_v24 }
  0x2c   :  { %883 = vmatprep.subr.bf16.mxu0 %v962_v0  ;;  %903 = vmatprep.subr.bf16.mxu1 %v962_v0 }
  0x2f   :  { %884 = vmatpush3.bf16.msra.mxu0 %v946_v25  ;;  %904 = vmatpush3.bf16.msra.mxu1 %v947_v26 }
  0x30   :  { %885 = vmatprep.subr.bf16.mxu0 %v962_v0  ;;  %905 = vmatprep.subr.bf16.mxu1 %v962_v0 }
  0x33   :  { %886 = vmatpush3.bf16.msra.mxu0 %v948_v27  ;;  %906 = vmatpush3.bf16.msra.mxu1 %v949_v28 }
  0x34   :  { %887 = vmatprep.subr.bf16.mxu0 %v962_v0  ;;  %907 = vmatprep.subr.bf16.mxu1 %v962_v0 }
  0x37   :  { %888 = vmatpush3.bf16.msra.mxu0 %v950_v29  ;;  %908 = vmatpush3.bf16.msra.mxu1 %v951_v30 }
  0x38   :  { %889 = vmatprep.subr.bf16.mxu0 %v962_v0  ;;  %909 = vmatprep.subr.bf16.mxu1 %v962_v0 }
  0x3b   :  { %890 = vmatpush3.bf16.msra.mxu0 %v952_v31  ;;  %910 = vmatpush3.bf16.msra.mxu1 %v953_v32 }
  0x3c   :  { %891 = vmatprep.subr.bf16.mxu0 %v962_v0  ;;  %911 = vmatprep.subr.bf16.mxu1 %v962_v0 }
  0x3f   :  { %892 = vmatpush3.bf16.msra.mxu0 %v954_v33  ;;  %912 = vmatpush3.bf16.msra.mxu1 %v955_v34 }
  0x42   :  { %894 = vmatmul.mubr.bf16.vlgmr.msra.gmra.mrb[4].mxu0 %v956_v35  ;;  %914 = vmatmul.mubr.bf16.vlgmr.msra.gmra.mrb[4].mxu1 %v957_v36 }
  0xf5   :  { %v1138_v37 = vpop.f32.mrb[0].mxu0  ;;  %v1140_v38 = vpop.f32.mrb[0].mxu1 }
  0xf6   :  { %133 = vadd.xlane.f32.xlu0 %v1138_v37  ;;  %v855_v39 = vpop.f32.mrb[1].mxu0  ;;  %265 = vadd.xlane.f32.xlu1 %v1140_v38  ;;  %v875_v41 = vpop.f32.mrb[1].mxu1  ;;  %v139_v45 = vmul.f32 %v1138_v37, %v1138_v37  ;;  %v271_v47 = vmul.f32 %v1140_v38, %v1140_v38 }
  0xf7   :  { %v1144_v40 = vpop.f32.mrb[2].mxu0  ;;  %v1146_v43 = vpop.f32.mrb[2].mxu1  ;;  %v553_v41 = vld [vmem:[%s1212_s2] sm:$0xff] }
  0xf8   :  { %v856_v42 = vpop.f32.mrb[3].mxu0  ;;  %v876_v44 = vpop.f32.mrb[3].mxu1  ;;  %v140_v46 = vmul.f32 %v1144_v40, %v1144_v40  ;;  %v272_v48 = vmul.f32 %v1146_v43, %v1146_v43 }
  0xf9   :  { %v554_v44 = vld [vmem:[%s1212_s2 + $0x8] sm:$0xff] }
  0xfa   :  { %135 = vadd.xlane.f32.xlu0 %v1144_v40  ;;  %267 = vadd.xlane.f32.xlu1 %v1146_v43 }
  0xfe   :  { %141 = vadd.xlane.f32.xlu0 %v139_v45  ;;  %143 = vadd.xlane.f32.xlu1 %v140_v46 }
 0x102   :  { %273 = vadd.xlane.f32.xlu0 %v271_v47  ;;  %275 = vadd.xlane.f32.xlu1 %v272_v48 }
 0x115   :  { %v1158_v49 = vpop.f32.mrb[4].mxu0  ;;  %v1160_v50 = vpop.f32.mrb[4].mxu1 }
 0x116   :  { %397 = vadd.xlane.f32.xlu0 %v1158_v49  ;;  %v895_v51 = vpop.f32.mrb[5].mxu0  ;;  %v915_v53 = vpop.f32.mrb[5].mxu1  ;;  %v403_v57 = vmul.f32 %v1158_v49, %v1158_v49  ;;  %v535_v59 = vmul.f32 %v1160_v50, %v1160_v50 }
 0x117   :  { %v1163_v52 = vpop.f32.mrb[6].mxu0  ;;  %v1165_v54 = vpop.f32.mrb[6].mxu1  ;;  %v561_v51 = vld [vmem:[%s1213_s3] sm:$0xff] }
 0x118   :  { %399 = vadd.xlane.f32.xlu1 %v1163_v52  ;;  %v896_v55 = vpop.f32.mrb[7].mxu0  ;;  %v916_v56 = vpop.f32.mrb[7].mxu1  ;;  %v404_v58 = vmul.f32 %v1163_v52, %v1163_v52  ;;  %v536_v60 = vmul.f32 %v1165_v54, %v1165_v54 }
 0x119   :  { %v562_v56 = vld [vmem:[%s1213_s3 + $0x8] sm:$0xff] }
 0x11a   :  { %529 = vadd.xlane.f32.xlu0 %v1160_v50 }
 0x11c   :  { %531 = vadd.xlane.f32.xlu1 %v1165_v54 }
 0x11e   :  { %405 = vadd.xlane.f32.xlu0 %v403_v57 }
 0x120   :  { %407 = vadd.xlane.f32.xlu1 %v404_v58 }
 0x122   :  { %537 = vadd.xlane.f32.xlu0 %v535_v59 }
 0x124   :  { %539 = vadd.xlane.f32.xlu1 %v536_v60 }
 0x183   :  { %v134_v62 = vpop.xlane.xlu0 %133  ;;  %v266_v63 = vpop.xlane.xlu1 %265 }
 0x184   :  { %v269_v8 = vadd.f32 %v266_v63, %v134_v62 }
 0x187   :  { %v136_v0 = vpop.xlane.xlu0 %135  ;;  %v268_v1 = vpop.xlane.xlu1 %267 }
 0x188   :  { %v270_v10 = vadd.f32 %v268_v1, %v136_v0 }
 0x18b   :  { %v142_v2 = vpop.xlane.xlu0 %141  ;;  %v144_v3 = vpop.xlane.xlu1 %143 }
 0x18f   :  { %v274_v4 = vpop.xlane.xlu0 %273  ;;  %v276_v5 = vpop.xlane.xlu1 %275 }
 0x190   :  { %v277_v16 = vadd.f32 %v274_v4, %v142_v2  ;;  %v278_v19 = vadd.f32 %v276_v5, %v144_v3 }
 0x1a3   :  { %v398_v6 = vpop.xlane.xlu0 %397 }
 0x1a4   :  { %v401_v11 = vadd.f32 %v398_v6, %v269_v8 }
 0x1a5   :  { %v400_v7 = vpop.xlane.xlu1 %399 }
 0x1a6   :  { %v402_v13 = vadd.f32 %v400_v7, %v270_v10 }
 0x1a7   :  { %v530_v9 = vpop.xlane.xlu0 %529 }
 0x1a8   :  { %v533_v14 = vadd.f32 %v530_v9, %v401_v11 }
 0x1a9   :  { %v532_v12 = vpop.xlane.xlu1 %531 }
 0x1aa   :  { %v534_v17 = vadd.f32 %v532_v12, %v402_v13  ;;  %v543_v20 = vmul.f32 0.001953125, %v533_v14 }
 0x1ab   :  { %v406_v15 = vpop.xlane.xlu0 %405 }
 0x1ac   :  { %v409_v21 = vadd.f32 %v406_v15, %v277_v16  ;;  %v544_v23 = vmul.f32 0.001953125, %v534_v17  ;;  %v547_v27 = vmul.f32 %v543_v20, %v543_v20 }
 0x1ad   :  { %v408_v18 = vpop.xlane.xlu1 %407 }
 0x1ae   :  { %v410_v24 = vadd.f32 %v408_v18, %v278_v19  ;;  %v548_v30 = vmul.f32 %v544_v23, %v544_v23 }
 0x1af   :  { %v538_v22 = vpop.xlane.xlu0 %537 }
 0x1b0   :  { %v541_v25 = vadd.f32 %v538_v22, %v409_v21 }
 0x1b1   :  { %v540_v26 = vpop.xlane.xlu1 %539 }
 0x1b2   :  { %v545_v28 = vmul.f32 0.001953125, %v541_v25  ;;  %v542_v29 = vadd.f32 %v540_v26, %v410_v24 }
 0x1b4   :  { %v549_v31 = vsub.f32 %v545_v28, %v547_v27  ;;  %v546_v32 = vmul.f32 0.001953125, %v542_v29 }
 0x1b6   :  { %v551_v33 = vmax.f32 %v549_v31, 0.0  ;;  %v550_v34 = vsub.f32 %v546_v32, %v548_v30 }
 0x1b8   :  { %v555_v35 = vadd.f32 1e-05, %v551_v33  ;;  %v552_v36 = vmax.f32 %v550_v34, 0.0 }
 0x1ba   :  { %958 = vrsqrt.f32 %v555_v35  ;;  %v556_v39 = vadd.f32 1e-05, %v552_v36 }
 0x1bc   :  { %960 = vrsqrt.f32 %v556_v39 }
 0x1c4   :  { %v959_v42 = vpop.eup %958 }
 0x1c5   :  { %v559_v45 = vmul.f32 %v959_v42, %v553_v41 }
 0x1c6   :  { %v961_v46 = vpop.eup %960 }
 0x1c7   :  { %571 = vperm.xlu0 %920, %v559_v45   ;;  %v560_v47 = vmul.f32 %v961_v46, %v554_v44  ;;  %v563_v48 = vmul.f32 %v559_v45, %v543_v20 }
 0x1c9   :  { %576 = vperm.xlu1 %921, %v560_v47   ;;  %v565_v53 = vsub.f32 %v561_v51, %v563_v48  ;;  %v564_v55 = vmul.f32 %v560_v47, %v544_v23 }
 0x1cb   :  { %v566_v57 = vsub.f32 %v562_v56, %v564_v55 }
 0x1cd   :  { %583 = vperm.xlu1 %921, %v565_v53  }
 0x1d1   :  { %588 = vperm.xlu1 %921, %v566_v57  }
 0x246   :  { %v572_v59 = vpop.permute.xlu0 %571 }
 0x247   :  { %v579_v60 = vmul.f32 %v572_v59, %v1138_v37  ;;  %v607_v61 = vmul.f32 %v572_v59, %v1140_v38  ;;  %v626_v62 = vmul.f32 %v572_v59, %v1158_v49  ;;  %v645_v63 = vmul.f32 %v572_v59, %v1160_v50 }
 0x248   :  { %v577_v58 = vpop.permute.xlu1 %576 }
 0x249   :  { %v580_v5 = vmul.f32 %v577_v58, %v1144_v40  ;;  %v608_v6 = vmul.f32 %v577_v58, %v1146_v43  ;;  %v627_v7 = vmul.f32 %v577_v58, %v1163_v52  ;;  %v646_v8 = vmul.f32 %v577_v58, %v1165_v54 }
 0x24c   :  { %v584_v0 = vpop.permute.xlu1 %583 }
 0x24d   :  { %v591_v1 = vadd.f32 %v584_v0, %v579_v60  ;;  %v609_v2 = vadd.f32 %v607_v61, %v584_v0  ;;  %v628_v3 = vadd.f32 %v626_v62, %v584_v0  ;;  %v647_v4 = vadd.f32 %v645_v63, %v584_v0 }
 0x24f   :  { %v593_v11 = vmax.f32 %v591_v1, 0.0  ;;  %v611_v50 = vmax.f32 %v609_v2, 0.0  ;;  %v630_v12 = vmax.f32 %v628_v3, 0.0  ;;  %v649_v13 = vmax.f32 %v647_v4, 0.0 }
 0x250   :  { %v589_v37 = vpop.permute.xlu1 %588 }
 0x251   :  { %v592_v9 = vadd.f32 %v589_v37, %v580_v5  ;;  %v610_v38 = vadd.f32 %v608_v6, %v589_v37  ;;  %v629_v10 = vadd.f32 %v627_v7, %v589_v37  ;;  %v648_v49 = vadd.f32 %v646_v8, %v589_v37 }
 0x253   :  { %v594_v14 = vmax.f32 %v592_v9, 0.0  ;;  %v612_v15 = vmax.f32 %v610_v38, 0.0  ;;  %v631_v16 = vmax.f32 %v629_v10, 0.0  ;;  %v650_v17 = vmax.f32 %v648_v49, 0.0 }
 0x255   :  { %v781_v40 = vpack.c.bf16 %v594_v14, %v593_v11  ;;  %v786_v18 = vpack.c.bf16 %v612_v15, %v611_v50  ;;  %v791_v43 = vpack.c.bf16 %v631_v16, %v630_v12  ;;  %v796_v19 = vpack.c.bf16 %v650_v17, %v649_v13 }
 0x257   :  { %782 = vst [vmem:[%s1214_s4] sm:$0xff] %v781_v40   ;;  %798 = vst [vmem:[%s1214_s4 + $0x8] sm:$0xff] %v786_v18  }
 0x258   :  { %799 = vst [vmem:[%s1214_s4 + $0x10] sm:$0xff] %v791_v43   ;;  %800 = vst [vmem:[%s1214_s4 + $0x18] sm:$0xff] %v796_v19  }

// kernel: generator_forward.8
= control target key start
LH: loop header
LB: loop body
LE: loop exit
PB: predicated region body
PF: predicated region fallthrough
CT: control target
= control target key end

     0   :  { %v1247_v1 = vmov 0   ;;  %vm115_vm0 = vcmask 523264   ;;  %s1615_s1 = inlined_call_operand.vmem [shape: bf16[4,64,512], index: 1, kind: input, shape index: {}]   ;;  %s1616_s0 = inlined_call_operand.vmem [shape: bf16[4,8,64], index: 0, kind: input, shape index: {}]   ;;  %s1617_s2 = inlined_call_operand.vmem [shape: f32[8,1], index: 2, kind: input, shape index: {}]   ;;  %s1618_s3 = inlined_call_operand.vmem [shape: f32[8,1], index: 3, kind: input, shape index: {}]   ;;  %s1619_s4 = inlined_call_operand.vmem [shape: bf16[4,8,512], index: 4, kind: output, shape index: {}]  }
   0x1   :  { %v1149_v0 = vld [vmem:[%s1615_s1 + $0x4] ss:$16 sps:$4 sm:$0xff]   ;;  %151 = vmatprep.mubr.bf16.mxu0 %v1247_v1  ;;  %192 = vmatprep.mubr.bf16.mxu1 %v1247_v1  ;;  %v1151_v2 = vld [vmem:[%s1615_s1 + $0xc] ss:$16 sps:$4 sm:$0xff]   ;;  %v1153_v3 = vld [vmem:[%s1615_s1] ss:$16 sps:$4 sm:$0xff]  }
   0x2   :  { %1147 = vset.pattern.permute.xlu0 %v1247_v1  ;;  %1148 = vset.pattern.permute.xlu1 %v1247_v1  ;;  %v1154_v4 = vld [vmem:[%s1615_s1 + $0x8] ss:$16 sps:$4 sm:$0xff]   ;;  %v1155_v5 = vld [vmem:[%s1615_s1 + $0x24] ss:$16 sps:$4 sm:$0xff]   ;;  %v1157_v6 = vld [vmem:[%s1615_s1 + $0x2c] ss:$16 sps:$4 sm:$0xff]  }
   0x3   :  { %119 = vmatprep.subr.bf16.mxu0 %v1149_v0  ;;  %160 = vmatprep.subr.bf16.mxu1 %v1151_v2  ;;  %v1159_v7 = vld [vmem:[%s1615_s1 + $0x20] ss:$16 sps:$4 sm:$0xff]   ;;  %v1160_v8 = vld [vmem:[%s1615_s1 + $0x28] ss:$16 sps:$4 sm:$0xff]   ;;  %v1161_v9 = vld [vmem:[%s1615_s1 + $0x44] ss:$16 sps:$4 sm:$0xff]  }
   0x4   :  { %120 = vmatpush1.bf16.msra.mxu0 %v1153_v3  ;;  %161 = vmatpush1.bf16.msra.mxu1 %v1154_v4  ;;  %v1163_v10 = vld [vmem:[%s1615_s1 + $0x4c] ss:$16 sps:$4 sm:$0xff]   ;;  %v1165_v11 = vld [vmem:[%s1615_s1 + $0x40] ss:$16 sps:$4 sm:$0xff]   ;;  %v1166_v12 = vld [vmem:[%s1615_s1 + $0x48] ss:$16 sps:$4 sm:$0xff]  }
   0x5   :  { %121 = vmatprep.subr.bf16.mxu0 %v1155_v5  ;;  %162 = vmatprep.subr.bf16.mxu1 %v1157_v6  ;;  %v1167_v13 = vld [vmem:[%s1615_s1 + $0x64] ss:$16 sps:$4 sm:$0xff]   ;;  %v1169_v14 = vld [vmem:[%s1615_s1 + $0x6c] ss:$16 sps:$4 sm:$0xff]   ;;  %v1171_v15 = vld [vmem:[%s1615_s1 + $0x60] ss:$16 sps:$4 sm:$0xff]  }
   0x6   :  { %v1172_v16 = vld [vmem:[%s1615_s1 + $0x68] ss:$16 sps:$4 sm:$0xff]   ;;  %v1175_v17 = vld [vmem:[%s1615_s1 + $0x84] ss:$16 sps:$4 sm:$0xff]   ;;  %v1178_v18 = vld [vmem:[%s1615_s1 + $0x8c] ss:$16 sps:$4 sm:$0xff]  }
   0x7   :  { %v18_v19 = vld [vmem:[%s1616_s0] sm:$0xf]  ;;  %v1176_v21 = vld [vmem:[%s1615_s1 + $0x88] ss:$16 sps:$4 sm:$0xff]   ;;  %v1181_v22 = vld [vmem:[%s1615_s1 + $0xa4] ss:$16 sps:$4 sm:$0xff]  }
   0x8   :  { %122 = vmatpush1.bf16.msra.mxu0 %v1159_v7  ;;  %163 = vmatpush1.bf16.msra.mxu1 %v1160_v8  ;;  %v1173_v20 = vld [vmem:[%s1615_s1 + $0x80] ss:$16 sps:$4 sm:$0xff]   ;;  %v1184_v23 = vld [vmem:[%s1615_s1 + $0xac] ss:$16 sps:$4 sm:$0xff]   ;;  %v1182_v25 = vld [vmem:[%s1615_s1 + $0xa8] ss:$16 sps:$4 sm:$0xff]  }
   0x9   :  { %123 = vmatprep.subr.bf16.mxu0 %v1161_v9  ;;  %164 = vmatprep.subr.bf16.mxu1 %v1163_v10  ;;  %v1179_v24 = vld [vmem:[%s1615_s1 + $0xa0] ss:$16 sps:$4 sm:$0xff]   ;;  %v1187_v26 = vld [vmem:[%s1615_s1 + $0xc4] ss:$16 sps:$4 sm:$0xff]   ;;  %v1190_v27 = vld [vmem:[%s1615_s1 + $0xcc] ss:$16 sps:$4 sm:$0xff]  }
   0xa   :  { %v1185_v28 = vld [vmem:[%s1615_s1 + $0xc0] ss:$16 sps:$4 sm:$0xff]   ;;  %v1188_v29 = vld [vmem:[%s1615_s1 + $0xc8] ss:$16 sps:$4 sm:$0xff]   ;;  %v1193_v30 = vld [vmem:[%s1615_s1 + $0xe4] ss:$16 sps:$4 sm:$0xff]  }
   0xb   :  { %v1196_v31 = vld [vmem:[%s1615_s1 + $0xec] ss:$16 sps:$4 sm:$0xff]   ;;  %v1191_v32 = vld [vmem:[%s1615_s1 + $0xe0] ss:$16 sps:$4 sm:$0xff]   ;;  %v1194_v33 = vld [vmem:[%s1615_s1 + $0xe8] ss:$16 sps:$4 sm:$0xff]  }
   0xc   :  { %124 = vmatpush1.bf16.msra.mxu0 %v1165_v11  ;;  %165 = vmatpush1.bf16.msra.mxu1 %v1166_v12  ;;  %v1199_v34 = vld [vmem:[%s1615_s1 + $0x104] ss:$16 sps:$4 sm:$0xff]   ;;  %v1202_v35 = vld [vmem:[%s1615_s1 + $0x10c] ss:$16 sps:$4 sm:$0xff]   ;;  %v1197_v37 = vld [vmem:[%s1615_s1 + $0x100] ss:$16 sps:$4 sm:$0xff]  }
   0xd   :  { %125 = vmatprep.subr.bf16.mxu0 %v1167_v13  ;;  %166 = vmatprep.subr.bf16.mxu1 %v1169_v14  ;;  %v1019_v36 = vld [vmem:[%s1616_s0 + $0x4] sm:$0xf]  ;;  %v1200_v38 = vld [vmem:[%s1615_s1 + $0x108] ss:$16 sps:$4 sm:$0xff]   ;;  %v1208_v40 = vld [vmem:[%s1615_s1 + $0x12c] ss:$16 sps:$4 sm:$0xff]  }
   0xe   :  { %v1205_v39 = vld [vmem:[%s1615_s1 + $0x124] ss:$16 sps:$4 sm:$0xff]   ;;  %v1203_v41 = vld [vmem:[%s1615_s1 + $0x120] ss:$16 sps:$4 sm:$0xff]   ;;  %v1206_v42 = vld [vmem:[%s1615_s1 + $0x128] ss:$16 sps:$4 sm:$0xff]  }
   0xf   :  { %v1211_v43 = vld [vmem:[%s1615_s1 + $0x144] ss:$16 sps:$4 sm:$0xff]   ;;  %v1214_v44 = vld [vmem:[%s1615_s1 + $0x14c] ss:$16 sps:$4 sm:$0xff]   ;;  %v1209_v45 = vld [vmem:[%s1615_s1 + $0x140] ss:$16 sps:$4 sm:$0xff]  }
  0x10   :  { %126 = vmatpush1.bf16.msra.mxu0 %v1171_v15  ;;  %167 = vmatpush1.bf16.msra.mxu1 %v1172_v16  ;;  %v1212_v46 = vld [vmem:[%s1615_s1 + $0x148] ss:$16 sps:$4 sm:$0xff]   ;;  %v1217_v47 = vld [vmem:[%s1615_s1 + $0x164] ss:$16 sps:$4 sm:$0xff]   ;;  %v1220_v48 = vld [vmem:[%s1615_s1 + $0x16c] ss:$16 sps:$4 sm:$0xff]  }
  0x11   :  { %323 = vmatprep.subr.bf16.mxu0 %v1175_v17  ;;  %364 = vmatprep.subr.bf16.mxu1 %v1178_v18  ;;  %v1215_v49 = vld [vmem:[%s1615_s1 + $0x160] ss:$16 sps:$4 sm:$0xff]   ;;  %v1218_v50 = vld [vmem:[%s1615_s1 + $0x168] ss:$16 sps:$4 sm:$0xff]   ;;  %v1223_v51 = vld [vmem:[%s1615_s1 + $0x184] ss:$16 sps:$4 sm:$0xff]  }
  0x12   :  { %v1226_v52 = vld [vmem:[%s1615_s1 + $0x18c] ss:$16 sps:$4 sm:$0xff]   ;;  %v1054_v53 = vld [vmem:[%s1616_s0 + $0x8] sm:$0xf]  ;;  %v1221_v54 = vld [vmem:[%s1615_s1 + $0x180] ss:$16 sps:$4 sm:$0xff]  }
  0x13   :  { %1017 = vmatmul.mubr.msk.bf16.vlgmr.msra.gmra.mrb[0].mxu0 %vm115_vm0, %v18_v19  ;;  %1018 = vmatmul.mubr.msk.bf16.vlgmr.msra.gmra.mrb[0].mxu1 %vm115_vm0, %v18_v19  ;;  %v1224_v55 = vld [vmem:[%s1615_s1 + $0x188] ss:$16 sps:$4 sm:$0xff]   ;;  %v1229_v56 = vld [vmem:[%s1615_s1 + $0x1a4] ss:$16 sps:$4 sm:$0xff]   ;;  %v1232_v57 = vld [vmem:[%s1615_s1 + $0x1ac] ss:$16 sps:$4 sm:$0xff]  }
  0x14   :  { %324 = vmatpush1.bf16.msra.mxu0 %v1173_v20  ;;  %365 = vmatpush1.bf16.msra.mxu1 %v1176_v21  ;;  %v1227_v58 = vld [vmem:[%s1615_s1 + $0x1a0] ss:$16 sps:$4 sm:$0xff]   ;;  %v1230_v59 = vld [vmem:[%s1615_s1 + $0x1a8] ss:$16 sps:$4 sm:$0xff]   ;;  %v1235_v60 = vld [vmem:[%s1615_s1 + $0x1c4] ss:$16 sps:$4 sm:$0xff]  }
  0x15   :  { %325 = vmatprep.subr.bf16.mxu0 %v1181_v22  ;;  %366 = vmatprep.subr.bf16.mxu1 %v1184_v23  ;;  %v1238_v61 = vld [vmem:[%s1615_s1 + $0x1cc] ss:$16 sps:$4 sm:$0xff]   ;;  %v1233_v62 = vld [vmem:[%s1615_s1 + $0x1c0] ss:$16 sps:$4 sm:$0xff]   ;;  %v1236_v63 = vld [vmem:[%s1615_s1 + $0x1c8] ss:$16 sps:$4 sm:$0xff]  }
  0x16   :  { %355 = vmatprep.mubr.bf16.mxu0 %v1247_v1  ;;  %396 = vmatprep.mubr.bf16.mxu1 %v1247_v1  ;;  %v1241_v0 = vld [vmem:[%s1615_s1 + $0x1e4] ss:$16 sps:$4 sm:$0xff]   ;;  %v1239_v2 = vld [vmem:[%s1615_s1 + $0x1e0] ss:$16 sps:$4 sm:$0xff]   ;;  %v1242_v3 = vld [vmem:[%s1615_s1 + $0x1e8] ss:$16 sps:$4 sm:$0xff]  }
  0x17   :  { %v1089_v4 = vld [vmem:[%s1616_s0 + $0xc] sm:$0xf] }
  0x18   :  { %326 = vmatpush1.bf16.msra.mxu0 %v1179_v24  ;;  %367 = vmatpush1.bf16.msra.mxu1 %v1182_v25 }
  0x19   :  { %327 = vmatprep.subr.bf16.mxu0 %v1187_v26  ;;  %368 = vmatprep.subr.bf16.mxu1 %v1190_v27 }
  0x1c   :  { %328 = vmatpush1.bf16.msra.mxu0 %v1185_v28  ;;  %369 = vmatpush1.bf16.msra.mxu1 %v1188_v29 }
  0x1d   :  { %329 = vmatprep.subr.bf16.mxu0 %v1193_v30  ;;  %370 = vmatprep.subr.bf16.mxu1 %v1196_v31 }
  0x20   :  { %330 = vmatpush1.bf16.msra.mxu0 %v1191_v32  ;;  %371 = vmatpush1.bf16.msra.mxu1 %v1194_v33 }
  0x21   :  { %528 = vmatprep.subr.bf16.mxu0 %v1199_v34  ;;  %569 = vmatprep.subr.bf16.mxu1 %v1202_v35 }
  0x23   :  { %1052 = vmatmul.mubr.msk.bf16.vlgmr.msra.gmra.mrb[4].mxu0 %vm115_vm0, %v1019_v36  ;;  %1053 = vmatmul.mubr.msk.bf16.vlgmr.msra.gmra.mrb[4].mxu1 %vm115_vm0, %v1019_v36 }
  0x24   :  { %529 = vmatpush1.bf16.msra.mxu0 %v1197_v37  ;;  %570 = vmatpush1.bf16.msra.mxu1 %v1200_v38 }
  0x25   :  { %530 = vmatprep.subr.bf16.mxu0 %v1205_v39  ;;  %571 = vmatprep.subr.bf16.mxu1 %v1208_v40 }
  0x26   :  { %560 = vmatprep.mubr.bf16.mxu0 %v1247_v1  ;;  %601 = vmatprep.mubr.bf16.mxu1 %v1247_v1 }
  0x28   :  { %531 = vmatpush1.bf16.msra.mxu0 %v1203_v41  ;;  %572 = vmatpush1.bf16.msra.mxu1 %v1206_v42 }
  0x29   :  { %532 = vmatprep.subr.bf16.mxu0 %v1211_v43  ;;  %573 = vmatprep.subr.bf16.mxu1 %v1214_v44 }
  0x2c   :  { %533 = vmatpush1.bf16.msra.mxu0 %v1209_v45  ;;  %574 = vmatpush1.bf16.msra.mxu1 %v1212_v46 }
  0x2d   :  { %534 = vmatprep.subr.bf16.mxu0 %v1217_v47  ;;  %575 = vmatprep.subr.bf16.mxu1 %v1220_v48 }
  0x30   :  { %535 = vmatpush1.bf16.msra.mxu0 %v1215_v49  ;;  %576 = vmatpush1.bf16.msra.mxu1 %v1218_v50 }
  0x31   :  { %733 = vmatprep.subr.bf16.mxu0 %v1223_v51  ;;  %774 = vmatprep.subr.bf16.mxu1 %v1226_v52 }
  0x33   :  { %1087 = vmatmul.mubr.msk.bf16.vlgmr.msra.gmra.mrb[8].mxu0 %vm115_vm0, %v1054_v53  ;;  %1088 = vmatmul.mubr.msk.bf16.vlgmr.msra.gmra.mrb[8].mxu1 %vm115_vm0, %v1054_v53 }
  0x34   :  { %734 = vmatpush1.bf16.msra.mxu0 %v1221_v54  ;;  %775 = vmatpush1.bf16.msra.mxu1 %v1224_v55 }
  0x35   :  { %735 = vmatprep.subr.bf16.mxu0 %v1229_v56  ;;  %776 = vmatprep.subr.bf16.mxu1 %v1232_v57 }
  0x36   :  { %765 = vmatprep.mubr.bf16.mxu0 %v1247_v1  ;;  %806 = vmatprep.mubr.bf16.mxu1 %v1247_v1  ;;  %v1244_v1 = vld [vmem:[%s1615_s1 + $0x1ec] ss:$16 sps:$4 sm:$0xff]  }
  0x38   :  { %736 = vmatpush1.bf16.msra.mxu0 %v1227_v58  ;;  %777 = vmatpush1.bf16.msra.mxu1 %v1230_v59 }
  0x39   :  { %737 = vmatprep.subr.bf16.mxu0 %v1235_v60  ;;  %778 = vmatprep.subr.bf16.mxu1 %v1238_v61 }
  0x3c   :  { %738 = vmatpush1.bf16.msra.mxu0 %v1233_v62  ;;  %779 = vmatpush1.bf16.msra.mxu1 %v1236_v63 }
  0x3d   :  { %739 = vmatprep.subr.bf16.mxu0 %v1241_v0  ;;  %780 = vmatprep.subr.bf16.mxu1 %v1244_v1 }
  0x40   :  { %740 = vmatpush1.bf16.msra.mxu0 %v1239_v2  ;;  %781 = vmatpush1.bf16.msra.mxu1 %v1242_v3 }
  0x43   :  { %1122 = vmatmul.mubr.msk.bf16.vlgmr.msra.gmra.mrb[12].mxu0 %vm115_vm0, %v1089_v4  ;;  %1123 = vmatmul.mubr.msk.bf16.vlgmr.msra.gmra.mrb[12].mxu1 %vm115_vm0, %v1089_v4 }
  0xe6   :  { %v1495_v5 = vpop.f32.mrb[0].mxu0  ;;  %v1497_v6 = vpop.f32.mrb[0].mxu1 }
  0xe7   :  { %v211_v7 = vmul.f32 %v1495_v5, %v1495_v5  ;;  %v1501_v8 = vpop.f32.mrb[1].mxu0  ;;  %v1503_v9 = vpop.f32.mrb[1].mxu1  ;;  %v213_v12 = vmul.f32 %v1497_v6, %v1497_v6 }
  0xe8   :  { %v205_v10 = vadd.f32 %v1501_v8, %v1495_v5  ;;  %v212_v11 = vmul.f32 %v1501_v8, %v1501_v8  ;;  %v157_v13 = vpop.f32.mrb[2].mxu0  ;;  %v198_v14 = vpop.f32.mrb[2].mxu1  ;;  %v214_v18 = vmul.f32 %v1503_v9, %v1503_v9 }
  0xe9   :  { %v158_v15 = vpop.f32.mrb[3].mxu0  ;;  %v199_v16 = vpop.f32.mrb[3].mxu1 }
  0xea   :  { %v206_v17 = vadd.f32 %v205_v10, %v1497_v6  ;;  %v215_v19 = vadd.f32 %v212_v11, %v211_v7 }
  0xec   :  { %v207_v20 = vadd.f32 %v206_v17, %v1503_v9  ;;  %v216_v21 = vadd.f32 %v215_v19, %v213_v12 }
  0xee   :  { %208 = vadd.xlane.f32.xlu0 %v207_v20  ;;  %v217_v22 = vadd.f32 %v216_v21, %v214_v18 }
  0xf0   :  { %218 = vadd.xlane.f32.xlu1 %v217_v22 }
  0xf6   :  { %v1515_v23 = vpop.f32.mrb[4].mxu0  ;;  %v1517_v24 = vpop.f32.mrb[4].mxu1 }
  0xf7   :  { %v416_v25 = vmul.f32 %v1515_v23, %v1515_v23  ;;  %v1521_v26 = vpop.f32.mrb[5].mxu0  ;;  %v1523_v27 = vpop.f32.mrb[5].mxu1  ;;  %v418_v30 = vmul.f32 %v1517_v24, %v1517_v24 }
  0xf8   :  { %v410_v28 = vadd.f32 %v1521_v26, %v1515_v23  ;;  %v417_v29 = vmul.f32 %v1521_v26, %v1521_v26  ;;  %v361_v31 = vpop.f32.mrb[6].mxu0  ;;  %v402_v32 = vpop.f32.mrb[6].mxu1  ;;  %v419_v36 = vmul.f32 %v1523_v27, %v1523_v27 }
  0xf9   :  { %v362_v33 = vpop.f32.mrb[7].mxu0  ;;  %v403_v34 = vpop.f32.mrb[7].mxu1 }
  0xfa   :  { %v411_v35 = vadd.f32 %v410_v28, %v1517_v24  ;;  %v420_v37 = vadd.f32 %v417_v29, %v416_v25 }
  0xfc   :  { %v412_v38 = vadd.f32 %v411_v35, %v1523_v27  ;;  %v421_v39 = vadd.f32 %v420_v37, %v418_v30 }
  0xfe   :  { %413 = vadd.xlane.f32.xlu0 %v412_v38  ;;  %v422_v40 = vadd.f32 %v421_v39, %v419_v36 }
 0x100   :  { %423 = vadd.xlane.f32.xlu1 %v422_v40 }
 0x106   :  { %v1535_v41 = vpop.f32.mrb[8].mxu0  ;;  %v1537_v42 = vpop.f32.mrb[8].mxu1 }
 0x107   :  { %v621_v43 = vmul.f32 %v1535_v41, %v1535_v41  ;;  %v1541_v44 = vpop.f32.mrb[9].mxu0  ;;  %v1543_v45 = vpop.f32.mrb[9].mxu1  ;;  %v623_v48 = vmul.f32 %v1537_v42, %v1537_v42 }
 0x108   :  { %v615_v46 = vadd.f32 %v1541_v44, %v1535_v41  ;;  %v622_v47 = vmul.f32 %v1541_v44, %v1541_v44  ;;  %v566_v49 = vpop.f32.mrb[10].mxu0  ;;  %v607_v50 = vpop.f32.mrb[10].mxu1  ;;  %v624_v54 = vmul.f32 %v1543_v45, %v1543_v45 }
 0x109   :  { %v567_v51 = vpop.f32.mrb[11].mxu0  ;;  %v608_v52 = vpop.f32.mrb[11].mxu1 }
 0x10a   :  { %v616_v53 = vadd.f32 %v615_v46, %v1537_v42  ;;  %v625_v55 = vadd.f32 %v622_v47, %v621_v43  ;;  %v841_v43 = vld [vmem:[%s1617_s2] sm:$0xff] }
 0x10c   :  { %v617_v56 = vadd.f32 %v616_v53, %v1543_v45  ;;  %v626_v57 = vadd.f32 %v625_v55, %v623_v48  ;;  %v845_v48 = vld [vmem:[%s1618_s3] sm:$0xff] }
 0x10e   :  { %618 = vadd.xlane.f32.xlu0 %v617_v56  ;;  %v627_v58 = vadd.f32 %v626_v57, %v624_v54 }
 0x110   :  { %628 = vadd.xlane.f32.xlu1 %v627_v58 }
 0x116   :  { %v1555_v59 = vpop.f32.mrb[12].mxu0  ;;  %v1557_v60 = vpop.f32.mrb[12].mxu1 }
 0x117   :  { %v826_v61 = vmul.f32 %v1555_v59, %v1555_v59  ;;  %v769_v62 = vpop.f32.mrb[13].mxu0  ;;  %v1561_v63 = vpop.f32.mrb[13].mxu1  ;;  %v828_v0 = vmul.f32 %v1557_v60, %v1557_v60 }
 0x118   :  { %v820_v1 = vadd.f32 %v769_v62, %v1555_v59  ;;  %v827_v2 = vmul.f32 %v769_v62, %v769_v62  ;;  %v771_v3 = vpop.f32.mrb[14].mxu0  ;;  %v812_v4 = vpop.f32.mrb[14].mxu1  ;;  %v829_v14 = vmul.f32 %v1561_v63, %v1561_v63 }
 0x119   :  { %v772_v7 = vpop.f32.mrb[15].mxu0  ;;  %v813_v10 = vpop.f32.mrb[15].mxu1 }
 0x11a   :  { %v821_v11 = vadd.f32 %v820_v1, %v1557_v60  ;;  %v830_v12 = vadd.f32 %v827_v2, %v826_v61 }
 0x11c   :  { %v822_v13 = vadd.f32 %v821_v11, %v1561_v63  ;;  %v831_v15 = vadd.f32 %v830_v12, %v828_v0 }
 0x11e   :  { %823 = vadd.xlane.f32.xlu0 %v822_v13  ;;  %v832_v16 = vadd.f32 %v831_v15, %v829_v14 }
 0x120   :  { %833 = vadd.xlane.f32.xlu1 %v832_v16 }
 0x17b   :  { %v209_v17 = vpop.xlane.xlu0 %208 }
 0x17d   :  { %v219_v18 = vpop.xlane.xlu1 %218 }
 0x18b   :  { %v414_v19 = vpop.xlane.xlu0 %413 }
 0x18c   :  { %v415_v22 = vadd.f32 %v414_v19, %v209_v17 }
 0x18d   :  { %v424_v20 = vpop.xlane.xlu1 %423 }
 0x18e   :  { %v425_v28 = vadd.f32 %v424_v20, %v219_v18 }
 0x19b   :  { %v619_v21 = vpop.xlane.xlu0 %618 }
 0x19c   :  { %v620_v29 = vadd.f32 %v619_v21, %v415_v22 }
 0x19d   :  { %v629_v25 = vpop.xlane.xlu1 %628 }
 0x19e   :  { %v630_v31 = vadd.f32 %v629_v25, %v425_v28 }
 0x1ab   :  { %v824_v30 = vpop.xlane.xlu0 %823 }
 0x1ac   :  { %v825_v32 = vadd.f32 %v824_v30, %v620_v29 }
 0x1ad   :  { %v834_v33 = vpop.xlane.xlu1 %833 }
 0x1ae   :  { %v836_v34 = vmul.f32 0.00048828125, %v825_v32  ;;  %v835_v35 = vadd.f32 %v834_v33, %v630_v31 }
 0x1b0   :  { %v838_v36 = vmul.f32 %v836_v34, %v836_v34  ;;  %v837_v37 = vmul.f32 0.00048828125, %v835_v35 }
 0x1b2   :  { %v839_v38 = vsub.f32 %v837_v37, %v838_v36 }
 0x1b4   :  { %v840_v39 = vmax.f32 %v839_v38, 0.0 }
 0x1b6   :  { %v842_v40 = vadd.f32 1e-05, %v840_v39 }
 0x1b8   :  { %1245 = vrsqrt.f32 %v842_v40 }
 0x1c2   :  { %v1246_v46 = vpop.eup %1245 }
 0x1c3   :  { %v844_v47 = vmul.f32 %v1246_v46, %v841_v43 }
 0x1c5   :  { %854 = vperm.xlu0 %1147, %v844_v47   ;;  %v846_v49 = vmul.f32 %v844_v47, %v836_v34 }
 0x1c7   :  { %v847_v50 = vsub.f32 %v845_v48, %v846_v49 }
 0x1c9   :  { %863 = vperm.xlu1 %1148, %v847_v50  }
 0x244   :  { %v855_v51 = vpop.permute.xlu0 %854 }
 0x245   :  { %v857_v52 = vmul.f32 %v855_v51, %v1495_v5  ;;  %v858_v53 = vmul.f32 %v855_v51, %v1501_v8  ;;  %v859_v54 = vmul.f32 %v855_v51, %v1497_v6  ;;  %v860_v55 = vmul.f32 %v855_v51, %v1503_v9 }
 0x246   :  { %v896_v56 = vmul.f32 %v855_v51, %v1515_v23  ;;  %v897_v57 = vmul.f32 %v855_v51, %v1521_v26  ;;  %v898_v58 = vmul.f32 %v855_v51, %v1517_v24  ;;  %v899_v61 = vmul.f32 %v855_v51, %v1523_v27 }
 0x247   :  { %v931_v0 = vmul.f32 %v855_v51, %v1535_v41  ;;  %v932_v1 = vmul.f32 %v855_v51, %v1541_v44  ;;  %v933_v5 = vmul.f32 %v855_v51, %v1537_v42  ;;  %v934_v8 = vmul.f32 %v855_v51, %v1543_v45 }
 0x248   :  { %v966_v6 = vmul.f32 %v855_v51, %v1555_v59  ;;  %v967_v2 = vmul.f32 %v855_v51, %v769_v62  ;;  %v968_v9 = vmul.f32 %v855_v51, %v1557_v60  ;;  %v969_v23 = vmul.f32 %v855_v51, %v1561_v63  ;;  %v864_v26 = vpop.permute.xlu1 %863 }
 0x249   :  { %v866_v3 = vadd.f32 %v864_v26, %v857_v52  ;;  %v867_v24 = vadd.f32 %v864_v26, %v858_v53  ;;  %v868_v4 = vadd.f32 %v864_v26, %v859_v54  ;;  %v869_v27 = vadd.f32 %v864_v26, %v860_v55 }
 0x24a   :  { %v900_v7 = vadd.f32 %v896_v56, %v864_v26  ;;  %v901_v41 = vadd.f32 %v897_v57, %v864_v26  ;;  %v902_v10 = vadd.f32 %v898_v58, %v864_v26  ;;  %v903_v44 = vadd.f32 %v899_v61, %v864_v26 }
 0x24b   :  { %v870_v11 = vmax.f32 %v866_v3, 0.0  ;;  %v871_v42 = vmax.f32 %v867_v24, 0.0  ;;  %v872_v12 = vmax.f32 %v868_v4, 0.0  ;;  %v873_v45 = vmax.f32 %v869_v27, 0.0 }
 0x24c   :  { %v904_v13 = vmax.f32 %v900_v7, 0.0  ;;  %v905_v59 = vmax.f32 %v901_v41, 0.0  ;;  %v906_v62 = vmax.f32 %v902_v10, 0.0  ;;  %v907_v14 = vmax.f32 %v903_v44, 0.0 }
 0x24d   :  { %v1138_v60 = vpack.c.bf16 %v871_v42, %v870_v11  ;;  %v1139_v15 = vpack.c.bf16 %v873_v45, %v872_v12  ;;  %v935_v63 = vadd.f32 %v931_v0, %v864_v26  ;;  %v936_v16 = vadd.f32 %v932_v1, %v864_v26 }
 0x24e   :  { %v1140_v17 = vpack.c.bf16 %v905_v59, %v904_v13  ;;  %v1141_v18 = vpack.c.bf16 %v907_v14, %v906_v62  ;;  %v937_v19 = vadd.f32 %v933_v5, %v864_v26  ;;  %v938_v20 = vadd.f32 %v934_v8, %v864_v26 }
 0x24f   :  { %890 = vst [vmem:[%s1619_s4] sm:$0xff] %v1138_v60  ;;  %891 = vst [vmem:[%s1619_s4 + $0x8] sm:$0xff] %v1139_v15  ;;  %v939_v21 = vmax.f32 %v935_v63, 0.0  ;;  %v940_v22 = vmax.f32 %v936_v16, 0.0  ;;  %v970_v25 = vadd.f32 %v966_v6, %v864_v26  ;;  %v971_v28 = vadd.f32 %v967_v2, %v864_v26 }
 0x250   :  { %1128 = vst [vmem:[%s1619_s4 + $0x10] sm:$0xff] %v1140_v17  ;;  %1129 = vst [vmem:[%s1619_s4 + $0x18] sm:$0xff] %v1141_v18  ;;  %v941_v29 = vmax.f32 %v937_v19, 0.0  ;;  %v942_v30 = vmax.f32 %v938_v20, 0.0  ;;  %v972_v31 = vadd.f32 %v968_v9, %v864_v26  ;;  %v973_v32 = vadd.f32 %v969_v23, %v864_v26 }
 0x251   :  { %v1142_v33 = vpack.c.bf16 %v940_v22, %v939_v21  ;;  %v974_v34 = vmax.f32 %v970_v25, 0.0  ;;  %v975_v35 = vmax.f32 %v971_v28, 0.0 }
 0x252   :  { %v1143_v36 = vpack.c.bf16 %v942_v30, %v941_v29  ;;  %v976_v37 = vmax.f32 %v972_v31, 0.0  ;;  %v977_v38 = vmax.f32 %v973_v32, 0.0 }
 0x253   :  { %1132 = vst [vmem:[%s1619_s4 + $0x20] sm:$0xff] %v1142_v33  ;;  %v1144_v39 = vpack.c.bf16 %v975_v35, %v974_v34 }
 0x254   :  { %1133 = vst [vmem:[%s1619_s4 + $0x28] sm:$0xff] %v1143_v36  ;;  %v1145_v40 = vpack.c.bf16 %v977_v38, %v976_v37 }
 0x255   :  { %1136 = vst [vmem:[%s1619_s4 + $0x30] sm:$0xff] %v1144_v39 }
 0x256   :  { %1137 = vst [vmem:[%s1619_s4 + $0x38] sm:$0xff] %v1145_v40 }

// kernel: generator_forward.9
= control target key start
LH: loop header
LB: loop body
LE: loop exit
PB: predicated region body
PF: predicated region fallthrough
CT: control target
= control target key end

     0   :  { %s1032_s9 = smov 0   ;;  %s1034_s10 = smov 0   ;;  %s1143_s0 = inlined_call_operand.vmem [shape: bf16[4,3,32], index: 0, kind: input, shape index: {}]   ;;  %s1144_s1 = inlined_call_operand.vmem [shape: bf16[4,32,2048], index: 1, kind: input, shape index: {}]   ;;  %s1145_s2 = inlined_call_operand.vmem [shape: f32[4,3,2048], index: 2, kind: output, shape index: {}]  }
   0x1   :  { %s1036_s11 = smov 0  }
   0x2 LB: > { %s24_s12 = sadd.s32 1, %s1010_s10  ;;  %p885_p0 = scmp.ge.s32.totalorder %s1014_s11, 1  ;;  %s1014_s11 = sphi %s1036_s11, %s12_s11   ;;  %s1010_s10 = sphi %s1034_s10, %s1147_s10   ;;  %s1006_s9 = sphi %s1032_s9, %s1146_s9  }
   0x3   : > { %p26_p1 = scmp.ge.s32.totalorder %s24_s12, 4  ;;  %p142_p2 = scmp.lt.s32.totalorder %s1014_s11, 5 }
   0x5   : > { %s1149_s12 = smov (%p26_p1, %s24_s12), 0  ;;  %p143_p3 = pnand %p885_p0, %p142_p2 }
   0x6   : > { %p176_p4 = scmp.lt.s32.totalorder (!%p143_p3), %s1006_s9, 3  ;;  %v1016_v0 = vmov (!%p143_p3), 0   ;;  %vm394_vm0 = vcmask (!%p143_p3), 261120  }
   0x7   : > { %146 = sbr.rel (%p143_p3) target bundleno = 282 (0x11a), region = 28  ;;  %430 = vmatprep.mubr.bf16.mxu0 (!%p143_p3), %v1016_v0  ;;  %471 = vmatprep.mubr.bf16.mxu1 (!%p143_p3), %v1016_v0 }
   0xe   : > { %s1151_s9 = smov (!%p176_p4, %s1006_s9), 3 }
   0xf   : > { %s933_s13 = sshll.u32 %s1151_s9, 8  ;;  %s886_s17 = sshll.u32 %s1151_s9, 1 }
  0x10   : > { %s1058_s16 = scalar_lea.vmem %s1144_s1, %s933_s13  ;;  %s179_s20 = scalar_lea.vmem %s1143_s0, %s886_s17 }
  0x11   : > { %v202_v1 = vld [vmem:[%s1058_s16] sm:$0xff]  ;;  %v203_v3 = vld [vmem:[%s1058_s16 + $0x8] sm:$0xff]  ;;  %v204_v15 = vld [vmem:[%s1058_s16 + $0x10] sm:$0xff]  ;;  %s934_s21 = sshll.u32 %s1151_s9, 6 }
  0x12   : > { %v210_v2 = vld [vmem:[%s1058_s16 + $0x40] sm:$0xff]  ;;  %v211_v5 = vld [vmem:[%s1058_s16 + $0x48] sm:$0xff]  ;;  %v212_v16 = vld [vmem:[%s1058_s16 + $0x50] sm:$0xff]  ;;  %s1124_s24 = scalar_lea.vmem %s1145_s2, %s934_s21 }
  0x13   : > { %v892_v4 = vcombine.high %v202_v1, %v210_v2  ;;  %v891_v6 = vcombine.low %v202_v1, %v210_v2  ;;  %v218_v7 = vld [vmem:[%s1058_s16 + $0x80] sm:$0xff]  ;;  %v894_v9 = vcombine.high %v203_v3, %v211_v5  ;;  %v893_v10 = vcombine.low %v203_v3, %v211_v5  ;;  %v219_v12 = vld [vmem:[%s1058_s16 + $0x88] sm:$0xff]  ;;  %v205_v17 = vld [vmem:[%s1058_s16 + $0x18] sm:$0xff] }
  0x14   : > { %v226_v8 = vld [vmem:[%s1058_s16 + $0xc0] sm:$0xff]  ;;  %v227_v13 = vld [vmem:[%s1058_s16 + $0xc8] sm:$0xff]  ;;  %v213_v19 = vld [vmem:[%s1058_s16 + $0x58] sm:$0xff]  ;;  %v896_v21 = vcombine.high %v204_v15, %v212_v16  ;;  %v895_v28 = vcombine.low %v204_v15, %v212_v16 }
  0x15   : > { %v908_v11 = vcombine.high %v218_v7, %v226_v8  ;;  %398 = vmatprep.subr.bf16.mxu0 %v892_v4  ;;  %v910_v14 = vcombine.high %v219_v12, %v227_v13  ;;  %439 = vmatprep.subr.bf16.mxu1 %v894_v9  ;;  %v907_v18 = vcombine.low %v218_v7, %v226_v8  ;;  %v220_v23 = vld [vmem:[%s1058_s16 + $0x90] sm:$0xff]  ;;  %v221_v25 = vld [vmem:[%s1058_s16 + $0x98] sm:$0xff]  ;;  %v1080_v27 = vld [vmem:[%s179_s20] sm:$0x3] }
  0x16   : > { %399 = vmatpush1.bf16.msra.mxu0 %v891_v6  ;;  %440 = vmatpush1.bf16.msra.mxu1 %v893_v10  ;;  %v909_v20 = vcombine.low %v219_v12, %v227_v13  ;;  %v898_v22 = vcombine.high %v205_v17, %v213_v19  ;;  %v228_v24 = vld [vmem:[%s1058_s16 + $0xd0] sm:$0xff]  ;;  %v229_v26 = vld [vmem:[%s1058_s16 + $0xd8] sm:$0xff]  ;;  %v897_v29 = vcombine.low %v205_v17, %v213_v19  ;;  %v206_v32 = vld [vmem:[%s1058_s16 + $0x20] sm:$0xff] }
  0x17   : > { %400 = vmatprep.subr.bf16.mxu0 %v908_v11  ;;  %441 = vmatprep.subr.bf16.mxu1 %v910_v14  ;;  %v912_v30 = vcombine.high %v220_v23, %v228_v24  ;;  %v914_v31 = vcombine.high %v221_v25, %v229_v26  ;;  %v214_v33 = vld [vmem:[%s1058_s16 + $0x60] sm:$0xff]  ;;  %v207_v34 = vld [vmem:[%s1058_s16 + $0x28] sm:$0xff]  ;;  %v911_v36 = vcombine.low %v220_v23, %v228_v24  ;;  %v208_v48 = vld [vmem:[%s1058_s16 + $0x30] sm:$0xff] }
  0x18   : > { %v215_v35 = vld [vmem:[%s1058_s16 + $0x68] sm:$0xff]  ;;  %v913_v37 = vcombine.low %v221_v25, %v229_v26  ;;  %v900_v38 = vcombine.high %v206_v32, %v214_v33  ;;  %v222_v40 = vld [vmem:[%s1058_s16 + $0xa0] sm:$0xff]  ;;  %v899_v44 = vcombine.low %v206_v32, %v214_v33  ;;  %v216_v49 = vld [vmem:[%s1058_s16 + $0x70] sm:$0xff] }
  0x19   : > { %v902_v39 = vcombine.high %v207_v34, %v215_v35  ;;  %v230_v41 = vld [vmem:[%s1058_s16 + $0xe0] sm:$0xff]  ;;  %v223_v42 = vld [vmem:[%s1058_s16 + $0xa8] sm:$0xff]  ;;  %v901_v45 = vcombine.low %v207_v34, %v215_v35  ;;  %v209_v50 = vld [vmem:[%s1058_s16 + $0x38] sm:$0xff]  ;;  %v904_v54 = vcombine.high %v208_v48, %v216_v49  ;;  %v903_v60 = vcombine.low %v208_v48, %v216_v49 }
  0x1a   : > { %401 = vmatpush1.bf16.msra.mxu0 %v907_v18  ;;  %442 = vmatpush1.bf16.msra.mxu1 %v909_v20  ;;  %v231_v43 = vld [vmem:[%s1058_s16 + $0xe8] sm:$0xff]  ;;  %v916_v46 = vcombine.high %v222_v40, %v230_v41  ;;  %v217_v51 = vld [vmem:[%s1058_s16 + $0x78] sm:$0xff]  ;;  %v915_v52 = vcombine.low %v222_v40, %v230_v41  ;;  %v224_v56 = vld [vmem:[%s1058_s16 + $0xb0] sm:$0xff] }
  0x1b   : > { %480 = vmatprep.subr.bf16.mxu0 %v896_v21  ;;  %521 = vmatprep.subr.bf16.mxu1 %v898_v22  ;;  %v918_v47 = vcombine.high %v223_v42, %v231_v43  ;;  %v917_v53 = vcombine.low %v223_v42, %v231_v43  ;;  %v906_v55 = vcombine.high %v209_v50, %v217_v51  ;;  %v232_v57 = vld [vmem:[%s1058_s16 + $0xf0] sm:$0xff]  ;;  %v225_v58 = vld [vmem:[%s1058_s16 + $0xb8] sm:$0xff] }
  0x1c   : > { %v233_v59 = vld [vmem:[%s1058_s16 + $0xf8] sm:$0xff]  ;;  %v905_v61 = vcombine.low %v209_v50, %v217_v51  ;;  %v920_v62 = vcombine.high %v224_v56, %v232_v57  ;;  %v919_v1 = vcombine.low %v224_v56, %v232_v57 }
  0x1d   : > { %923 = vmatmul.mubr.msk.bf16.vlgmr.msra.gmra.mrb[0].mxu0 %vm394_vm0, %v1080_v27  ;;  %924 = vmatmul.mubr.msk.bf16.vlgmr.msra.gmra.mrb[0].mxu1 %vm394_vm0, %v1080_v27  ;;  %v922_v63 = vcombine.high %v225_v58, %v233_v59  ;;  %v921_v2 = vcombine.low %v225_v58, %v233_v59 }
  0x1e   : > { %481 = vmatpush1.bf16.msra.mxu0 %v895_v28  ;;  %522 = vmatpush1.bf16.msra.mxu1 %v897_v29 }
  0x1f   : > { %482 = vmatprep.subr.bf16.mxu0 %v912_v30  ;;  %523 = vmatprep.subr.bf16.mxu1 %v914_v31 }
  0x20   : > { %512 = vmatprep.mubr.bf16.mxu0 %v1016_v0  ;;  %553 = vmatprep.mubr.bf16.mxu1 %v1016_v0 }
  0x22   : > { %483 = vmatpush1.bf16.msra.mxu0 %v911_v36  ;;  %524 = vmatpush1.bf16.msra.mxu1 %v913_v37 }
  0x23   : > { %562 = vmatprep.subr.bf16.mxu0 %v900_v38  ;;  %603 = vmatprep.subr.bf16.mxu1 %v902_v39 }
  0x25   : > { %925 = vmatmul.mubr.msk.bf16.vlgmr.msra.gmra.mrb[4].mxu0 %vm394_vm0, %v1080_v27  ;;  %926 = vmatmul.mubr.msk.bf16.vlgmr.msra.gmra.mrb[4].mxu1 %vm394_vm0, %v1080_v27 }
  0x26   : > { %563 = vmatpush1.bf16.msra.mxu0 %v899_v44  ;;  %604 = vmatpush1.bf16.msra.mxu1 %v901_v45 }
  0x27   : > { %564 = vmatprep.subr.bf16.mxu0 %v916_v46  ;;  %605 = vmatprep.subr.bf16.mxu1 %v918_v47 }
  0x28   : > { %594 = vmatprep.mubr.bf16.mxu0 %v1016_v0  ;;  %635 = vmatprep.mubr.bf16.mxu1 %v1016_v0 }
  0x2a   : > { %565 = vmatpush1.bf16.msra.mxu0 %v915_v52  ;;  %606 = vmatpush1.bf16.msra.mxu1 %v917_v53 }
  0x2b   : > { %644 = vmatprep.subr.bf16.mxu0 %v904_v54  ;;  %685 = vmatprep.subr.bf16.mxu1 %v906_v55 }
  0x2d   : > { %927 = vmatmul.mubr.msk.bf16.vlgmr.msra.gmra.mrb[8].mxu0 %vm394_vm0, %v1080_v27  ;;  %928 = vmatmul.mubr.msk.bf16.vlgmr.msra.gmra.mrb[8].mxu1 %vm394_vm0, %v1080_v27 }
  0x2e   : > { %645 = vmatpush1.bf16.msra.mxu0 %v903_v60  ;;  %686 = vmatpush1.bf16.msra.mxu1 %v905_v61 }
  0x2f   : > { %646 = vmatprep.subr.bf16.mxu0 %v920_v62  ;;  %687 = vmatprep.subr.bf16.mxu1 %v922_v63 }
  0x30   : > { %676 = vmatprep.mubr.bf16.mxu0 %v1016_v0  ;;  %717 = vmatprep.mubr.bf16.mxu1 %v1016_v0 }
  0x32   : > { %647 = vmatpush1.bf16.msra.mxu0 %v919_v1  ;;  %688 = vmatpush1.bf16.msra.mxu1 %v921_v2 }
  0x35   : > { %929 = vmatmul.mubr.msk.bf16.vlgmr.msra.gmra.mrb[12].mxu0 %vm394_vm0, %v1080_v27  ;;  %930 = vmatmul.mubr.msk.bf16.vlgmr.msra.gmra.mrb[12].mxu1 %vm394_vm0, %v1080_v27 }
  0xf0   : > { %v432_v3 = vpop.f32.mrb[0].mxu0  ;;  %v473_v4 = vpop.f32.mrb[0].mxu1 }
  0xf1   : > { %960 = vtanh.f32 %v432_v3  ;;  %v434_v5 = vpop.f32.mrb[1].mxu0  ;;  %v475_v6 = vpop.f32.mrb[1].mxu1 }
  0xf2   : > { %962 = vtanh.f32 %v473_v4  ;;  %v436_v7 = vpop.f32.mrb[2].mxu0  ;;  %v477_v8 = vpop.f32.mrb[2].mxu1 }
  0xf3   : > { %964 = vtanh.f32 %v434_v5  ;;  %v437_v9 = vpop.f32.mrb[3].mxu0  ;;  %v478_v0 = vpop.f32.mrb[3].mxu1 }
  0xf4   : > { %966 = vtanh.f32 %v475_v6 }
  0xf8   : > { %v514_v10 = vpop.f32.mrb[4].mxu0  ;;  %v555_v11 = vpop.f32.mrb[4].mxu1 }
  0xf9   : > { %968 = vtanh.f32 %v514_v10  ;;  %v516_v12 = vpop.f32.mrb[5].mxu0  ;;  %v557_v13 = vpop.f32.mrb[5].mxu1 }
  0xfa   : > { %970 = vtanh.f32 %v555_v11  ;;  %v518_v14 = vpop.f32.mrb[6].mxu0  ;;  %v559_v16 = vpop.f32.mrb[6].mxu1 }
  0xfb   : > { %v961_v15 = vpop.eup %960  ;;  %972 = vtanh.f32 %v516_v12  ;;  %v519_v17 = vpop.f32.mrb[7].mxu0 }
  0xfc   : > { %v963_v18 = vpop.eup %962  ;;  %974 = vtanh.f32 %v557_v13  ;;  %v560_v19 = vpop.f32.mrb[7].mxu1 }
  0xfd   : > { %v965_v20 = vpop.eup %964 }
  0xfe   : > { %v967_v21 = vpop.eup %966  ;;  %v758_v22 = vcombine.low %v961_v15, %v965_v20 }
  0xff   : > { %v759_v23 = vcombine.low %v963_v18, %v967_v21 }
 0x100   : > { %774 = vst [vmem:[%s1124_s24] sm:$0x77] %v758_v22  ;;  %v596_v24 = vpop.f32.mrb[8].mxu0  ;;  %v637_v25 = vpop.f32.mrb[8].mxu1 }
 0x101   : > { %775 = vst [vmem:[%s1124_s24 + $0x8] sm:$0x77] %v759_v23  ;;  %976 = vtanh.f32 %v596_v24  ;;  %v598_v26 = vpop.f32.mrb[9].mxu0  ;;  %v639_v27 = vpop.f32.mrb[9].mxu1 }
 0x102   : > { %978 = vtanh.f32 %v637_v25  ;;  %v600_v28 = vpop.f32.mrb[10].mxu0  ;;  %v641_v30 = vpop.f32.mrb[10].mxu1 }
 0x103   : > { %v969_v29 = vpop.eup %968  ;;  %980 = vtanh.f32 %v598_v26  ;;  %v601_v31 = vpop.f32.mrb[11].mxu0 }
 0x104   : > { %v971_v32 = vpop.eup %970  ;;  %982 = vtanh.f32 %v639_v27  ;;  %v642_v33 = vpop.f32.mrb[11].mxu1 }
 0x105   : > { %v973_v34 = vpop.eup %972 }
 0x106   : > { %v975_v35 = vpop.eup %974  ;;  %v760_v36 = vcombine.low %v969_v29, %v973_v34 }
 0x107   : > { %v761_v37 = vcombine.low %v971_v32, %v975_v35 }
 0x108   : > { %776 = vst [vmem:[%s1124_s24 + $0x10] sm:$0x77] %v760_v36  ;;  %v678_v38 = vpop.f32.mrb[12].mxu0  ;;  %v719_v39 = vpop.f32.mrb[12].mxu1 }
 0x109   : > { %777 = vst [vmem:[%s1124_s24 + $0x18] sm:$0x77] %v761_v37  ;;  %984 = vtanh.f32 %v678_v38  ;;  %v680_v40 = vpop.f32.mrb[13].mxu0  ;;  %v721_v41 = vpop.f32.mrb[13].mxu1 }
 0x10a   : > { %986 = vtanh.f32 %v719_v39  ;;  %v682_v42 = vpop.f32.mrb[14].mxu0  ;;  %v723_v44 = vpop.f32.mrb[14].mxu1 }
 0x10b   : > { %v977_v43 = vpop.eup %976  ;;  %988 = vtanh.f32 %v680_v40  ;;  %v683_v45 = vpop.f32.mrb[15].mxu0 }
 0x10c   : > { %v979_v46 = vpop.eup %978  ;;  %990 = vtanh.f32 %v721_v41  ;;  %v724_v47 = vpop.f32.mrb[15].mxu1 }
 0x10d   : > { %v981_v48 = vpop.eup %980 }
 0x10e   : > { %v983_v49 = vpop.eup %982  ;;  %v762_v50 = vcombine.low %v977_v43, %v981_v48 }
 0x10f   : > { %v763_v51 = vcombine.low %v979_v46, %v983_v49 }
 0x110   : > { %778 = vst [vmem:[%s1124_s24 + $0x20] sm:$0x77] %v762_v50 }
 0x111   : > { %779 = vst [vmem:[%s1124_s24 + $0x28] sm:$0x77] %v763_v51 }
 0x113   : > { %v985_v52 = vpop.eup %984 }
 0x114   : > { %v987_v53 = vpop.eup %986 }
 0x115   : > { %v989_v54 = vpop.eup %988 }
 0x116   : > { %v991_v55 = vpop.eup %990  ;;  %v764_v56 = vcombine.low %v985_v52, %v989_v54 }
 0x117   : > { %v765_v57 = vcombine.low %v987_v53, %v991_v55 }
 0x118   : > { %780 = vst [vmem:[%s1124_s24 + $0x30] sm:$0x77] %v764_v56 }
 0x119   : > { %781 = vst [vmem:[%s1124_s24 + $0x38] sm:$0x77] %v765_v57 }
 0x11a PF: > { %s12_s11 = sadd.s32 1, %s1014_s11   ;;  %s1146_s9 = smov %s1010_s10 }
 0x11b   : > { %p9_p5 = scmp.ge.s32.totalorder %s12_s11, 6   ;;  %s1147_s10 = smov %s1149_s12 }
 0x11d   :  { %11 = sbr.rel (!%p9_p5) target bundleno = 2 (0x2), region = 61 }

</bundles_post_ra>
